<compile_context>
chip_gen: v7x
topology: tpu7x:2x2x1
jax: 0.10.0
libtpu: 0.0.40
codegen_flags: <defaults>
</compile_context>

<pallas_src>
import functools

import jax
import jax.numpy as jnp
from jax.experimental import pallas as pl
from jax.experimental.pallas import tpu as pltpu


# ---------------------------------------------------------------------------
# Fused Bottleneck kernel (one image per grid step)
# ---------------------------------------------------------------------------
def _bottleneck_kernel(x_ref, w1_ref, s1_ref, b1_ref,
                       w2_ref, s2_ref, b2_ref,
                       w3_ref, s3_ref, b3_ref,
                       o_ref, hpad_ref):
    # x_ref   : (H, W, Cin)          bf16   (batch dim squeezed by BlockSpec)
    # w1_ref  : (Cin, P)             bf16
    # w2_ref  : (9*P, P)             bf16   row index = (dh*3 + dw)*P + cin
    # w3_ref  : (P, Cout)            bf16
    # s*/b*   : (1, C)               f32    (folded BatchNorm scale / bias)
    # o_ref   : (H, W, Cout)         bf16
    # hpad_ref: (H+2, Wpad, P)       bf16 VMEM scratch (zero-haloed conv1 out)
    h_dim, w_dim, cin = x_ref.shape
    planes = w1_ref.shape[1]
    cout = w3_ref.shape[1]
    hw = h_dim * w_dim

    x2d = x_ref[...].reshape(hw, cin)                                  # bf16

    # ---- conv1 (1x1) + bn1 + relu -> bf16 padded VMEM scratch ----
    h1 = jnp.dot(x2d, w1_ref[...], preferred_element_type=jnp.float32)
    h1 = jnp.maximum(h1 * s1_ref[...] + b1_ref[...], 0.0)              # f32

    # Zero only the halo border (interior is fully overwritten each step).
    zero_row = jnp.zeros((1, hpad_ref.shape[1], planes), hpad_ref.dtype)
    zero_col = jnp.zeros((h_dim, 1, planes), hpad_ref.dtype)
    hpad_ref[0:1, :, :] = zero_row
    hpad_ref[h_dim + 1:h_dim + 2, :, :] = zero_row
    hpad_ref[1:h_dim + 1, 0:1, :] = zero_col
    hpad_ref[1:h_dim + 1, w_dim + 1:w_dim + 2, :] = zero_col
    hpad_ref[1:h_dim + 1, 1:w_dim + 1, :] = (
        h1.astype(hpad_ref.dtype).reshape(h_dim, w_dim, planes))

    # ---- conv2 (3x3, pad=1, stride=1): one contraction with K = 9*P ----
    pieces = [
        hpad_ref[dh:dh + h_dim, dw:dw + w_dim, :].reshape(hw, planes)
        for dh in range(3) for dw in range(3)
    ]
    patches = jnp.concatenate(pieces, axis=-1)                         # (HW, 9P) bf16
    g = jnp.dot(patches, w2_ref[...], preferred_element_type=jnp.float32)
    g = jnp.maximum(g * s2_ref[...] + b2_ref[...], 0.0)                # f32

    # ---- conv3 (1x1) + bn3 + identity residual + relu ----
    out = jnp.dot(g.astype(jnp.bfloat16), w3_ref[...],
                  preferred_element_type=jnp.float32)
    out = out * s3_ref[...] + b3_ref[...] + x2d.astype(jnp.float32)
    out = jnp.maximum(out, 0.0)
    o_ref[...] = out.astype(o_ref.dtype).reshape(h_dim, w_dim, cout)


# ---------------------------------------------------------------------------
# Wrapper: BN folding, weight layout, pallas_call plumbing
# ---------------------------------------------------------------------------
def _fold_bn(gamma, beta, mean, var, eps=1e-5):
    scale = gamma / jnp.sqrt(var + eps)
    bias = beta - mean * scale
    return (scale.reshape(1, -1).astype(jnp.float32),
            bias.reshape(1, -1).astype(jnp.float32))


def bottleneck_forward_nhwc(x_nhwc, params, stride=1):
    """Fused Bottleneck on NHWC activations (downsample=None -> stride=1, Cin == 4*planes)."""
    if stride != 1:
        # TODO(synk): stride>1 needs the downsample residual path (None in this spec).
        raise NotImplementedError("fused kernel supports stride=1 / identity residual only")

    n, h, w, cin = x_nhwc.shape
    w1 = params["conv1_w"]            # (P, Cin, 1, 1)  torch layout
    w2 = params["conv2_w"]            # (P, P, 3, 3)
    w3 = params["conv3_w"]            # (Cout, P, 1, 1)
    planes = w1.shape[0]
    cout = w3.shape[0]
    assert cin == cout, "identity residual requires inplanes == planes * expansion"

    # bf16 MXU inputs (f32 accumulation + epilogue inside the kernel).
    x_bf = x_nhwc.astype(jnp.bfloat16)
    w1m = jnp.transpose(w1[:, :, 0, 0], (1, 0)).astype(jnp.bfloat16)        # (Cin, P)
    # (P_out, P_in, 3, 3) -> (kh, kw, cin, cout) -> (9*P_in, P_out); row = (dh*3+dw)*P + cin
    w2m = jnp.transpose(w2, (2, 3, 1, 0)).reshape(9 * planes, planes).astype(jnp.bfloat16)
    w3m = jnp.transpose(w3[:, :, 0, 0], (1, 0)).astype(jnp.bfloat16)        # (P, Cout)
    s1, b1 = _fold_bn(*params["bn1"])
    s2, b2 = _fold_bn(*params["bn2"])
    s3, b3 = _fold_bn(*params["bn3"])

    def _rep(arr):
        nd = arr.ndim
        return pl.BlockSpec(arr.shape, lambda i, _nd=nd: (0,) * _nd)   # fetched once

    in_specs = [
        pl.BlockSpec((None, h, w, cin), lambda i: (i, 0, 0, 0)),       # x (per image)
        _rep(w1m), _rep(s1), _rep(b1),
        _rep(w2m), _rep(s2), _rep(b2),
        _rep(w3m), _rep(s3), _rep(b3),
    ]
    out_specs = pl.BlockSpec((None, h, w, cout), lambda i: (i, 0, 0, 0))

    hw = h * w
    w_pad = ((w + 2 + 7) // 8) * 8                 # sublane-aligned scratch width
    b16, b32 = 2, 4

    # VMEM budget, including in-kernel temporaries (stacked patches + f32 accs).
    temporaries = (
        hw * 9 * planes * b16                       # stacked patch matrix
        + 2 * hw * planes * b32                     # conv1 / conv2 f32 results
        + hw * cout * b32                           # conv3 f32 result
        + hw * cin * b32                            # residual cast to f32
    )
    per_step = (
        2 * hw * cin * b16                          # x block, double-buffered
        + 2 * hw * cout * b16                       # bf16 out block, double-buffered
        + (h + 2) * w_pad * planes * b16            # padded hidden scratch (bf16)
        + 2 * (w1m.size + w2m.size + w3m.size) * b16
        + 4 * (2 * planes + cout) * b32             # folded BN scale/bias
        + temporaries
    )
    vmem_limit = int(min(max(int(1.5 * per_step), 16 << 20), 48 << 20))

    flops = 2 * n * hw * (cin * planes + 9 * planes * planes + planes * cout)
    bytes_accessed = (
        n * hw * cin * b16 + n * hw * cout * b16
        + (w1m.size + w2m.size + w3m.size) * b16
        + 2 * (2 * planes + cout) * b32
    )

    return pl.pallas_call(
        _bottleneck_kernel,
        out_shape=jax.ShapeDtypeStruct((n, h, w, cout), jnp.bfloat16),
        grid=(n,),
        in_specs=in_specs,
        out_specs=out_specs,
        scratch_shapes=[pltpu.VMEM((h + 2, w_pad, planes), jnp.bfloat16)],
        compiler_params=pltpu.CompilerParams(
            dimension_semantics=("parallel",),
            vmem_limit_bytes=vmem_limit),
        cost_estimate=pl.CostEstimate(
            flops=flops, transcendentals=0, bytes_accessed=bytes_accessed),
    )(x_bf, w1m, s1, b1, w2m, s2, b2, w3m, s3, b3)


def bottleneck_forward(x_nchw, params, stride=1):
    """PyTorch-parity entry point (NCHW in / NCHW out, bf16 output)."""
    # A full network should stay NHWC/bf16 and call bottleneck_forward_nhwc
    # directly to avoid these pure-layout HBM passes.
    x = jnp.transpose(x_nchw, (0, 2, 3, 1))
    out = bottleneck_forward_nhwc(x, params, stride=stride)
    return jnp.transpose(out, (0, 3, 1, 2))


# ---------------------------------------------------------------------------
# Pure-JAX f32 reference (PyTorch eval-mode semantics) for correctness check
# ---------------------------------------------------------------------------
def _bn_ref(x_nhwc, gamma, beta, mean, var, eps=1e-5):
    return (x_nhwc - mean) / jnp.sqrt(var + eps) * gamma + beta


def _conv_ref(x_nhwc, w_torch, stride, padding):
    w_hwio = jnp.transpose(w_torch, (2, 3, 1, 0))
    return jax.lax.conv_general_dilated(
        x_nhwc, w_hwio, window_strides=(stride, stride),
        padding=[(padding, padding), (padding, padding)],
        dimension_numbers=("NHWC", "HWIO", "NHWC"))


def bottleneck_ref(x_nchw, params, stride=1):
    x = jnp.transpose(x_nchw, (0, 2, 3, 1)).astype(jnp.float32)
    out = jax.nn.relu(_bn_ref(_conv_ref(x, params["conv1_w"], 1, 0), *params["bn1"]))
    out = jax.nn.relu(_bn_ref(_conv_ref(out, params["conv2_w"], stride, 1), *params["bn2"]))
    out = _bn_ref(_conv_ref(out, params["conv3_w"], 1, 0), *params["bn3"])
    out = jax.nn.relu(out + x)
    return jnp.transpose(out, (0, 3, 1, 2))


# ---------------------------------------------------------------------------
def make_params(key, inplanes, planes):
    expansion = 4
    kc1, kc2, kc3, kb1, kb2, kb3 = jax.random.split(key, 6)

    def bn(k, c):
        kg, kb, km, kv = jax.random.split(k, 4)
        return (0.5 + jax.random.uniform(kg, (c,), jnp.float32),
                0.1 * jax.random.normal(kb, (c,), jnp.float32),
                0.1 * jax.random.normal(km, (c,), jnp.float32),
                0.5 + jax.random.uniform(kv, (c,), jnp.float32))

    return {
        "conv1_w": 0.1 * jax.random.normal(kc1, (planes, inplanes, 1, 1), jnp.float32),
        "conv2_w": 0.1 * jax.random.normal(kc2, (planes, planes, 3, 3), jnp.float32),
        "conv3_w": 0.1 * jax.random.normal(kc3, (planes * expansion, planes, 1, 1), jnp.float32),
        "bn1": bn(kb1, planes),
        "bn2": bn(kb2, planes),
        "bn3": bn(kb3, planes * expansion),
    }


if __name__ == "__main__":
    key = jax.random.PRNGKey(0)
    k_x, k_p = jax.random.split(key)

    # Bottleneck(inplanes=128, planes=32, stride=1, downsample=None) -> out channels 128
    N, INPLANES, PLANES, H, W = 2, 128, 32, 16, 16
    x = jax.random.normal(k_x, (N, INPLANES, H, W), jnp.float32)
    params = make_params(k_p, INPLANES, PLANES)

    fwd = jax.jit(functools.partial(bottleneck_forward, stride=1))
    out = jax.block_until_ready(fwd(x, params))

    ref = bottleneck_ref(x, params, stride=1)
    assert out.shape == (N, PLANES * 4, H, W), out.shape
    # bf16 MXU inputs / bf16 hidden scratch / bf16 output with f32 accumulation:
    # compare to the f32 reference with a bf16-appropriate tolerance.
    out_f32 = out.astype(jnp.float32)
    assert jnp.allclose(out_f32, ref, atol=5e-2, rtol=5e-2), \
        float(jnp.max(jnp.abs(out_f32 - ref)))

    print("KERNEL_OK")
</pallas_src>

<mosaic_0001>
module attributes {stable_mosaic.version = 11 : i64} {
  func.func @_bottleneck_kernel(%arg0: i32, %arg1: memref<1x16x16x128xbf16, #tpu.memory_space<vmem>>, %arg2: memref<128x32xbf16, #tpu.memory_space<vmem>>, %arg3: memref<1x32xf32, #tpu.memory_space<vmem>>, %arg4: memref<1x32xf32, #tpu.memory_space<vmem>>, %arg5: memref<288x32xbf16, #tpu.memory_space<vmem>>, %arg6: memref<1x32xf32, #tpu.memory_space<vmem>>, %arg7: memref<1x32xf32, #tpu.memory_space<vmem>>, %arg8: memref<32x128xbf16, #tpu.memory_space<vmem>>, %arg9: memref<1x128xf32, #tpu.memory_space<vmem>>, %arg10: memref<1x128xf32, #tpu.memory_space<vmem>>, %arg11: memref<1x16x16x128xbf16, #tpu.memory_space<vmem>>, %arg12: memref<18x24x32xbf16, #tpu.memory_space<vmem>>) attributes {dimension_semantics = [#tpu.dimension_semantics<parallel>], iteration_bounds = array<i64: 2>, scalar_prefetch = 0 : i64, scratch_operands = 1 : i64, tpu.core_type = #tpu.core_type<tc>, window_params = [{transform_indices = @transform_0, window_bounds = array<i64: 1, 16, 16, 128>}, {pipeline_mode = #tpu.pipeline_mode<synchronous>, transform_indices = @transform_1, window_bounds = array<i64: 128, 32>}, {pipeline_mode = #tpu.pipeline_mode<synchronous>, transform_indices = @transform_2, window_bounds = array<i64: 1, 32>}, {pipeline_mode = #tpu.pipeline_mode<synchronous>, transform_indices = @transform_3, window_bounds = array<i64: 1, 32>}, {pipeline_mode = #tpu.pipeline_mode<synchronous>, transform_indices = @transform_4, window_bounds = array<i64: 288, 32>}, {pipeline_mode = #tpu.pipeline_mode<synchronous>, transform_indices = @transform_5, window_bounds = array<i64: 1, 32>}, {pipeline_mode = #tpu.pipeline_mode<synchronous>, transform_indices = @transform_6, window_bounds = array<i64: 1, 32>}, {pipeline_mode = #tpu.pipeline_mode<synchronous>, transform_indices = @transform_7, window_bounds = array<i64: 32, 128>}, {pipeline_mode = #tpu.pipeline_mode<synchronous>, transform_indices = @transform_8, window_bounds = array<i64: 1, 128>}, {pipeline_mode = #tpu.pipeline_mode<synchronous>, transform_indices = @transform_9, window_bounds = array<i64: 1, 128>}, {transform_indices = @transform_10, window_bounds = array<i64: 1, 16, 16, 128>}]} {
    %c0 = arith.constant 0 : index
    %c0_0 = arith.constant 0 : index
    %c0_1 = arith.constant 0 : index
    %c0_2 = arith.constant 0 : index
    %0 = vector.load %arg1[%c0, %c0_0, %c0_1, %c0_2] : memref<1x16x16x128xbf16, #tpu.memory_space<vmem>>, vector<1x16x16x128xbf16>
    %1 = vector.shape_cast %0 : vector<1x16x16x128xbf16> to vector<16x16x128xbf16>
    %2 = vector.shape_cast %1 : vector<16x16x128xbf16> to vector<256x128xbf16>
    %c0_3 = arith.constant 0 : index
    %c0_4 = arith.constant 0 : index
    %3 = vector.load %arg2[%c0_3, %c0_4] : memref<128x32xbf16, #tpu.memory_space<vmem>>, vector<128x32xbf16>
    %cst = arith.constant dense<0.000000e+00> : vector<256x32xf32>
    %4 = tpu.matmul %2, %3, %cst {dimension_numbers = #tpu.dot_dimension_numbers<[1], [0], [0], [1], [0, 0, 1, 1], [], []>} : vector<256x128xbf16>, vector<128x32xbf16>, vector<256x32xf32> -> vector<256x32xf32>
    %c0_5 = arith.constant 0 : index
    %c0_6 = arith.constant 0 : index
    %5 = vector.load %arg3[%c0_5, %c0_6] : memref<1x32xf32, #tpu.memory_space<vmem>>, vector<1x32xf32>
    %6 = vector.broadcast %5 : vector<1x32xf32> to vector<256x32xf32>
    %7 = arith.mulf %4, %6 : vector<256x32xf32>
    %c0_7 = arith.constant 0 : index
    %c0_8 = arith.constant 0 : index
    %8 = vector.load %arg4[%c0_7, %c0_8] : memref<1x32xf32, #tpu.memory_space<vmem>>, vector<1x32xf32>
    %9 = vector.broadcast %8 : vector<1x32xf32> to vector<256x32xf32>
    %10 = arith.addf %7, %9 : vector<256x32xf32>
    %cst_9 = arith.constant 0.000000e+00 : f32
    %11 = vector.broadcast %cst_9 : f32 to vector<256x32xf32>
    %12 = arith.maximumf %10, %11 : vector<256x32xf32>
    %cst_10 = arith.constant 0.000000e+00 : bf16
    %13 = vector.broadcast %cst_10 : bf16 to vector<1x24x32xbf16>
    %cst_11 = arith.constant 0.000000e+00 : bf16
    %14 = vector.broadcast %cst_11 : bf16 to vector<16x1x32xbf16>
    %c0_12 = arith.constant 0 : index
    %c0_13 = arith.constant 0 : index
    %c0_14 = arith.constant 0 : index
    %15 = vector.load %arg12[%c0_12, %c0_13, %c0_14] : memref<18x24x32xbf16, #tpu.memory_space<vmem>>, vector<1x24x32xbf16>
    tpu.vector_store %arg12[%c0_12, %c0_13, %c0_14], %13 {strides = array<i32>} : memref<18x24x32xbf16, #tpu.memory_space<vmem>>, vector<1x24x32xbf16>,
    %c17 = arith.constant 17 : index
    %c0_15 = arith.constant 0 : index
    %c0_16 = arith.constant 0 : index
    %16 = vector.load %arg12[%c17, %c0_15, %c0_16] : memref<18x24x32xbf16, #tpu.memory_space<vmem>>, vector<1x24x32xbf16>
    tpu.vector_store %arg12[%c17, %c0_15, %c0_16], %13 {strides = array<i32>} : memref<18x24x32xbf16, #tpu.memory_space<vmem>>, vector<1x24x32xbf16>,
    %c1 = arith.constant 1 : index
    %c0_17 = arith.constant 0 : index
    %c0_18 = arith.constant 0 : index
    %17 = vector.load %arg12[%c1, %c0_17, %c0_18] : memref<18x24x32xbf16, #tpu.memory_space<vmem>>, vector<16x1x32xbf16>
    tpu.vector_store %arg12[%c1, %c0_17, %c0_18], %14 {strides = array<i32>} : memref<18x24x32xbf16, #tpu.memory_space<vmem>>, vector<16x1x32xbf16>,
    %c1_19 = arith.constant 1 : index
    %c17_20 = arith.constant 17 : index
    %c0_21 = arith.constant 0 : index
    %18 = vector.load %arg12[%c1_19, %c17_20, %c0_21] : memref<18x24x32xbf16, #tpu.memory_space<vmem>>, vector<16x1x32xbf16>
    tpu.vector_store %arg12[%c1_19, %c17_20, %c0_21], %14 {strides = array<i32>} : memref<18x24x32xbf16, #tpu.memory_space<vmem>>, vector<16x1x32xbf16>,
    %19 = arith.truncf %12 : vector<256x32xf32> to vector<256x32xbf16>
    %20 = vector.shape_cast %19 : vector<256x32xbf16> to vector<16x16x32xbf16>
    %c1_22 = arith.constant 1 : index
    %c1_23 = arith.constant 1 : index
    %c0_24 = arith.constant 0 : index
    %21 = vector.load %arg12[%c1_22, %c1_23, %c0_24] : memref<18x24x32xbf16, #tpu.memory_space<vmem>>, vector<16x16x32xbf16>
    tpu.vector_store %arg12[%c1_22, %c1_23, %c0_24], %20 {strides = array<i32>} : memref<18x24x32xbf16, #tpu.memory_space<vmem>>, vector<16x16x32xbf16>,
    %c0_25 = arith.constant 0 : index
    %c0_26 = arith.constant 0 : index
    %c0_27 = arith.constant 0 : index
    %22 = vector.load %arg12[%c0_25, %c0_26, %c0_27] : memref<18x24x32xbf16, #tpu.memory_space<vmem>>, vector<16x16x32xbf16>
    %23 = vector.shape_cast %22 : vector<16x16x32xbf16> to vector<256x32xbf16>
    %c0_28 = arith.constant 0 : index
    %c1_29 = arith.constant 1 : index
    %c0_30 = arith.constant 0 : index
    %24 = vector.load %arg12[%c0_28, %c1_29, %c0_30] : memref<18x24x32xbf16, #tpu.memory_space<vmem>>, vector<16x16x32xbf16>
    %25 = vector.shape_cast %24 : vector<16x16x32xbf16> to vector<256x32xbf16>
    %c0_31 = arith.constant 0 : index
    %c2 = arith.constant 2 : index
    %c0_32 = arith.constant 0 : index
    %26 = vector.load %arg12[%c0_31, %c2, %c0_32] : memref<18x24x32xbf16, #tpu.memory_space<vmem>>, vector<16x16x32xbf16>
    %27 = vector.shape_cast %26 : vector<16x16x32xbf16> to vector<256x32xbf16>
    %c1_33 = arith.constant 1 : index
    %c0_34 = arith.constant 0 : index
    %c0_35 = arith.constant 0 : index
    %28 = vector.load %arg12[%c1_33, %c0_34, %c0_35] : memref<18x24x32xbf16, #tpu.memory_space<vmem>>, vector<16x16x32xbf16>
    %29 = vector.shape_cast %28 : vector<16x16x32xbf16> to vector<256x32xbf16>
    %c1_36 = arith.constant 1 : index
    %c1_37 = arith.constant 1 : index
    %c0_38 = arith.constant 0 : index
    %30 = vector.load %arg12[%c1_36, %c1_37, %c0_38] : memref<18x24x32xbf16, #tpu.memory_space<vmem>>, vector<16x16x32xbf16>
    %31 = vector.shape_cast %30 : vector<16x16x32xbf16> to vector<256x32xbf16>
    %c1_39 = arith.constant 1 : index
    %c2_40 = arith.constant 2 : index
    %c0_41 = arith.constant 0 : index
    %32 = vector.load %arg12[%c1_39, %c2_40, %c0_41] : memref<18x24x32xbf16, #tpu.memory_space<vmem>>, vector<16x16x32xbf16>
    %33 = vector.shape_cast %32 : vector<16x16x32xbf16> to vector<256x32xbf16>
    %c2_42 = arith.constant 2 : index
    %c0_43 = arith.constant 0 : index
    %c0_44 = arith.constant 0 : index
    %34 = vector.load %arg12[%c2_42, %c0_43, %c0_44] : memref<18x24x32xbf16, #tpu.memory_space<vmem>>, vector<16x16x32xbf16>
    %35 = vector.shape_cast %34 : vector<16x16x32xbf16> to vector<256x32xbf16>
    %c2_45 = arith.constant 2 : index
    %c1_46 = arith.constant 1 : index
    %c0_47 = arith.constant 0 : index
    %36 = vector.load %arg12[%c2_45, %c1_46, %c0_47] : memref<18x24x32xbf16, #tpu.memory_space<vmem>>, vector<16x16x32xbf16>
    %37 = vector.shape_cast %36 : vector<16x16x32xbf16> to vector<256x32xbf16>
    %c2_48 = arith.constant 2 : index
    %c2_49 = arith.constant 2 : index
    %c0_50 = arith.constant 0 : index
    %38 = vector.load %arg12[%c2_48, %c2_49, %c0_50] : memref<18x24x32xbf16, #tpu.memory_space<vmem>>, vector<16x16x32xbf16>
    %39 = vector.shape_cast %38 : vector<16x16x32xbf16> to vector<256x32xbf16>
    %40 = tpu.concatenate %23, %25, %27, %29, %31, %33, %35, %37, %39 in 1 : vector<256x32xbf16>, vector<256x32xbf16>, vector<256x32xbf16>, vector<256x32xbf16>, vector<256x32xbf16>, vector<256x32xbf16>, vector<256x32xbf16>, vector<256x32xbf16>, vector<256x32xbf16> -> vector<256x288xbf16>
    %c0_51 = arith.constant 0 : index
    %c0_52 = arith.constant 0 : index
    %41 = vector.load %arg5[%c0_51, %c0_52] : memref<288x32xbf16, #tpu.memory_space<vmem>>, vector<288x32xbf16>
    %cst_53 = arith.constant dense<0.000000e+00> : vector<256x32xf32>
    %42 = tpu.matmul %40, %41, %cst_53 {dimension_numbers = #tpu.dot_dimension_numbers<[1], [0], [0], [1], [0, 0, 1, 1], [], []>} : vector<256x288xbf16>, vector<288x32xbf16>, vector<256x32xf32> -> vector<256x32xf32>
    %c0_54 = arith.constant 0 : index
    %c0_55 = arith.constant 0 : index
    %43 = vector.load %arg6[%c0_54, %c0_55] : memref<1x32xf32, #tpu.memory_space<vmem>>, vector<1x32xf32>
    %44 = vector.broadcast %43 : vector<1x32xf32> to vector<256x32xf32>
    %45 = arith.mulf %42, %44 : vector<256x32xf32>
    %c0_56 = arith.constant 0 : index
    %c0_57 = arith.constant 0 : index
    %46 = vector.load %arg7[%c0_56, %c0_57] : memref<1x32xf32, #tpu.memory_space<vmem>>, vector<1x32xf32>
    %47 = vector.broadcast %46 : vector<1x32xf32> to vector<256x32xf32>
    %48 = arith.addf %45, %47 : vector<256x32xf32>
    %cst_58 = arith.constant 0.000000e+00 : f32
    %49 = vector.broadcast %cst_58 : f32 to vector<256x32xf32>
    %50 = arith.maximumf %48, %49 : vector<256x32xf32>
    %51 = arith.truncf %50 : vector<256x32xf32> to vector<256x32xbf16>
    %c0_59 = arith.constant 0 : index
    %c0_60 = arith.constant 0 : index
    %52 = vector.load %arg8[%c0_59, %c0_60] : memref<32x128xbf16, #tpu.memory_space<vmem>>, vector<32x128xbf16>
    %cst_61 = arith.constant dense<0.000000e+00> : vector<256x128xf32>
    %53 = tpu.matmul %51, %52, %cst_61 {dimension_numbers = #tpu.dot_dimension_numbers<[1], [0], [0], [1], [0, 0, 1, 1], [], []>} : vector<256x32xbf16>, vector<32x128xbf16>, vector<256x128xf32> -> vector<256x128xf32>
    %c0_62 = arith.constant 0 : index
    %c0_63 = arith.constant 0 : index
    %54 = vector.load %arg9[%c0_62, %c0_63] : memref<1x128xf32, #tpu.memory_space<vmem>>, vector<1x128xf32>
    %55 = vector.broadcast %54 : vector<1x128xf32> to vector<256x128xf32>
    %56 = arith.mulf %53, %55 : vector<256x128xf32>
    %c0_64 = arith.constant 0 : index
    %c0_65 = arith.constant 0 : index
    %57 = vector.load %arg10[%c0_64, %c0_65] : memref<1x128xf32, #tpu.memory_space<vmem>>, vector<1x128xf32>
    %58 = vector.broadcast %57 : vector<1x128xf32> to vector<256x128xf32>
    %59 = arith.addf %56, %58 : vector<256x128xf32>
    %60 = arith.extf %2 : vector<256x128xbf16> to vector<256x128xf32>
    %61 = arith.addf %59, %60 : vector<256x128xf32>
    %cst_66 = arith.constant 0.000000e+00 : f32
    %62 = vector.broadcast %cst_66 : f32 to vector<256x128xf32>
    %63 = arith.maximumf %61, %62 : vector<256x128xf32>
    %64 = arith.truncf %63 : vector<256x128xf32> to vector<256x128xbf16>
    %65 = vector.shape_cast %64 : vector<256x128xbf16> to vector<16x16x128xbf16>
    %c0_67 = arith.constant 0 : index
    %c0_68 = arith.constant 0 : index
    %c0_69 = arith.constant 0 : index
    %c0_70 = arith.constant 0 : index
    %66 = vector.load %arg11[%c0_67, %c0_68, %c0_69, %c0_70] : memref<1x16x16x128xbf16, #tpu.memory_space<vmem>>, vector<1x16x16x128xbf16>
    %67 = vector.shape_cast %66 : vector<1x16x16x128xbf16> to vector<16x16x128xbf16>
    %68 = vector.shape_cast %65 : vector<16x16x128xbf16> to vector<1x16x16x128xbf16>
    tpu.vector_store %arg11[%c0_67, %c0_68, %c0_69, %c0_70], %68 {strides = array<i32>} : memref<1x16x16x128xbf16, #tpu.memory_space<vmem>>, vector<1x16x16x128xbf16>,
    return
  }
  func.func @transform_0(%arg0: i32) -> (i32, i32, i32, i32) {
    %c0_i32 = arith.constant 0 : i32
    %c0_i32_0 = arith.constant 0 : i32
    %c0_i32_1 = arith.constant 0 : i32
    %c0_i32_2 = arith.constant 0 : i32
    return %arg0, %c0_i32, %c0_i32_0, %c0_i32_1 : i32, i32, i32, i32
  }
  func.func @transform_1(%arg0: i32) -> (i32, i32) {
    %c0_i32 = arith.constant 0 : i32
    %c0_i32_0 = arith.constant 0 : i32
    %c0_i32_1 = arith.constant 0 : i32
    return %c0_i32, %c0_i32_0 : i32, i32
  }
  func.func @transform_2(%arg0: i32) -> (i32, i32) {
    %c0_i32 = arith.constant 0 : i32
    %c0_i32_0 = arith.constant 0 : i32
    %c0_i32_1 = arith.constant 0 : i32
    return %c0_i32, %c0_i32_0 : i32, i32
  }
  func.func @transform_3(%arg0: i32) -> (i32, i32) {
    %c0_i32 = arith.constant 0 : i32
    %c0_i32_0 = arith.constant 0 : i32
    %c0_i32_1 = arith.constant 0 : i32
    return %c0_i32, %c0_i32_0 : i32, i32
  }
  func.func @transform_4(%arg0: i32) -> (i32, i32) {
    %c0_i32 = arith.constant 0 : i32
    %c0_i32_0 = arith.constant 0 : i32
    %c0_i32_1 = arith.constant 0 : i32
    return %c0_i32, %c0_i32_0 : i32, i32
  }
  func.func @transform_5(%arg0: i32) -> (i32, i32) {
    %c0_i32 = arith.constant 0 : i32
    %c0_i32_0 = arith.constant 0 : i32
    %c0_i32_1 = arith.constant 0 : i32
    return %c0_i32, %c0_i32_0 : i32, i32
  }
  func.func @transform_6(%arg0: i32) -> (i32, i32) {
    %c0_i32 = arith.constant 0 : i32
    %c0_i32_0 = arith.constant 0 : i32
    %c0_i32_1 = arith.constant 0 : i32
    return %c0_i32, %c0_i32_0 : i32, i32
  }
  func.func @transform_7(%arg0: i32) -> (i32, i32) {
    %c0_i32 = arith.constant 0 : i32
    %c0_i32_0 = arith.constant 0 : i32
    %c0_i32_1 = arith.constant 0 : i32
    return %c0_i32, %c0_i32_0 : i32, i32
  }
  func.func @transform_8(%arg0: i32) -> (i32, i32) {
    %c0_i32 = arith.constant 0 : i32
    %c0_i32_0 = arith.constant 0 : i32
    %c0_i32_1 = arith.constant 0 : i32
    return %c0_i32, %c0_i32_0 : i32, i32
  }
  func.func @transform_9(%arg0: i32) -> (i32, i32) {
    %c0_i32 = arith.constant 0 : i32
    %c0_i32_0 = arith.constant 0 : i32
    %c0_i32_1 = arith.constant 0 : i32
    return %c0_i32, %c0_i32_0 : i32, i32
  }
  func.func @transform_10(%arg0: i32) -> (i32, i32, i32, i32) {
    %c0_i32 = arith.constant 0 : i32
    %c0_i32_0 = arith.constant 0 : i32
    %c0_i32_1 = arith.constant 0 : i32
    %c0_i32_2 = arith.constant 0 : i32
    return %arg0, %c0_i32, %c0_i32_0, %c0_i32_1 : i32, i32, i32, i32
  }
}

</mosaic_0001>

<bundles_post_ra>
// kernel: bottleneck_forward.1
= control target key start
LH: loop header
LB: loop body
LE: loop exit
PB: predicated region body
PF: predicated region fallthrough
CT: control target
= control target key end

     0   :  { %15 = vsyncpa [#allocation4], 0  ;;  %s9219_s0 = inlined_call_operand.vmem [shape: bf16[2,16,16,128], index: 0, kind: input, shape index: {}]   ;;  %s9220_s1 = inlined_call_operand.vmem [shape: bf16[128,32], index: 1, kind: input, shape index: {}]   ;;  %s9221_s2 = inlined_call_operand.vmem [shape: f32[1,32], index: 2, kind: input, shape index: {}]   ;;  %s9222_s3 = inlined_call_operand.vmem [shape: f32[1,32], index: 3, kind: input, shape index: {}]   ;;  %s9223_s4 = inlined_call_operand.vmem [shape: bf16[288,32], index: 4, kind: input, shape index: {}]   ;;  %s9224_s5 = inlined_call_operand.vmem [shape: f32[1,32], index: 5, kind: input, shape index: {}]   ;;  %s9225_s6 = inlined_call_operand.vmem [shape: f32[1,32], index: 6, kind: input, shape index: {}]   ;;  %s9226_s7 = inlined_call_operand.vmem [shape: bf16[32,128], index: 7, kind: input, shape index: {}]   ;;  %s9227_s8 = inlined_call_operand.vmem [shape: f32[1,128], index: 8, kind: input, shape index: {}]   ;;  %s9228_s9 = inlined_call_operand.vmem [shape: f32[1,128], index: 9, kind: input, shape index: {}]   ;;  %s9229_s10 = inlined_call_operand.hbm [shape: bf16[2,16,16,128], index: 10, kind: output, shape index: {}]  }
   0x1   :  { %17 = vsyncpa [#allocation4 + $0x1], 0  ;;  %s6644_s13 = smov 0   ;;  %s6646_s14 = smov 0  }
   0x2   :  { %s6648_s15 = smov 0   ;;  %s6650_s16 = smov 0  }
   0x3 LB: > { %s6665_s17 = sadd.s32 4294967295, %s6581_s16   ;;  %s5501_s18 = sadd.s32 4294967294, %s6581_s16   ;;  %s6581_s16 = sphi %s6650_s16, %s9487_s16   ;;  %s6577_s15 = sphi %s6648_s15, %s9486_s15   ;;  %s6573_s14 = sphi %s6646_s14, %s9485_s14   ;;  %s6569_s13 = sphi %s6644_s13, %s9484_s13  }
   0x4   : > { %s6669_s19 = sadd.s32 1, %s6581_s16   ;;  %s245_s20 = sadd.s32 1, %s6577_s15 }
   0x5   : > { %s242_s21 = ssub.s32 %s6581_s16, %s6669_s19  ;;  %p255_p0 = scmp.ne.s32.totalorder %s6577_s15, %s6573_s14 }
   0x6   : > { %p243_p1 = scmp.eq.s32.totalorder %s242_s21, 0  ;;  %p256_p2 = scmp.eq.s32.totalorder %s6665_s17, 1 }
   0x7   : > { %p261_p3 = scmp.ne.s32.totalorder %s6573_s14, %s6569_s13  ;;  %p262_p4 = scmp.eq.s32.totalorder %s5501_s18, 1 }
   0x8   : > { %s6680_s22 = scalar_select %p243_p1, %s6577_s15, %s245_s20  }
   0x9   : > { %p6682_p5 = por %p256_p2, %p255_p0  ;;  %p6686_p6 = por %p262_p4, %p261_p3 }
   0xa   : > { %p5504_p7 = scmp.ge.s32.totalorder %s6581_s16, 1  ;;  %p315_p8 = scmp.lt.s32.totalorder %s6581_s16, 3 }
   0xc   : > { %p316_p9 = pnand %p5504_p7, %p315_p8 }
   0xe   : > { %319 = sbr.rel (%p316_p9) target bundleno = 1213 (0x4bd), region = 60 }
  0x15   : > { %v6364_v0 = vld [vmem:[%s9220_s1] sm:$0xff]   ;;  %p353_p10 = scmp.lt.s32.totalorder %s6665_s17, 1  ;;  %v6365_v1 = vld [vmem:[%s9220_s1 + $0x8] sm:$0xff]   ;;  %v6366_v2 = vld [vmem:[%s9220_s1 + $0x10] sm:$0xff]   ;;  %vm831_vm0 = vcmask 253952   ;;  %vm822_vm5 = vcmask 257024  }
  0x16   : > { %6184 = vmatprep.subr.bf16.mxu0 %v6364_v0  ;;  %6304 = vmatprep.subr.bf16.mxu1 %v6364_v0  ;;  %v6367_v3 = vld [vmem:[%s9220_s1 + $0x18] sm:$0xff]   ;;  %v6368_v6 = vld [vmem:[%s9220_s1 + $0x20] sm:$0xff]   ;;  %v6369_v7 = vld [vmem:[%s9220_s1 + $0x28] sm:$0xff]   ;;  %vm832_vm1 = vsmask.f32 256  ;;  %v6583_v42 = vmov 0  }
  0x17   : > { %s354_s29 = scalar_select %p353_p10, %s6665_s17, 1  ;;  %6185 = vmatpush3.bf16.msra.mxu0 %v6364_v0  ;;  %6312 = vmatpush3.bf16.msra.mxu1 %v6364_v0  ;;  %v6370_v8 = vld [vmem:[%s9220_s1 + $0x30] sm:$0xff]   ;;  %v6371_v9 = vld [vmem:[%s9220_s1 + $0x38] sm:$0xff]   ;;  %vm6740_vm2 = vmand %vm831_vm0, %vm832_vm1  ;;  %vm882_vm3 = vsmask.f32 7938  ;;  %vm1963_vm6 = vcmask 1042432  }
  0x18   : > { %6186 = vmatprep.subr.bf16.mxu0 %v6365_v1  ;;  %6305 = vmatprep.subr.bf16.mxu1 %v6365_v1  ;;  %v837_v25 = vld [vmem:[#allocation2 + $0x18] sm:$0x1]  ;;  %vm6747_vm4 = vmand %vm831_vm0, %vm882_vm3  ;;  %v834_v30 = vld [vmem:[#allocation2 + $0xc] sm:$0x1]  ;;  %823 = vst.msk [vmem:[#allocation2] sm:$0xf] %vm822_vm5, %v6583_v42 }
  0x19   : > { %s5851_s12 = sshll.u32 %s354_s29, 7  ;;  %v861_v26 = vld [vmem:[#allocation2 + $0x78] sm:$0x1]  ;;  %v838_v27 = vsel %vm6740_vm2, 0, %v837_v25  ;;  %v858_v31 = vld [vmem:[#allocation2 + $0x6c] sm:$0x1]  ;;  %vm6853_vm13 = vmand %vm822_vm5, %vm882_vm3 }
  0x1a   : > { %s6706_s21 = scalar_lea.vmem %s9219_s0, %s5851_s12  ;;  %v862_v29 = vsel %vm6740_vm2, 0, %v861_v26  ;;  %839 = vst [vmem:[#allocation2 + $0x18] sm:$0x1] %v838_v27  ;;  %v835_v32 = vsel %vm6740_vm2, 0, %v834_v30  ;;  %v859_v33 = vsel %vm6740_vm2, 0, %v858_v31  ;;  %vm1964_vm7 = vcmask 1046532  }
  0x1b   : > { %6187 = vmatpush3.bf16.msra.mxu0 %v6365_v1  ;;  %6313 = vmatpush3.bf16.msra.mxu1 %v6365_v1  ;;  %v359_v4 = vld [vmem:[%s6706_s21] sm:$0xff]   ;;  %v361_v10 = vld [vmem:[%s6706_s21 + $0x8] sm:$0xff]   ;;  %v363_v12 = vld [vmem:[%s6706_s21 + $0x10] sm:$0xff]   ;;  %863 = vst [vmem:[#allocation2 + $0x78] sm:$0x1] %v862_v29  ;;  %s6584_s25 = smov 64  }
  0x1c   : > { %6188 = vmatprep.subr.bf16.mxu0 %v6366_v2  ;;  %6306 = vmatprep.subr.bf16.mxu1 %v6366_v2  ;;  %v375_v5 = vld [vmem:[%s6706_s21 + $0x40] sm:$0xff]   ;;  %v377_v11 = vld [vmem:[%s6706_s21 + $0x48] sm:$0xff]   ;;  %v379_v13 = vld [vmem:[%s6706_s21 + $0x50] sm:$0xff]   ;;  %836 = vst [vmem:[#allocation2 + $0xc] sm:$0x1] %v835_v32  ;;  %s6585_s26 = smov 32  }
  0x1d   : > { %6200 = vmatprep.mubr.bf16.mxu0 %v359_v4  ;;  %6216 = vmatprep.mubr.bf16.mxu1 %v375_v5  ;;  %v365_v14 = vld [vmem:[%s6706_s21 + $0x18] sm:$0xff]   ;;  %v367_v16 = vld [vmem:[%s6706_s21 + $0x20] sm:$0xff]   ;;  %v369_v18 = vld [vmem:[%s6706_s21 + $0x28] sm:$0xff]   ;;  %860 = vst [vmem:[#allocation2 + $0x6c] sm:$0x1] %v859_v33  ;;  %s6586_s27 = smov 96  }
  0x1e   : > { %v381_v15 = vld [vmem:[%s6706_s21 + $0x58] sm:$0xff]   ;;  %v383_v17 = vld [vmem:[%s6706_s21 + $0x60] sm:$0xff]   ;;  %v385_v19 = vld [vmem:[%s6706_s21 + $0x68] sm:$0xff]   ;;  %824 = vst.msk [vmem:[#allocation2 + $0x4] sm:$0xf] %vm822_vm5, %v6583_v42  ;;  %vm3967_vm15 = vcmask 261120  }
  0x1f   : > { %6189 = vmatpush3.bf16.msra.mxu0 %v6366_v2  ;;  %6314 = vmatpush3.bf16.msra.mxu1 %v6366_v2  ;;  %v371_v20 = vld [vmem:[%s6706_s21 + $0x30] sm:$0xff]   ;;  %v373_v22 = vld [vmem:[%s6706_s21 + $0x38] sm:$0xff]   ;;  %v887_v34 = vld [vmem:[#allocation2 + $0x20] sm:$0x1]  ;;  %825 = vst.msk [vmem:[#allocation2 + $0x8] sm:$0xf] %vm822_vm5, %v6583_v42 }
  0x20   : > { %6190 = vmatprep.subr.bf16.mxu0 %v6367_v3  ;;  %6307 = vmatprep.subr.bf16.mxu1 %v6367_v3  ;;  %v387_v21 = vld [vmem:[%s6706_s21 + $0x70] sm:$0xff]   ;;  %v389_v23 = vld [vmem:[%s6706_s21 + $0x78] sm:$0xff]   ;;  %v888_v35 = vsel %vm6747_vm4, 0, %v887_v34  ;;  %v911_v36 = vld [vmem:[#allocation2 + $0x80] sm:$0x1]  ;;  %vm4016_vm0 = vcmask 523264  }
  0x21   : > { %889 = vst [vmem:[#allocation2 + $0x20] sm:$0x1] %v888_v35  ;;  %v912_v37 = vsel %vm6747_vm4, 0, %v911_v36  ;;  %v884_v38 = vld [vmem:[#allocation2 + $0x14] sm:$0x1]  ;;  %vm6777_vm8 = vmor %vm1963_vm6, %vm1964_vm7  ;;  %v6392_v35 = vld [vmem:[%s9223_s4 + $0x80] sm:$0xff]  }
  0x22   : > { %913 = vst [vmem:[#allocation2 + $0x80] sm:$0x1] %v912_v37  ;;  %v908_v39 = vld [vmem:[#allocation2 + $0x74] sm:$0x1]  ;;  %v885_v40 = vsel %vm6747_vm4, 0, %v884_v38  ;;  %v6394_v36 = vld [vmem:[%s9223_s4 + $0x88] sm:$0xff]  }
  0x23   : > { %6191 = vmatpush3.bf16.msra.mxu0 %v6367_v3  ;;  %6315 = vmatpush3.bf16.msra.mxu1 %v6367_v3  ;;  %v909_v41 = vsel %vm6747_vm4, 0, %v908_v39  ;;  %886 = vst [vmem:[#allocation2 + $0x14] sm:$0x1] %v885_v40  ;;  %827 = vst.msk [vmem:[#allocation2 + $0xcc] sm:$0xf] %vm822_vm5, %v6583_v42  ;;  %s350_s20 = sand.u32 1, %s6573_s14  }
  0x24   : > { %6192 = vmatprep.subr.bf16.mxu0 %v6368_v6  ;;  %6308 = vmatprep.subr.bf16.mxu1 %v6368_v6  ;;  %910 = vst [vmem:[#allocation2 + $0x74] sm:$0x1] %v909_v41  ;;  %828 = vst.msk [vmem:[#allocation2 + $0xd0] sm:$0xf] %vm822_vm5, %v6583_v42  ;;  %v1464_v44 = vld [vmem:[#allocation2] sm:$0xf] }
  0x25   : > { %829 = vst.msk [vmem:[#allocation2 + $0xd4] sm:$0xf] %vm822_vm5, %v6583_v42  ;;  %v1465_v43 = vld [vmem:[#allocation2 + $0x4] sm:$0xf]  ;;  %v843_v45 = vld [vmem:[#allocation2 + $0x30] sm:$0x1] }
  0x26   : > { %v840_v46 = vld [vmem:[#allocation2 + $0x24] sm:$0x1]  ;;  %v1516_v47 = vshrl.u32 %v1464_v44, 16  ;;  %v1519_v48 = vshll.u32 %v1464_v44, 16  ;;  %v844_v49 = vsel %vm6740_vm2, 0, %v843_v45  ;;  %v1525_v51 = vshll.u32 %v1465_v43, 16 }
  0x27   : > { %6193 = vmatpush3.bf16.msra.mxu0 %v6368_v6  ;;  %6316 = vmatpush3.bf16.msra.mxu1 %v6368_v6  ;;  %v841_v50 = vsel %vm6740_vm2, 0, %v840_v46  ;;  %v1529_v52 = vshrl.u32 %v1465_v43, 16  ;;  %845 = vst [vmem:[#allocation2 + $0x30] sm:$0x1] %v844_v49  ;;  %v1496_v55 = vld [vmem:[#allocation2 + $0x8] sm:$0x1] }
  0x28   : > { %6194 = vmatprep.subr.bf16.mxu0 %v6369_v7  ;;  %6309 = vmatprep.subr.bf16.mxu1 %v6369_v7  ;;  %842 = vst [vmem:[#allocation2 + $0x24] sm:$0x1] %v841_v50  ;;  %v1518_v53 = vrot.slane %v1516_v47, 4  ;;  %v1521_v54 = vrot.slane %v1519_v48, 5  ;;  %v1527_v56 = vrot.slane %v1525_v51, 5  ;;  %v1968_v58 = vrot.slane %v1465_v43, 5 }
  0x29   : > { %v1531_v57 = vrot.slane %v1529_v52, 4  ;;  %v890_v60 = vld [vmem:[#allocation2 + $0x2c] sm:$0x1]  ;;  %v1899_v61 = vld [vmem:[#allocation2] sm:$0xe]  ;;  %v1535_v63 = vshll.u32 %v1496_v55, 16 }
  0x2a   : > { %v1522_v59 = vor.u32 %v1521_v54, %v1518_v53  ;;  %v891_v0 = vsel %vm6747_vm4, 0, %v890_v60  ;;  %v5566_v1 = vrot.slane %v1899_v61, 9  ;;  %v893_v2 = vld [vmem:[#allocation2 + $0x38] sm:$0x1]  ;;  %v1970_v4 = vrot.slane %v1968_v58, 4  ;;  %s5505_s28 = sshll.u32 %s350_s20, 7 }
  0x2b   : > { %6195 = vmatpush3.bf16.msra.mxu0 %v6369_v7  ;;  %6317 = vmatpush3.bf16.msra.mxu1 %v6369_v7  ;;  %v1532_v62 = vor.u32 %v1531_v57, %v1527_v56  ;;  %892 = vst [vmem:[#allocation2 + $0x2c] sm:$0x1] %v891_v0  ;;  %v1971_v5 = vrot.slane %v1496_v55, 5  ;;  %vm1512_vm9 = vsmask.f32 3328  ;;  %v894_v6 = vsel %vm6747_vm4, 0, %v893_v2 }
  0x2c   : > { %6196 = vmatprep.subr.bf16.mxu0 %v6370_v8  ;;  %6310 = vmatprep.subr.bf16.mxu1 %v6370_v8  ;;  %v1969_v7 = vsel %vm6777_vm8, %v5566_v1, %v1968_v58  ;;  %vm1513_vm10 = vsmask.f32 7440  ;;  %895 = vst [vmem:[#allocation2 + $0x38] sm:$0x1] %v894_v6  ;;  %v855_v26 = vld [vmem:[#allocation2 + $0x60] sm:$0x1] }
  0x2d   : > { %vm6787_vm11 = vmor %vm1512_vm9, %vm1513_vm10  ;;  %v856_v27 = vsel %vm6740_vm2, 0, %v855_v26  ;;  %v852_v29 = vld [vmem:[#allocation2 + $0x54] sm:$0x1]  ;;  %v902_v31 = vld [vmem:[#allocation2 + $0x5c] sm:$0x1]  ;;  %s9077_s29 = scalar_lea.vmem [#allocation3], %s5505_s28 }
  0x2e   : > { %857 = vst [vmem:[#allocation2 + $0x60] sm:$0x1] %v856_v27  ;;  %v853_v30 = vsel %vm6740_vm2, 0, %v852_v29  ;;  %v903_v32 = vsel %vm6747_vm4, 0, %v902_v31  ;;  %v905_v33 = vld [vmem:[#allocation2 + $0x68] sm:$0x1] }
  0x2f   : > { %6197 = vmatpush3.bf16.msra.mxu0 %v6370_v8  ;;  %6318 = vmatpush3.bf16.msra.mxu1 %v6370_v8  ;;  %v1523_v8 = vrot.slane %v1522_v59, 4  ;;  %854 = vst [vmem:[#allocation2 + $0x54] sm:$0x1] %v853_v30  ;;  %904 = vst [vmem:[#allocation2 + $0x5c] sm:$0x1] %v903_v32  ;;  %v906_v34 = vsel %vm6747_vm4, 0, %v905_v33 }
  0x30   : > { %6198 = vmatprep.subr.bf16.mxu0 %v6371_v9  ;;  %6311 = vmatprep.subr.bf16.mxu1 %v6371_v9  ;;  %907 = vst [vmem:[#allocation2 + $0x68] sm:$0x1] %v906_v34  ;;  %v6822_v37 = vld [vmem:[%s9221_s2] ss:$0 sm:$0xff]  ;;  %vm1028_vm12 = vsmask.f32 4368 }
  0x31   : > { %v6827_v39 = vld [vmem:[%s9222_s3] ss:$0 sm:$0xff]  ;;  %v1359_v32 = vld [vmem:[#allocation2 + $0x18] sm:$0xf]  ;;  %vm6877_vm14 = vmor %vm832_vm1, %vm1028_vm12  ;;  %vm4049_vm1 = vcmask 785408   ;;  %s5439_s30 = sshll.u32 %s9077_s29, 4  ;;  %s9170_s30 = int_to_ptr.vmem [resolvable:$true] %s5439_s30 }
  0x32   : > { %v1415_v33 = vld [vmem:[#allocation2 + $0x78] sm:$0xf]  ;;  %s6587_s18 = smov [#allocation3]  }
  0x33   : > { %6199 = vmatpush3.bf16.msra.mxu0 %v6371_v9  ;;  %6319 = vmatpush3.bf16.msra.mxu1 %v6371_v9  ;;  %v1972_v9 = vsel %vm6777_vm8, %v1970_v4, %v1971_v5  ;;  %s6523_s28 = sshll.u32 %s6587_s18, 4  ;;  %s6524_s28 = int_to_ptr.vmem [resolvable:$false] %s6523_s28 }
  0x34   : > { %6232 = vmatprep.subr.bf16.mxu0 %v6392_v35  ;;  %p6526_p0 = scmp.lt.s32.totalorder %s9170_s30, %s6524_s28 }
  0x36   : > { %6201 = vmatmul.mubr.bf16.vlgmr.msra.gmra.mrb[0].mxu0 %v361_v10  ;;  %6217 = vmatmul.mubr.bf16.vlgmr.msra.gmra.mrb[0].mxu1 %v377_v11  ;;  %v1533_v11 = vrot.slane %v1532_v62, 4 }
  0x37   : > { %6204 = vmatprep.mubr.bf16.mxu0 %v363_v12  ;;  %6220 = vmatprep.mubr.bf16.mxu1 %v379_v13  ;;  %v1537_v12 = vrot.slane %v1535_v63, 5  ;;  %v5646_v13 = vcombine.low %v1969_v7, %v1972_v9 }
  0x38   : > { %6233 = vmatpush3.bf16.msra.mxu0 %v6392_v35 }
  0x39   : > { %3487 = vrot.lane.b32.xlu1 %v5646_v13, %s6584_s25  ;;  %6234 = vmatprep.subr.bf16.mxu0 %v6394_v36 }
  0x3c   : > { %6235 = vmatpush3.bf16.msra.mxu0 %v6394_v36 }
  0x3e   : > { %6205 = vmatmul.mubr.bf16.gmra.mrb[4].mxu0 %v365_v14  ;;  %6221 = vmatmul.mubr.bf16.gmra.mrb[4].mxu1 %v381_v15  ;;  %v1528_v14 = vsel %vm6787_vm11, %v1523_v8, %v1527_v56  ;;  %v1538_v15 = vsel %vm6787_vm11, %v1533_v11, %v1537_v12 }
  0x3f   : > { %6208 = vmatprep.mubr.bf16.mxu0 %v367_v16  ;;  %6224 = vmatprep.mubr.bf16.mxu1 %v383_v17  ;;  %v5630_v16 = vcombine.low %v1528_v14, %v1538_v15  ;;  %v846_v17 = vld [vmem:[#allocation2 + $0x3c] sm:$0x1] }
  0x41   : > { %3407 = vrot.lane.b32.xlu0 %v5630_v16, %s6585_s26 }
  0x46   : > { %6209 = vmatmul.mubr.bf16.gmra.mrb[8].mxu0 %v369_v18  ;;  %6225 = vmatmul.mubr.bf16.gmra.mrb[8].mxu1 %v385_v19  ;;  %v896_v18 = vld [vmem:[#allocation2 + $0x44] sm:$0x1]  ;;  %v849_v19 = vld [vmem:[#allocation2 + $0x48] sm:$0x1] }
  0x47   : > { %6212 = vmatprep.mubr.bf16.mxu0 %v371_v20  ;;  %6228 = vmatprep.mubr.bf16.mxu1 %v387_v21  ;;  %v847_v20 = vsel %vm6740_vm2, 0, %v846_v17  ;;  %v897_v21 = vsel %vm6747_vm4, 0, %v896_v18 }
  0x48   : > { %848 = vst [vmem:[#allocation2 + $0x3c] sm:$0x1] %v847_v20  ;;  %898 = vst [vmem:[#allocation2 + $0x44] sm:$0x1] %v897_v21 }
  0x4e   : > { %6213 = vmatmul.mubr.bf16.gmra.mrb[12].mxu0 %v373_v22  ;;  %6229 = vmatmul.mubr.bf16.gmra.mrb[12].mxu1 %v389_v23  ;;  %v850_v22 = vsel %vm6740_vm2, 0, %v849_v19  ;;  %v899_v23 = vld [vmem:[#allocation2 + $0x50] sm:$0x1] }
  0x4f   : > { %851 = vst [vmem:[#allocation2 + $0x48] sm:$0x1] %v850_v22  ;;  %v900_v25 = vsel %vm6747_vm4, 0, %v899_v23 }
  0x50   : > { %901 = vst [vmem:[#allocation2 + $0x50] sm:$0x1] %v900_v25 }
 0x109   : > { %v6202_v38 = vpop.f32.mrb[0].mxu0  ;;  %v6218_v40 = vpop.f32.mrb[0].mxu1 }
 0x10a   : > { %v721_v41 = vmul.f32 %v6202_v38, %v6822_v37  ;;  %v737_v42 = vmul.f32 %v6218_v40, %v6822_v37  ;;  %v585_v43 = vpop.f32.mrb[1].mxu0  ;;  %v649_v44 = vpop.f32.mrb[1].mxu1 }
 0x10b   : > { %v719_v45 = vmul.f32 %v6822_v37, %v585_v43  ;;  %v735_v46 = vmul.f32 %v6822_v37, %v649_v44  ;;  %v6203_v47 = vpop.f32.mrb[2].mxu0  ;;  %v6219_v48 = vpop.f32.mrb[2].mxu1  ;;  %v1352_v44 = vld [vmem:[#allocation2 + $0xc] sm:$0xf] }
 0x10c   : > { %v760_v49 = vadd.f32 %v6827_v39, %v721_v41  ;;  %v776_v50 = vadd.f32 %v6827_v39, %v737_v42  ;;  %v722_v51 = vmul.f32 %v6203_v47, %v6822_v37  ;;  %v738_v52 = vmul.f32 %v6219_v48, %v6822_v37  ;;  %v588_v53 = vpop.f32.mrb[3].mxu0  ;;  %v652_v54 = vpop.f32.mrb[3].mxu1 }
 0x10d   : > { %v758_v55 = vadd.f32 %v6827_v39, %v719_v45  ;;  %v774_v56 = vadd.f32 %v6827_v39, %v735_v46  ;;  %v720_v57 = vmul.f32 %v6822_v37, %v588_v53  ;;  %v736_v58 = vmul.f32 %v6822_v37, %v652_v54  ;;  %v1408_v45 = vld [vmem:[#allocation2 + $0x6c] sm:$0xf] }
 0x10e   : > { %v792_v59 = vmax.f32 %v760_v49, 0.0  ;;  %v808_v60 = vmax.f32 %v776_v50, 0.0  ;;  %v761_v61 = vadd.f32 %v6827_v39, %v722_v51  ;;  %v777_v62 = vadd.f32 %v6827_v39, %v738_v52 }
 0x10f   : > { %v790_v63 = vmax.f32 %v758_v55, 0.0  ;;  %v806_v0 = vmax.f32 %v774_v56, 0.0  ;;  %v759_v1 = vadd.f32 %v6827_v39, %v720_v57  ;;  %v775_v2 = vadd.f32 %v6827_v39, %v736_v58 }
 0x110   : > { %v5854_v4 = vpack.c.bf16 %v792_v59, %v792_v59  ;;  %v5870_v5 = vpack.c.bf16 %v808_v60, %v808_v60  ;;  %v793_v6 = vmax.f32 %v761_v61, 0.0  ;;  %v809_v7 = vmax.f32 %v777_v62, 0.0 }
 0x111   : > { %v5852_v8 = vpack.c.bf16 %v790_v63, %v790_v63  ;;  %v5868_v9 = vpack.c.bf16 %v806_v0, %v806_v0  ;;  %v791_v11 = vmax.f32 %v759_v1, 0.0  ;;  %v807_v12 = vmax.f32 %v775_v2, 0.0  ;;  %v6206_v13 = vpop.f32.mrb[4].mxu0  ;;  %v1363_v1 = vld [vmem:[#allocation2 + $0x20] sm:$0x1] }
 0x112   : > { %v1048_v14 = vshrl.u32 %v5854_v4, 16  ;;  %v1051_v15 = vshll.u32 %v5854_v4, 16  ;;  %v1184_v16 = vshrl.u32 %v5870_v5, 16  ;;  %v1187_v17 = vshll.u32 %v5870_v5, 16  ;;  %v601_v18 = vpop.f32.mrb[5].mxu0 }
 0x113   : > { %v1031_v19 = vshrl.u32 %v5852_v8, 16  ;;  %v1034_v20 = vshll.u32 %v5852_v8, 16  ;;  %v1167_v21 = vshrl.u32 %v5868_v9, 16  ;;  %v1170_v22 = vshll.u32 %v5868_v9, 16  ;;  %v6845_v23 = vpop.f32.mrb[6].mxu0 }
 0x114   : > { %v1050_v25 = vrot.slane %v1048_v14, 7  ;;  %v6847_v26 = vrot.slane %v1184_v16, 7  ;;  %v5855_v27 = vpack.c.bf16 %v793_v6, %v793_v6  ;;  %v5871_v29 = vpack.c.bf16 %v809_v7, %v809_v7  ;;  %v6849_v30 = vpop.f32.mrb[7].mxu0 }
 0x115   : > { %v6857_v34 = vrot.slane %v1031_v19, 7  ;;  %v6859_v35 = vrot.slane %v1167_v21, 7  ;;  %v5853_v36 = vpack.c.bf16 %v791_v11, %v791_v11  ;;  %v5869_v38 = vpack.c.bf16 %v807_v12, %v807_v12  ;;  %v1419_v11 = vld [vmem:[#allocation2 + $0x80] sm:$0x1]  ;;  %v1356_v19 = vld [vmem:[#allocation2 + $0x14] sm:$0x1] }
 0x116   : > { %v1053_v40 = vor.u32 %v1051_v15, %v1050_v25  ;;  %v1054_v41 = vrot.slane %v1050_v25, 4  ;;  %v1189_v42 = vor.u32 %v1187_v17, %v6847_v26  ;;  %v1190_v43 = vrot.slane %v6847_v26, 4  ;;  %v1412_v26 = vld [vmem:[#allocation2 + $0x74] sm:$0x1] }
 0x117   : > { %v1036_v46 = vor.u32 %v1034_v20, %v6857_v34  ;;  %v1037_v47 = vrot.slane %v6857_v34, 4  ;;  %v1172_v48 = vor.u32 %v1170_v22, %v6859_v35  ;;  %v1173_v49 = vrot.slane %v6859_v35, 4 }
 0x118   : > { %v1360_v50 = vsel %vm6853_vm13, %v1053_v40, %v1359_v32  ;;  %v1416_v51 = vsel %vm6853_vm13, %v1189_v42, %v1415_v33  ;;  %v1056_v52 = vshrl.u32 %v5855_v27, 16  ;;  %v1059_v53 = vshll.u32 %v5855_v27, 16 }
 0x119   : > { %1361 = vst [vmem:[#allocation2 + $0x18] sm:$0xf] %v1360_v50  ;;  %1417 = vst [vmem:[#allocation2 + $0x78] sm:$0xf] %v1416_v51  ;;  %v1353_v54 = vsel %vm6853_vm13, %v1036_v46, %v1352_v44  ;;  %v1409_v55 = vsel %vm6853_vm13, %v1172_v48, %v1408_v45  ;;  %v1192_v56 = vshrl.u32 %v5871_v29, 16  ;;  %v1195_v57 = vshll.u32 %v5871_v29, 16 }
 0x11a   : > { %v6210_v58 = vpop.f32.mrb[8].mxu0  ;;  %1354 = vst [vmem:[#allocation2 + $0xc] sm:$0xf] %v1353_v54  ;;  %1410 = vst [vmem:[#allocation2 + $0x6c] sm:$0xf] %v1409_v55  ;;  %v1058_v59 = vrot.slane %v1056_v52, 7  ;;  %v725_v5 = vmul.f32 %v6206_v13, %v6822_v37  ;;  %v723_v6 = vmul.f32 %v6822_v37, %v601_v18  ;;  %v726_v42 = vmul.f32 %v6845_v23, %v6822_v37 }
 0x11b   : > { %v1039_v60 = vshrl.u32 %v5853_v36, 16  ;;  %v1042_v61 = vshll.u32 %v5853_v36, 16  ;;  %v1175_v62 = vshrl.u32 %v5869_v38, 16  ;;  %v617_v63 = vpop.f32.mrb[9].mxu0  ;;  %v9267_v0 = vmov 0  ;;  %v6910_v45 = vpop.f32.mrb[4].mxu1 }
 0x11c   : > { %v9268_v0 = vsel %vm6877_vm14, 4294967295, %v9267_v0  ;;  %v1194_v2 = vrot.slane %v1192_v56, 7  ;;  %v1178_v4 = vshll.u32 %v5869_v38, 16  ;;  %v6211_v7 = vpop.f32.mrb[10].mxu0  ;;  %v1061_v8 = vor.u32 %v1059_v53, %v1058_v59 }
 0x11d   : > { %9269 = vst [vmem:[#allocation6_spill] sm:$0xff] %v9268_v0  ;;  %v1063_v9 = vrot.slane %v1058_v59, 4  ;;  %v1041_v12 = vrot.slane %v1039_v60, 7  ;;  %v1177_v14 = vrot.slane %v1175_v62, 7  ;;  %v620_v15 = vpop.f32.mrb[11].mxu0  ;;  %v764_v20 = vadd.f32 %v6827_v39, %v725_v5 }
 0x11e   : > { %v1197_v16 = vor.u32 %v1195_v57, %v1194_v2  ;;  %v1199_v17 = vrot.slane %v1194_v2, 4  ;;  %v762_v21 = vadd.f32 %v6827_v39, %v723_v6  ;;  %v1062_v22 = vsel %vm6877_vm14, %v1054_v41, %v1061_v8  ;;  %v1373_v5 = vld [vmem:[#allocation2 + $0x30] sm:$0xf]  ;;  %v1366_v6 = vld [vmem:[#allocation2 + $0x24] sm:$0xf] }
 0x11f   : > { %v1364_v13 = vsel %vm6740_vm2, %v1063_v9, %v1363_v1  ;;  %v1044_v18 = vor.u32 %v1042_v61, %v1041_v12  ;;  %v1046_v25 = vrot.slane %v1041_v12, 4  ;;  %1362 = vst.msk [vmem:[#allocation2 + $0x1c] sm:$0xf] %vm822_vm5, %v1062_v22  ;;  %v1180_v32 = vor.u32 %v1178_v4, %v1177_v14 }
 0x120   : > { %1365 = vst [vmem:[#allocation2 + $0x20] sm:$0x1] %v1364_v13  ;;  %v1198_v27 = vsel %vm6877_vm14, %v1190_v43, %v1197_v16  ;;  %v1420_v29 = vsel %vm6740_vm2, %v1199_v17, %v1419_v11  ;;  %v1182_v33 = vrot.slane %v1177_v14, 4  ;;  %v796_v36 = vmax.f32 %v764_v20, 0.0 }
 0x121   : > { %1418 = vst.msk [vmem:[#allocation2 + $0x7c] sm:$0xf] %vm822_vm5, %v1198_v27  ;;  %1421 = vst [vmem:[#allocation2 + $0x80] sm:$0x1] %v1420_v29  ;;  %v1045_v34 = vsel %vm6877_vm14, %v1037_v47, %v1044_v18  ;;  %v1357_v35 = vsel %vm6740_vm2, %v1046_v25, %v1356_v19  ;;  %v794_v38 = vmax.f32 %v762_v21, 0.0  ;;  %v1181_v40 = vsel %vm6877_vm14, %v1173_v49, %v1180_v32  ;;  %v6908_v44 = vpop.f32.mrb[12].mxu0 }
 0x122   : > { %1355 = vst.msk [vmem:[#allocation2 + $0x10] sm:$0xf] %vm822_vm5, %v1045_v34  ;;  %1358 = vst [vmem:[#allocation2 + $0x14] sm:$0x1] %v1357_v35  ;;  %v1413_v41 = vsel %vm6740_vm2, %v1182_v33, %v1412_v26  ;;  %v724_v43 = vmul.f32 %v6822_v37, %v6849_v30  ;;  %v5858_v46 = vpack.c.bf16 %v796_v36, %v796_v36  ;;  %v6915_v50 = vpop.f32.mrb[13].mxu0 }
 0x123   : > { %1411 = vst.msk [vmem:[#allocation2 + $0x70] sm:$0xf] %vm822_vm5, %v1181_v40  ;;  %1414 = vst [vmem:[#allocation2 + $0x74] sm:$0x1] %v1413_v41  ;;  %v5856_v47 = vpack.c.bf16 %v794_v38, %v794_v38  ;;  %v729_v48 = vmul.f32 %v6210_v58, %v6822_v37  ;;  %v727_v49 = vmul.f32 %v6822_v37, %v617_v63  ;;  %v6921_v53 = vpop.f32.mrb[14].mxu0 }
 0x124   : > { %v765_v23 = vadd.f32 %v6827_v39, %v726_v42  ;;  %v763_v51 = vadd.f32 %v6827_v39, %v724_v43  ;;  %v730_v30 = vmul.f32 %v6211_v7, %v6822_v37  ;;  %v728_v52 = vmul.f32 %v6822_v37, %v620_v15  ;;  %v6923_v59 = vpop.f32.mrb[15].mxu0  ;;  %v1370_v29 = vld [vmem:[#allocation2 + $0x2c] sm:$0x1]  ;;  %v1377_v34 = vld [vmem:[#allocation2 + $0x38] sm:$0x1] }
 0x125   : > { %v1082_v54 = vshrl.u32 %v5858_v46, 16  ;;  %v1085_v55 = vshll.u32 %v5858_v46, 16  ;;  %v1065_v56 = vshrl.u32 %v5856_v47, 16  ;;  %v1068_v57 = vshll.u32 %v5856_v47, 16 }
 0x126   : > { %v797_v58 = vmax.f32 %v765_v23, 0.0  ;;  %v795_v60 = vmax.f32 %v763_v51, 0.0  ;;  %v768_v61 = vadd.f32 %v6827_v39, %v729_v48  ;;  %v766_v62 = vadd.f32 %v6827_v39, %v727_v49 }
 0x127   : > { %v1084_v63 = vrot.slane %v1082_v54, 7  ;;  %v1067_v1 = vrot.slane %v1065_v56, 7  ;;  %v769_v2 = vadd.f32 %v6827_v39, %v730_v30  ;;  %v767_v4 = vadd.f32 %v6827_v39, %v728_v52  ;;  %v1380_v56 = vld [vmem:[#allocation2 + $0x3c] sm:$0xf] }
 0x128   : > { %v5859_v7 = vpack.c.bf16 %v797_v58, %v797_v58  ;;  %v5857_v8 = vpack.c.bf16 %v795_v60, %v795_v60  ;;  %v800_v9 = vmax.f32 %v768_v61, 0.0  ;;  %v798_v11 = vmax.f32 %v766_v62, 0.0 }
 0x129   : > { %v1087_v12 = vor.u32 %v1085_v55, %v1084_v63  ;;  %v1088_v14 = vrot.slane %v1084_v63, 4  ;;  %v1070_v15 = vor.u32 %v1068_v57, %v1067_v1  ;;  %v1071_v16 = vrot.slane %v1067_v1, 4  ;;  %v1387_v55 = vld [vmem:[#allocation2 + $0x48] sm:$0xf] }
 0x12a   : > { %v1090_v17 = vshrl.u32 %v5859_v7, 16  ;;  %v1093_v19 = vshll.u32 %v5859_v7, 16  ;;  %v1073_v20 = vshrl.u32 %v5857_v8, 16  ;;  %v1076_v21 = vshll.u32 %v5857_v8, 16 }
 0x12b   : > { %v1374_v22 = vsel %vm6853_vm13, %v1087_v12, %v1373_v5  ;;  %v1367_v13 = vsel %vm6853_vm13, %v1070_v15, %v1366_v6  ;;  %v5862_v18 = vpack.c.bf16 %v800_v9, %v800_v9  ;;  %v5860_v25 = vpack.c.bf16 %v798_v11, %v798_v11  ;;  %v1384_v15 = vld [vmem:[#allocation2 + $0x44] sm:$0x1] }
 0x12c   : > { %1375 = vst [vmem:[#allocation2 + $0x30] sm:$0xf] %v1374_v22  ;;  %1368 = vst [vmem:[#allocation2 + $0x24] sm:$0xf] %v1367_v13  ;;  %v1092_v26 = vrot.slane %v1090_v17, 7  ;;  %v1075_v27 = vrot.slane %v1073_v20, 7  ;;  %v733_v6 = vmul.f32 %v6908_v44, %v6822_v37  ;;  %v731_v7 = vmul.f32 %v6822_v37, %v6915_v50 }
 0x12d   : > { %v801_v32 = vmax.f32 %v769_v2, 0.0  ;;  %v799_v33 = vmax.f32 %v767_v4, 0.0  ;;  %v1116_v35 = vshrl.u32 %v5862_v18, 16  ;;  %v1119_v36 = vshll.u32 %v5862_v18, 16 }
 0x12e   : > { %v1099_v38 = vshrl.u32 %v5860_v25, 16  ;;  %v1102_v40 = vshll.u32 %v5860_v25, 16  ;;  %v1095_v41 = vor.u32 %v1093_v19, %v1092_v26  ;;  %v1097_v42 = vrot.slane %v1092_v26, 4 }
 0x12f   : > { %v1078_v43 = vor.u32 %v1076_v21, %v1075_v27  ;;  %v1080_v46 = vrot.slane %v1075_v27, 4  ;;  %v1118_v47 = vrot.slane %v1116_v35, 7  ;;  %v5863_v49 = vpack.c.bf16 %v801_v32, %v801_v32  ;;  %v6975_v35 = vld [vmem:[#allocation2 + $0x1c] sm:$0xf] }
 0x130   : > { %v1101_v48 = vrot.slane %v1099_v38, 7  ;;  %v5861_v23 = vpack.c.bf16 %v799_v33, %v799_v33  ;;  %v1096_v51 = vsel %vm6877_vm14, %v1088_v14, %v1095_v41  ;;  %v1378_v30 = vsel %vm6740_vm2, %v1097_v42, %v1377_v34  ;;  %v1391_v14 = vld [vmem:[#allocation2 + $0x50] sm:$0x1]  ;;  %v6971_v33 = vld [vmem:[#allocation2 + $0x78] sm:$0xf] }
 0x131   : > { %v1079_v52 = vsel %vm6877_vm14, %v1071_v16, %v1078_v43  ;;  %v1371_v54 = vsel %vm6740_vm2, %v1080_v46, %v1370_v29  ;;  %1376 = vst.msk [vmem:[#allocation2 + $0x34] sm:$0xf] %vm822_vm5, %v1096_v51  ;;  %1379 = vst [vmem:[#allocation2 + $0x38] sm:$0x1] %v1378_v30  ;;  %v1121_v57 = vor.u32 %v1119_v36, %v1118_v47  ;;  %v1122_v58 = vrot.slane %v1118_v47, 4  ;;  %v6977_v36 = vpop.f32.mrb[5].mxu1 }
 0x132   : > { %1369 = vst.msk [vmem:[#allocation2 + $0x28] sm:$0xf] %vm822_vm5, %v1079_v52  ;;  %1372 = vst [vmem:[#allocation2 + $0x2c] sm:$0x1] %v1371_v54  ;;  %v1104_v60 = vor.u32 %v1102_v40, %v1101_v48  ;;  %v1105_v61 = vrot.slane %v1101_v48, 4  ;;  %v1124_v62 = vshrl.u32 %v5863_v49, 16  ;;  %v734_v11 = vmul.f32 %v6921_v53, %v6822_v37 }
 0x133   : > { %v1127_v63 = vshll.u32 %v5863_v49, 16  ;;  %v1107_v1 = vshrl.u32 %v5861_v23, 16  ;;  %v1110_v2 = vshll.u32 %v5861_v23, 16  ;;  %v1388_v4 = vsel %vm6853_vm13, %v1121_v57, %v1387_v55  ;;  %v6959_v53 = vld [vmem:[#allocation2 + $0x7c] sm:$0xf]  ;;  %v6984_v30 = vpop.f32.mrb[6].mxu1 }
 0x134   : > { %v1381_v5 = vsel %vm6853_vm13, %v1104_v60, %v1380_v56  ;;  %1389 = vst [vmem:[#allocation2 + $0x48] sm:$0xf] %v1388_v4  ;;  %v1126_v8 = vrot.slane %v1124_v62, 7  ;;  %v732_v12 = vmul.f32 %v6822_v37, %v6923_v59  ;;  %v772_v16 = vadd.f32 %v6827_v39, %v733_v6  ;;  %v6980_v47 = vld [vmem:[#allocation2 + $0x18] sm:$0xf] }
 0x135   : > { %1382 = vst [vmem:[#allocation2 + $0x3c] sm:$0xf] %v1381_v5  ;;  %v1109_v9 = vrot.slane %v1107_v1, 7  ;;  %v770_v17 = vadd.f32 %v6827_v39, %v731_v7  ;;  %v773_v13 = vadd.f32 %v6827_v39, %v734_v11  ;;  %v5718_v34 = vcombine.low %v6971_v33, %v6959_v53  ;;  %v1401_v49 = vld [vmem:[#allocation2 + $0x60] sm:$0xf] }
 0x136   : > { %v1129_v44 = vor.u32 %v1127_v63, %v1126_v8  ;;  %v1131_v19 = vrot.slane %v1126_v8, 4  ;;  %v804_v21 = vmax.f32 %v772_v16, 0.0  ;;  %v771_v18 = vadd.f32 %v6827_v39, %v732_v12  ;;  %v1394_v52 = vld [vmem:[#allocation2 + $0x54] sm:$0xf]  ;;  %v1405_v6 = vld [vmem:[#allocation2 + $0x68] sm:$0x1] }
 0x137   : > { %v1112_v20 = vor.u32 %v1110_v2, %v1109_v9  ;;  %v1114_v50 = vrot.slane %v1109_v9, 4  ;;  %v802_v22 = vmax.f32 %v770_v17, 0.0  ;;  %v805_v29 = vmax.f32 %v773_v13, 0.0  ;;  %3823 = vrot.lane.b32.xlu0 %v5718_v34, %s6584_s25  ;;  %v6987_v2 = vld [vmem:[#allocation2 + $0x70] sm:$0xf] }
 0x138   : > { %v1130_v37 = vsel %vm6877_vm14, %v1122_v58, %v1129_v44  ;;  %v1392_v59 = vsel %vm6740_vm2, %v1131_v19, %v1391_v14  ;;  %v5866_v39 = vpack.c.bf16 %v804_v21, %v804_v21  ;;  %v803_v32 = vmax.f32 %v771_v18, 0.0  ;;  %v1398_v7 = vld [vmem:[#allocation2 + $0x5c] sm:$0x1]  ;;  %v6993_v14 = vld [vmem:[#allocation2 + $0x6c] sm:$0xf]  ;;  %v7000_v44 = vpop.f32.mrb[7].mxu1 }
 0x139   : > { %v1113_v25 = vsel %vm6877_vm14, %v1105_v61, %v1112_v20  ;;  %v1385_v26 = vsel %vm6740_vm2, %v1114_v50, %v1384_v15  ;;  %1390 = vst.msk [vmem:[#allocation2 + $0x4c] sm:$0xf] %vm822_vm5, %v1130_v37  ;;  %1393 = vst [vmem:[#allocation2 + $0x50] sm:$0x1] %v1392_v59  ;;  %v5864_v27 = vpack.c.bf16 %v802_v22, %v802_v22  ;;  %v3185_v15 = vrot.slane %v6975_v35, 5 }
 0x13a   : > { %1383 = vst.msk [vmem:[#allocation2 + $0x40] sm:$0xf] %vm822_vm5, %v1113_v25  ;;  %1386 = vst [vmem:[#allocation2 + $0x44] sm:$0x1] %v1385_v26  ;;  %v1150_v38 = vshrl.u32 %v5866_v39, 16  ;;  %v1153_v40 = vshll.u32 %v5866_v39, 16  ;;  %v5867_v43 = vpack.c.bf16 %v805_v29, %v805_v29  ;;  %v5865_v46 = vpack.c.bf16 %v803_v32, %v803_v32 }
 0x13b   : > { %v1133_v41 = vshrl.u32 %v5864_v27, 16  ;;  %v1136_v42 = vshll.u32 %v5864_v27, 16  ;;  %v5710_v51 = vcombine.low %v6980_v47, %v6975_v35  ;;  %v5717_v16 = vcombine.low %v6993_v14, %v6987_v2  ;;  %v6998_v17 = vld [vmem:[#allocation2 + $0x1c] sm:$0xf]  ;;  %v7010_v22 = vld [vmem:[#allocation2 + $0x20] sm:$0x1] }
 0x13c   : > { %v1152_v48 = vrot.slane %v1150_v38, 7  ;;  %v1158_v54 = vshrl.u32 %v5867_v43, 16  ;;  %v1161_v55 = vshll.u32 %v5867_v43, 16  ;;  %v1141_v56 = vshrl.u32 %v5865_v46, 16  ;;  %9270 = vst [vmem:[#allocation7_spill] sm:$0xff] %v6998_v17 }
 0x13d   : > { %v1135_v23 = vrot.slane %v1133_v41, 7  ;;  %v1144_v57 = vshll.u32 %v5865_v46, 16  ;;  %3807 = vrot.lane.b32.xlu1 %v5710_v51, %s6584_s25  ;;  %v3119_v13 = vld [vmem:[#allocation2 + $0x18] sm:$0xe]  ;;  %3821 = vrot.lane.b32.xlu0 %v5717_v16, %s6584_s25  ;;  %v3187_v25 = vrot.slane %v3185_v15, 4  ;;  %v3188_v26 = vrot.slane %v7010_v22, 5 }
 0x13e   : > { %v1155_v58 = vor.u32 %v1153_v40, %v1152_v48  ;;  %v1156_v61 = vrot.slane %v1152_v48, 4  ;;  %v1160_v63 = vrot.slane %v1158_v54, 7  ;;  %v1143_v1 = vrot.slane %v1141_v56, 7  ;;  %v7015_v18 = vld [vmem:[#allocation2 + $0x18] sm:$0xf] }
 0x13f   : > { %v1138_v60 = vor.u32 %v1136_v42, %v1135_v23  ;;  %v1139_v62 = vrot.slane %v1135_v23, 4  ;;  %v5663_v37 = vcombine.low %v7015_v18, %v6998_v17  ;;  %v5598_v59 = vrot.slane %v3119_v13, 9  ;;  %v2511_v39 = vld [vmem:[#allocation2 + $0x18] sm:$0xe]  ;;  %v7023_v32 = vld [vmem:[#allocation2 + $0x20] sm:$0x1] }
 0x140   : > { %v1402_v4 = vsel %vm6853_vm13, %v1155_v58, %v1401_v49  ;;  %v1163_v8 = vor.u32 %v1161_v55, %v1160_v63  ;;  %v1165_v9 = vrot.slane %v1160_v63, 4  ;;  %v1146_v11 = vor.u32 %v1144_v57, %v1143_v1  ;;  %9271 = vst [vmem:[#allocation8_spill] sm:$0xff] %v7023_v32  ;;  %v7025_v34 = vld [vmem:[#allocation2 + $0x10] sm:$0xf]  ;;  %v7032_v42 = vld [vmem:[#allocation2 + $0xc] sm:$0xf] }
 0x141   : > { %v1395_v5 = vsel %vm6853_vm13, %v1138_v60, %v1394_v52  ;;  %1403 = vst [vmem:[#allocation2 + $0x60] sm:$0xf] %v1402_v4  ;;  %v1148_v12 = vrot.slane %v1143_v1, 4  ;;  %v2928_v27 = vshrl.u32 %v6971_v33, 16  ;;  %v2931_v29 = vshll.u32 %v6971_v33, 16  ;;  %3585 = vrot.lane.b32.xlu1 %v5663_v37, %s6586_s27 }
 0x142   : > { %1396 = vst [vmem:[#allocation2 + $0x54] sm:$0xf] %v1395_v5  ;;  %v1164_v19 = vsel %vm6877_vm14, %v1156_v61, %v1163_v8  ;;  %v1406_v20 = vsel %vm6740_vm2, %v1165_v9, %v1405_v6  ;;  %v1147_v50 = vsel %vm6877_vm14, %v1139_v62, %v1146_v11  ;;  %v3186_v38 = vsel %vm6777_vm8, %v5598_v59, %v3185_v15  ;;  %v2097_v46 = vld [vmem:[#allocation2 + $0x7c] sm:$0xf]  ;;  %v2519_v48 = vld [vmem:[#allocation2 + $0x78] sm:$0xe] }
 0x143   : > { %v1399_v21 = vsel %vm6740_vm2, %v1148_v12, %v1398_v7  ;;  %1404 = vst.msk [vmem:[#allocation2 + $0x64] sm:$0xf] %vm822_vm5, %v1164_v19  ;;  %1407 = vst [vmem:[#allocation2 + $0x68] sm:$0x1] %v1406_v20  ;;  %v3189_v40 = vsel %vm6777_vm8, %v3187_v25, %v3188_v26  ;;  %v2583_v41 = vrot.slane %v6998_v17, 5  ;;  %v2736_v33 = vshrl.u32 %v6980_v47, 16 }
 0x144   : > { %1397 = vst.msk [vmem:[#allocation2 + $0x58] sm:$0xf] %vm822_vm5, %v1147_v50  ;;  %1400 = vst [vmem:[#allocation2 + $0x5c] sm:$0x1] %v1399_v21  ;;  %v5742_v43 = vcombine.low %v3186_v38, %v3189_v40  ;;  %v5583_v49 = vrot.slane %v2511_v39, 9  ;;  %v2586_v51 = vrot.slane %v7023_v32, 5  ;;  %v5662_v52 = vcombine.low %v7032_v42, %v7025_v34 }
 0x145   : > { %v2585_v23 = vrot.slane %v2583_v41, 4  ;;  %v7038_v54 = vld [vmem:[#allocation2 + $0x80] sm:$0x1]  ;;  %v7040_v55 = vrot.slane %v2928_v27, 4  ;;  %v7042_v56 = vrot.slane %v2931_v29, 5  ;;  %v2739_v57 = vshll.u32 %v6980_v47, 16 }
 0x146   : > { %6236 = vmatprep.mubr.msk.bf16.mxu0 %vm3967_vm15, %v5742_v43  ;;  %v7046_v58 = vld [vmem:[#allocation2 + $0x70] sm:$0xf]  ;;  %v2584_v61 = vsel %vm6777_vm8, %v5583_v49, %v2583_v41  ;;  %3583 = vrot.lane.b32.xlu1 %v5662_v52, %s6586_s27  ;;  %v2639_v63 = vrot.slane %v2097_v46, 5  ;;  %v7054_v1 = vld [vmem:[#allocation2 + $0x6c] sm:$0xf]  ;;  %v7056_v5 = vpop.f32.mrb[8].mxu1 }
 0x147   : > { %v2587_v62 = vsel %vm6777_vm8, %v2585_v23, %v2586_v51  ;;  %v3120_v4 = vld [vmem:[#allocation2 + $0x24] sm:$0xe]  ;;  %9272 = vst [vmem:[#allocation9_spill] sm:$0xff] %v7056_v5  ;;  %v7059_v6 = vrot.slane %v2736_v33, 4  ;;  %v2151_v7 = vshrl.u32 %v7015_v18, 16  ;;  %v2154_v11 = vshll.u32 %v7015_v18, 16 }
 0x148   : > { %v5695_v8 = vcombine.low %v2584_v61, %v2587_v62  ;;  %v7062_v9 = vld [vmem:[#allocation2 + $0x28] sm:$0xf]  ;;  %v5591_v12 = vrot.slane %v2519_v48, 9  ;;  %v2641_v15 = vrot.slane %v2639_v63, 4  ;;  %v2642_v16 = vrot.slane %v7038_v54, 5 }
 0x149   : > { %v7066_v19 = vld [vmem:[#allocation2 + $0x2c] sm:$0x1]  ;;  %v1901_v20 = vld [vmem:[#allocation2 + $0x18] sm:$0xe]  ;;  %v7068_v50 = vrot.slane %v2739_v57, 5  ;;  %v5670_v37 = vcombine.low %v7054_v1, %v7046_v58  ;;  %v5599_v39 = vrot.slane %v3120_v4, 9 }
 0x14a   : > { %3713 = vrot.lane.b32.xlu0 %v5695_v8, %s6585_s26  ;;  %v7075_v59 = vld [vmem:[#allocation2 + $0x1c] sm:$0xf]  ;;  %v2640_v25 = vsel %vm6777_vm8, %v5591_v12, %v2639_v63  ;;  %v2643_v26 = vsel %vm6777_vm8, %v2641_v15, %v2642_v16  ;;  %v7082_v27 = vld [vmem:[#allocation2 + $0x20] sm:$0x1]  ;;  %v7084_v29 = vld [vmem:[#allocation2 + $0x14] sm:$0x1] }
 0x14b   : > { %v5703_v40 = vcombine.low %v2640_v25, %v2643_v26  ;;  %3599 = vrot.lane.b32.xlu1 %v5670_v37, %s6586_s27  ;;  %v3192_v41 = vrot.slane %v7062_v9, 5  ;;  %v3195_v33 = vrot.slane %v7066_v19, 5  ;;  %v2510_v43 = vld [vmem:[#allocation2 + $0xc] sm:$0xe]  ;;  %v7090_v46 = vrot.slane %v2151_v7, 4  ;;  %v7107_v15 = vpop.f32.mrb[9].mxu1 }
 0x14c   : > { %v7092_v48 = vrot.slane %v2154_v11, 5  ;;  %v1982_v23 = vrot.slane %v7075_v59, 5  ;;  %v7096_v51 = vld [vmem:[#allocation2 + $0x74] sm:$0x1]  ;;  %v2518_v52 = vld [vmem:[#allocation2 + $0x6c] sm:$0xe] }
 0x14d   : > { %9273 = vst [vmem:[#allocation10_spill] sm:$0xff] %v7096_v51  ;;  %v3193_v61 = vsel %vm6777_vm8, %v5599_v39, %v3192_v41  ;;  %v3194_v62 = vrot.slane %v3192_v41, 4  ;;  %v5568_v63 = vrot.slane %v1901_v20, 9  ;;  %v7102_v4 = vld [vmem:[#allocation2 + $0x10] sm:$0xf]  ;;  %v2130_v7 = vshll.u32 %v7032_v42, 16 }
 0x14e   : > { %3729 = vrot.lane.b32.xlu0 %v5703_v40, %s6585_s26  ;;  %v1984_v8 = vrot.slane %v1982_v23, 4  ;;  %v1985_v11 = vrot.slane %v7082_v27, 5  ;;  %v2576_v12 = vrot.slane %v7025_v34, 5  ;;  %9274 = vst [vmem:[#allocation11_spill] sm:$0xff] %v7107_v15  ;;  %v5582_v25 = vrot.slane %v2510_v43, 9 }
 0x14f   : > { %v3196_v16 = vsel %vm6777_vm8, %v3194_v62, %v3195_v33  ;;  %v1983_v37 = vsel %vm6777_vm8, %v5568_v63, %v1982_v23  ;;  %v2579_v20 = vrot.slane %v7084_v29, 5  ;;  %v1900_v26 = vld [vmem:[#allocation2 + $0xc] sm:$0xe]  ;;  %v3121_v39 = vld [vmem:[#allocation2 + $0x30] sm:$0xe]  ;;  %v5590_v47 = vrot.slane %v2518_v52, 9 }
 0x150   : > { %v5743_v40 = vcombine.low %v3193_v61, %v3196_v16  ;;  %v1986_v41 = vsel %vm6777_vm8, %v1984_v8, %v1985_v11  ;;  %v2578_v38 = vrot.slane %v2576_v12, 4  ;;  %v7116_v60 = vld [vmem:[#allocation2 + $0x14] sm:$0x1]  ;;  %v2577_v33 = vsel %vm6777_vm8, %v5582_v25, %v2576_v12  ;;  %v7124_v62 = vld [vmem:[#allocation2 + $0x38] sm:$0x1] }
 0x151   : > { %v7118_v21 = vld [vmem:[#allocation2 + $0x34] sm:$0xf]  ;;  %v5648_v49 = vcombine.low %v1983_v37, %v1986_v41  ;;  %v2632_v43 = vrot.slane %v7046_v58, 5  ;;  %v2635_v23 = vrot.slane %v7096_v51, 5  ;;  %v3122_v61 = vld [vmem:[#allocation2 + $0x3c] sm:$0xe] }
 0x152   : > { %6237 = vmatmul.mubr.msk.bf16.vlgmr.msra.gmra.mrb[16].mxu0 %vm3967_vm15, %v5743_v40  ;;  %v2580_v52 = vsel %vm6777_vm8, %v2578_v38, %v2579_v20  ;;  %v5567_v63 = vrot.slane %v1900_v26, 9  ;;  %v1975_v8 = vrot.slane %v7102_v4, 5  ;;  %v5600_v11 = vrot.slane %v3121_v39, 9  ;;  %v7130_v16 = vld [vmem:[#allocation2 + $0x40] sm:$0xf]  ;;  %v7132_v37 = vpop.f32.mrb[10].mxu1 }
 0x153   : > { %9275 = vst [vmem:[#allocation12_spill] sm:$0xff] %v7132_v37  ;;  %3491 = vrot.lane.b32.xlu1 %v5648_v49, %s6584_s25  ;;  %v5694_v12 = vcombine.low %v2577_v33, %v2580_v52  ;;  %v2634_v25 = vrot.slane %v2632_v43, 4  ;;  %v1978_v41 = vrot.slane %v7116_v60, 5  ;;  %v3199_v57 = vrot.slane %v7118_v21, 5  ;;  %v2722_v40 = vld [vmem:[#allocation2 + $0x44] sm:$0x1] }
 0x154   : > { %v2633_v38 = vsel %vm6777_vm8, %v5590_v47, %v2632_v43  ;;  %v1977_v20 = vrot.slane %v1975_v8, 4  ;;  %v3202_v26 = vrot.slane %v7124_v62, 5  ;;  %v5601_v39 = vrot.slane %v3122_v61, 9  ;;  %v3124_v32 = vld [vmem:[#allocation2 + $0x54] sm:$0xe] }
 0x155   : > { %3711 = vrot.lane.b32.xlu0 %v5694_v12, %s6585_s26  ;;  %v2636_v18 = vsel %vm6777_vm8, %v2634_v25, %v2635_v23  ;;  %v3200_v49 = vsel %vm6777_vm8, %v5600_v11, %v3199_v57  ;;  %v3201_v33 = vrot.slane %v3199_v57, 4  ;;  %v3206_v52 = vrot.slane %v7130_v16, 5  ;;  %v7154_v11 = vpop.f32.mrb[11].mxu1 }
 0x156   : > { %v5702_v13 = vcombine.low %v2633_v38, %v2636_v18  ;;  %v1976_v37 = vsel %vm6777_vm8, %v5567_v63, %v1975_v8  ;;  %v1979_v47 = vsel %vm6777_vm8, %v1977_v20, %v1978_v41  ;;  %v3209_v43 = vrot.slane %v2722_v40, 5  ;;  %9276 = vst [vmem:[#allocation13_spill] sm:$0xff] %v7154_v11  ;;  %v1468_v40 = vld [vmem:[#allocation2 + $0x18] sm:$0xf] }
 0x157   : > { %v5647_v61 = vcombine.low %v1976_v37, %v1979_v47  ;;  %v3203_v12 = vsel %vm6777_vm8, %v3201_v33, %v3202_v26  ;;  %v3207_v23 = vsel %vm6777_vm8, %v5601_v39, %v3206_v52  ;;  %v3208_v25 = vrot.slane %v3206_v52, 4  ;;  %v7176_v33 = vld [vmem:[#allocation2 + $0x30] sm:$0xf]  ;;  %v2698_v11 = vld [vmem:[#allocation2 + $0x58] sm:$0xf] }
 0x158   : > { %v9277_v57 = vshrl.u32 %v6993_v14, 16  ;;  %v9278_v63 = vshll.u32 %v6993_v14, 16  ;;  %v5744_v37 = vcombine.low %v3200_v49, %v3203_v12  ;;  %v9279_v20 = vshrl.u32 %v7032_v42, 16  ;;  %v7202_v42 = vld [vmem:[#allocation2 + $0x4c] sm:$0xf] }
 0x159   : > { %v7170_v39 = vrot.slane %v2130_v7, 5  ;;  %3727 = vrot.lane.b32.xlu0 %v5702_v13, %s6585_s26  ;;  %3489 = vrot.lane.b32.xlu1 %v5647_v61, %s6584_s25  ;;  %v3210_v14 = vsel %vm6777_vm8, %v3208_v25, %v3209_v43  ;;  %v9280_v52 = vshrl.u32 %v6998_v17, 16  ;;  %v7186_v13 = vld [vmem:[#allocation2 + $0x30] sm:$0xf]  ;;  %v7188_v61 = vld [vmem:[#allocation2 + $0x34] sm:$0xf]  ;;  %v5712_v43 = vcombine.low %v7176_v33, %v7118_v21 }
 0x15a   : > { %v7158_v18 = vrot.slane %v9277_v57, 4  ;;  %v7162_v8 = vrot.slane %v9278_v63, 5  ;;  %v7168_v26 = vrot.slane %v9279_v20, 4  ;;  %6240 = vmatprep.mubr.msk.bf16.mxu0 %vm3967_vm15, %v5744_v37  ;;  %v5745_v7 = vcombine.low %v3207_v23, %v3210_v14  ;;  %9282 = vst [vmem:[#allocation15_spill] sm:$0xff] %v7188_v61  ;;  %v3123_v63 = vld [vmem:[#allocation2 + $0x48] sm:$0xe] }
 0x15b   : > { %v7182_v47 = vrot.slane %v9280_v52, 4  ;;  %v5665_v12 = vcombine.low %v7186_v13, %v7188_v61  ;;  %v2742_v25 = vor.u32 %v7068_v50, %v7059_v6  ;;  %v2745_v57 = vshll.u32 %v6975_v35, 16 }
 0x15c   : > { %v2140_v20 = vshrl.u32 %v7025_v34, 16  ;;  %6241 = vmatmul.mubr.msk.bf16.gmra.mrb[20].mxu0 %vm3967_vm15, %v5745_v7  ;;  %v9283_v23 = vshrl.u32 %v6975_v35, 16  ;;  %v2755_v14 = vshll.u32 %v7010_v22, 16  ;;  %v1564_v52 = vshrl.u32 %v1468_v40, 16  ;;  %v7209_v7 = vld [vmem:[#allocation2 + $0x50] sm:$0x1] }
 0x15d   : > { %9281 = vst [vmem:[#allocation14_spill] sm:$0xff] %v7182_v47  ;;  %v2133_v38 = vor.u32 %v7170_v39, %v7168_v26  ;;  %v2319_v6 = vshrl.u32 %v7054_v1, 16  ;;  %3811 = vrot.lane.b32.xlu0 %v5712_v43, %s6584_s25  ;;  %3589 = vrot.lane.b32.xlu1 %v5665_v12, %s6586_s27  ;;  %v2747_v50 = vrot.slane %v2745_v57, 5  ;;  %v1567_v41 = vshll.u32 %v1468_v40, 16  ;;  %9284 = vst [vmem:[#allocation16_spill] sm:$0xff] %v7209_v7 }
 0x15e   : > { %v2751_v37 = vrot.slane %v9283_v23, 4  ;;  %v2743_v35 = vrot.slane %v2742_v25, 4  ;;  %v1566_v23 = vrot.slane %v1564_v52, 4  ;;  %v1573_v22 = vshll.u32 %v7075_v59, 16 }
 0x15f   : > { %v1577_v49 = vshrl.u32 %v7075_v59, 16  ;;  %v2322_v47 = vshll.u32 %v7054_v1, 16  ;;  %v2757_v39 = vrot.slane %v2755_v14, 5  ;;  %v1569_v17 = vrot.slane %v1567_v41, 5  ;;  %v2724_v1 = vld [vmem:[#allocation2 + $0x5c] sm:$0x1] }
 0x160   : > { %v2752_v26 = vor.u32 %v2751_v37, %v2747_v50  ;;  %v1575_v43 = vrot.slane %v1573_v22, 5  ;;  %v1583_v12 = vshll.u32 %v7082_v27, 16  ;;  %v5602_v40 = vrot.slane %v3123_v63, 9 }
 0x161   : > { %v1579_v15 = vrot.slane %v1577_v49, 4  ;;  %v1570_v5 = vor.u32 %v1569_v17, %v1566_v23  ;;  %v3213_v25 = vrot.slane %v7202_v42, 5  ;;  %v3216_v52 = vrot.slane %v7209_v7, 5 }
 0x162   : > { %v2753_v57 = vrot.slane %v2752_v26, 4  ;;  %v2748_v59 = vsel %vm6787_vm11, %v2743_v35, %v2747_v50  ;;  %v5603_v37 = vrot.slane %v3124_v32, 9  ;;  %v3220_v14 = vrot.slane %v2698_v11, 5 }
 0x163   : > { %v1580_v0 = vor.u32 %v1579_v15, %v1575_v43  ;;  %v1571_v49 = vrot.slane %v1570_v5, 4  ;;  %v3214_v27 = vsel %vm6777_vm8, %v5602_v40, %v3213_v25  ;;  %v3215_v63 = vrot.slane %v3213_v25, 4  ;;  %v7246_v25 = vld [vmem:[#allocation2 + $0x80] sm:$0x1] }
 0x164   : > { %v2758_v41 = vsel %vm6787_vm11, %v2753_v57, %v2757_v39  ;;  %v1585_v22 = vrot.slane %v1583_v12, 5  ;;  %v3222_v26 = vrot.slane %v3220_v14, 4  ;;  %v7223_v7 = vrot.slane %v2319_v6, 4  ;;  %v7244_v57 = vld [vmem:[#allocation2 + $0x24] sm:$0xf] }
 0x165   : > { %v5726_v17 = vcombine.low %v2748_v59, %v2758_v41  ;;  %v1581_v23 = vrot.slane %v1580_v0, 4  ;;  %v3217_v15 = vsel %vm6777_vm8, %v3215_v63, %v3216_v52  ;;  %v3221_v32 = vsel %vm6777_vm8, %v5603_v37, %v3220_v14  ;;  %v7259_v41 = vld [vmem:[#allocation2 + $0x24] sm:$0xf] }
 0x166   : > { %v3223_v11 = vrot.slane %v2724_v1, 5  ;;  %v7229_v50 = vrot.slane %v2322_v47, 5  ;;  %v1576_v5 = vsel %vm6787_vm11, %v1571_v49, %v1575_v43  ;;  %v5746_v35 = vcombine.low %v3214_v27, %v3217_v15  ;;  %v3125_v15 = vld [vmem:[#allocation2 + $0x60] sm:$0xe] }
 0x167   : > { %3887 = vrot.lane.b32.xlu0 %v5726_v17, %s6586_s27  ;;  %v1586_v0 = vsel %vm6787_vm11, %v1581_v23, %v1585_v22  ;;  %v9285_v6 = vor.u32 %v7092_v48, %v7090_v46  ;;  %v7248_v43 = vrot.slane %v2140_v20, 4  ;;  %v5711_v46 = vcombine.low %v7244_v57, %v7062_v9  ;;  %v1466_v48 = vld [vmem:[#allocation2 + $0xc] sm:$0xf] }
 0x168   : > { %v5632_v40 = vcombine.low %v1576_v5, %v1586_v0  ;;  %v3224_v47 = vsel %vm6777_vm8, %v3222_v26, %v3223_v11  ;;  %6244 = vmatprep.mubr.msk.bf16.mxu0 %vm3967_vm15, %v5746_v35  ;;  %v7254_v1 = vrot.slane %v2133_v38, 4  ;;  %v2934_v20 = vor.u32 %v7042_v56, %v7040_v55  ;;  %v7267_v38 = vld [vmem:[#allocation2 + $0x28] sm:$0xf]  ;;  %v7278_v35 = vld [vmem:[#allocation2 + $0x64] sm:$0xf] }
 0x169   : > { %v7239_v39 = vrot.slane %v9285_v6, 4  ;;  %9286 = vst [vmem:[#allocation17_spill] sm:$0xff] %v7248_v43  ;;  %v5747_v59 = vcombine.low %v3221_v32, %v3224_v47  ;;  %9287 = vst [vmem:[#allocation18_spill] sm:$0xff] %v7267_v38  ;;  %v2937_v27 = vshll.u32 %v6959_v53, 16  ;;  %v9288_v63 = vshrl.u32 %v6959_v53, 16 }
 0x16a   : > { %3411 = vrot.lane.b32.xlu1 %v5632_v40, %s6585_s26  ;;  %v2947_v23 = vshll.u32 %v7246_v25, 16  ;;  %v5664_v55 = vcombine.low %v7259_v41, %v7267_v38  ;;  %v2935_v56 = vrot.slane %v2934_v20, 4  ;;  %v1540_v26 = vshrl.u32 %v1466_v48, 16 }
 0x16b   : > { %6245 = vmatmul.mubr.msk.bf16.gmra.mrb[24].mxu0 %vm3967_vm15, %v5747_v59  ;;  %3809 = vrot.lane.b32.xlu0 %v5711_v46, %s6584_s25  ;;  %v2943_v17 = vrot.slane %v9288_v63, 4  ;;  %v2939_v11 = vrot.slane %v2937_v27, 5  ;;  %v3244_v5 = vrot.slane %v7246_v25, 5  ;;  %v1543_v0 = vshll.u32 %v1466_v48, 16  ;;  %v2725_v46 = vld [vmem:[#allocation2 + $0x68] sm:$0x1] }
 0x16c   : > { %v1542_v6 = vrot.slane %v1540_v26, 4  ;;  %v1549_v40 = vshll.u32 %v7102_v4, 16  ;;  %v1553_v47 = vshrl.u32 %v7102_v4, 16  ;;  %v1559_v59 = vshll.u32 %v7116_v60, 16  ;;  %v7286_v25 = vld [vmem:[#allocation2 + $0x74] sm:$0x1] }
 0x16d   : > { %v2940_v20 = vsel %vm6787_vm11, %v2935_v56, %v2939_v11  ;;  %v2944_v63 = vor.u32 %v2943_v17, %v2939_v11  ;;  %v2949_v27 = vrot.slane %v2947_v23, 5  ;;  %v1545_v37 = vrot.slane %v1543_v0, 5  ;;  %v3126_v48 = vld [vmem:[#allocation2 + $0x6c] sm:$0xe]  ;;  %v3127_v23 = vld [vmem:[#allocation2 + $0x78] sm:$0xe] }
 0x16e   : > { %3587 = vrot.lane.b32.xlu1 %v5664_v55, %s6586_s27  ;;  %v1551_v12 = vrot.slane %v1549_v40, 5  ;;  %v1555_v52 = vrot.slane %v1553_v47, 4  ;;  %v1561_v55 = vrot.slane %v1559_v59, 5  ;;  %v5604_v26 = vrot.slane %v3125_v15, 9 }
 0x16f   : > { %v2945_v49 = vrot.slane %v2944_v63, 4  ;;  %v1546_v32 = vor.u32 %v1545_v37, %v1542_v6  ;;  %v3227_v4 = vrot.slane %v7278_v35, 5  ;;  %v3230_v22 = vrot.slane %v2725_v46, 5  ;;  %v1482_v63 = vld [vmem:[#allocation2 + $0x6c] sm:$0xf] }
 0x170   : > { %v1556_v60 = vor.u32 %v1555_v52, %v1551_v12  ;;  %v5605_v14 = vrot.slane %v3126_v48, 9  ;;  %v9289_v43 = vrot.slane %v6987_v2, 5  ;;  %v3237_v17 = vrot.slane %v7286_v25, 5 }
 0x171   : > { %v2950_v11 = vsel %vm6787_vm11, %v2945_v49, %v2949_v27  ;;  %v1547_v0 = vrot.slane %v1546_v32, 4  ;;  %v3228_v15 = vsel %vm6777_vm8, %v5604_v26, %v3227_v4  ;;  %v3229_v40 = vrot.slane %v3227_v4, 4  ;;  %v1483_v4 = vld [vmem:[#allocation2 + $0x70] sm:$0xf] }
 0x172   : > { %v3236_v56 = vrot.slane %v9289_v43, 4  ;;  %v5734_v37 = vcombine.low %v2940_v20, %v2950_v11  ;;  %v1557_v6 = vrot.slane %v1556_v60, 4  ;;  %v9290_v47 = vmov %v9289_v43 }
 0x173   : > { %v3235_v52 = vsel %vm6777_vm8, %v5605_v14, %v9290_v47  ;;  %v1552_v59 = vsel %vm6787_vm11, %v1547_v0, %v1551_v12  ;;  %v3231_v49 = vsel %vm6777_vm8, %v3229_v40, %v3230_v22  ;;  %v5606_v46 = vrot.slane %v3127_v23, 9 }
 0x174   : > { %v3238_v43 = vsel %vm6777_vm8, %v3236_v56, %v3237_v17  ;;  %3903 = vrot.lane.b32.xlu0 %v5734_v37, %s6586_s27  ;;  %v1562_v20 = vsel %vm6787_vm11, %v1557_v6, %v1561_v55  ;;  %v5748_v27 = vcombine.low %v3228_v15, %v3231_v49  ;;  %v9291_v14 = vrot.slane %v6959_v53, 5  ;;  %v1505_v55 = vld [vmem:[#allocation2 + $0x74] sm:$0x1]  ;;  %v7324_v15 = vld [vmem:[#allocation2 + $0x38] sm:$0x1] }
 0x175   : > { %v5749_v32 = vcombine.low %v3235_v52, %v3238_v43  ;;  %v2910_v26 = vor.u32 %v7162_v8, %v7158_v18  ;;  %v5631_v12 = vcombine.low %v1552_v59, %v1562_v20  ;;  %v2913_v56 = vshll.u32 %v6987_v2, 16  ;;  %9294 = vst [vmem:[#allocation19_spill] sm:$0xff] %v7324_v15  ;;  %v2513_v6 = vld [vmem:[#allocation2 + $0x30] sm:$0xe] }
 0x176   : > { %v3243_v48 = vrot.slane %v9291_v14, 4  ;;  %v9292_v60 = vmov %v9291_v14  ;;  %v9293_v17 = vshrl.u32 %v6987_v2, 16  ;;  %6248 = vmatprep.mubr.msk.bf16.mxu0 %vm3967_vm15, %v5748_v27  ;;  %v2923_v18 = vshll.u32 %v7286_v25, 16  ;;  %v1903_v59 = vld [vmem:[#allocation2 + $0x30] sm:$0xe]  ;;  %v7337_v27 = vpop.f32.mrb[12].mxu1 }
 0x177   : > { %v3242_v22 = vsel %vm6777_vm8, %v5606_v46, %v9292_v60  ;;  %v2911_v0 = vrot.slane %v2910_v26, 4  ;;  %v1732_v8 = vshrl.u32 %v1482_v63, 16  ;;  %3409 = vrot.lane.b32.xlu1 %v5631_v12, %s6585_s26  ;;  %6249 = vmatmul.mubr.msk.bf16.gmra.mrb[28].mxu0 %vm3967_vm15, %v5749_v32  ;;  %v2915_v40 = vrot.slane %v2913_v56, 5  ;;  %v6407_v32 = vld [vmem:[%s9223_s4 + $0x40] sm:$0xff]  }
 0x178   : > { %v2919_v23 = vrot.slane %v9293_v17, 4  ;;  %v3245_v11 = vsel %vm6777_vm8, %v3243_v48, %v3244_v5  ;;  %v1735_v2 = vshll.u32 %v1482_v63, 16  ;;  %v1741_v37 = vshll.u32 %v1483_v4, 16  ;;  %v6408_v63 = vld [vmem:[%s9223_s4] sm:$0xff]   ;;  %v7345_v17 = vld [vmem:[#allocation2 + $0x34] sm:$0xf]  ;;  %6036 = vmatprep.subr.bf16.mxu1 %v6407_v32 }
 0x179   : > { %v5750_v53 = vcombine.low %v3242_v22, %v3245_v11  ;;  %v2199_v47 = vshrl.u32 %v7186_v13, 16  ;;  %v1734_v52 = vrot.slane %v1732_v8, 4  ;;  %v1745_v43 = vshrl.u32 %v1483_v4, 16  ;;  %v7341_v4 = vld [vmem:[#allocation2 + $0x38] sm:$0x1]  ;;  %6037 = vmatpush3.bf16.msra.mxu1 %v6408_v63 }
 0x17a   : > { %v1751_v5 = vshll.u32 %v1505_v55, 16  ;;  %v2202_v25 = vshll.u32 %v7186_v13, 16  ;;  %v2920_v49 = vor.u32 %v2919_v23, %v2915_v40  ;;  %v1737_v46 = vrot.slane %v1735_v2, 5 }
 0x17b   : > { %6252 = vmatprep.mubr.msk.bf16.mxu0 %vm3967_vm15, %v5750_v53  ;;  %v1743_v20 = vrot.slane %v1741_v37, 5  ;;  %v2916_v14 = vsel %vm6787_vm11, %v2911_v0, %v2915_v40  ;;  %v2925_v48 = vrot.slane %v2923_v18, 5  ;;  %v1747_v13 = vrot.slane %v1745_v43, 4  ;;  %v2512_v0 = vld [vmem:[#allocation2 + $0x24] sm:$0xe] }
 0x17c   : > { %v5585_v26 = vrot.slane %v2513_v6, 9  ;;  %v2921_v12 = vrot.slane %v2920_v49, 4  ;;  %v1738_v60 = vor.u32 %v1737_v46, %v1734_v52  ;;  %v2597_v22 = vrot.slane %v7188_v61, 5  ;;  %v7353_v49 = vld [vmem:[#allocation2 + $0x2c] sm:$0x1] }
 0x17d   : > { %v2600_v56 = vrot.slane %v7324_v15, 5  ;;  %v1748_v23 = vor.u32 %v1747_v13, %v1743_v20  ;;  %v1753_v55 = vrot.slane %v1751_v5, 5  ;;  %v5570_v11 = vrot.slane %v1903_v59, 9  ;;  %9295 = vst [vmem:[#allocation20_spill] sm:$0xff] %v7353_v49  ;;  %v7355_v5 = vld [vmem:[#allocation2 + $0x2c] sm:$0x1] }
 0x17e   : > { %v1996_v8 = vrot.slane %v7345_v17, 5  ;;  %v2926_v18 = vsel %vm6787_vm11, %v2921_v12, %v2925_v48  ;;  %v1739_v53 = vrot.slane %v1738_v60, 4  ;;  %v2599_v40 = vrot.slane %v2597_v22, 4  ;;  %v1902_v48 = vld [vmem:[#allocation2 + $0x24] sm:$0xe] }
 0x17f   : > { %v1999_v2 = vrot.slane %v7341_v4, 5  ;;  %v5733_v37 = vcombine.low %v2916_v14, %v2926_v18  ;;  %v1749_v6 = vrot.slane %v1748_v23, 4  ;;  %v2598_v52 = vsel %vm6777_vm8, %v5585_v26, %v2597_v22  ;;  %v7376_v23 = vpop.f32.mrb[13].mxu1 }
 0x180   : > { %v1998_v43 = vrot.slane %v1996_v8, 4  ;;  %v7357_v59 = vrot.slane %v2199_v47, 4  ;;  %v7359_v46 = vrot.slane %v2202_v25, 5  ;;  %v2601_v32 = vsel %vm6777_vm8, %v2599_v40, %v2600_v56  ;;  %v7374_v56 = vld [vmem:[#allocation2 + $0x28] sm:$0xf] }
 0x181   : > { %v5584_v63 = vrot.slane %v2512_v0, 9  ;;  %3901 = vrot.lane.b32.xlu0 %v5733_v37, %s6586_s27  ;;  %v1744_v14 = vsel %vm6787_vm11, %v1739_v53, %v1743_v20  ;;  %v1754_v13 = vsel %vm6787_vm11, %v1749_v6, %v1753_v55  ;;  %v1997_v26 = vsel %vm6777_vm8, %v5570_v11, %v1996_v8 }
 0x182   : > { %v2590_v47 = vrot.slane %v7267_v38, 5  ;;  %v5639_v25 = vcombine.low %v1744_v14, %v1754_v13  ;;  %v5697_v12 = vcombine.low %v2598_v52, %v2601_v32  ;;  %v2000_v60 = vsel %vm6777_vm8, %v1998_v43, %v1999_v2 }
 0x183   : > { %v2593_v22 = vrot.slane %v7353_v49, 5  ;;  %v5569_v0 = vrot.slane %v1902_v48, 9  ;;  %v1989_v55 = vrot.slane %v7374_v56, 5  ;;  %v1992_v18 = vrot.slane %v7355_v5, 5  ;;  %v1906_v49 = vld [vmem:[#allocation2 + $0x54] sm:$0xe] }
 0x184   : > { %v2592_v20 = vrot.slane %v2590_v47, 4  ;;  %v9296_v11 = vshrl.u32 %v7046_v58, 16  ;;  %v9298_v53 = vshrl.u32 %v7176_v33, 16  ;;  %v9299_v2 = vshll.u32 %v7176_v33, 16  ;;  %3425 = vrot.lane.b32.xlu1 %v5639_v25, %s6585_s26 }
 0x185   : > { %v2591_v6 = vsel %vm6777_vm8, %v5584_v63, %v2590_v47  ;;  %v9300_v52 = vor.u32 %v7229_v50, %v7223_v7  ;;  %3717 = vrot.lane.b32.xlu0 %v5697_v12, %s6585_s26  ;;  %v1991_v14 = vrot.slane %v1989_v55, 4  ;;  %v2212_v25 = vshrl.u32 %v7188_v61, 16  ;;  %v1472_v47 = vld [vmem:[#allocation2 + $0x30] sm:$0xf] }
 0x186   : > { %v7382_v8 = vrot.slane %v9296_v11, 4  ;;  %v2786_v40 = vrot.slane %v9298_v53, 4  ;;  %v2789_v37 = vrot.slane %v9299_v2, 5  ;;  %v2594_v48 = vsel %vm6777_vm8, %v2592_v20, %v2593_v22 }
 0x187   : > { %v7394_v43 = vrot.slane %v9300_v52, 4  ;;  %v5650_v63 = vcombine.low %v1997_v26, %v2000_v60  ;;  %v2205_v7 = vor.u32 %v7359_v46, %v7357_v59  ;;  %v5696_v50 = vcombine.low %v2591_v6, %v2594_v48  ;;  %v6409_v59 = vld [vmem:[%s9223_s4 + $0x48] sm:$0xff]   ;;  %v7419_v60 = vpop.f32.mrb[14].mxu1 }
 0x188   : > { %9297 = vst [vmem:[#allocation21_spill] sm:$0xff] %v7382_v8  ;;  %v1990_v11 = vsel %vm6777_vm8, %v5569_v0, %v1989_v55  ;;  %v1993_v12 = vsel %vm6777_vm8, %v1991_v14, %v1992_v18  ;;  %v2760_v22 = vshrl.u32 %v7244_v57, 16  ;;  %v2175_v20 = vshrl.u32 %v7259_v41, 16  ;;  %v6410_v46 = vld [vmem:[%s9223_s4 + $0x8] sm:$0xff]   ;;  %v7425_v2 = vpop.f32.mrb[15].mxu1  ;;  %6038 = vmatprep.subr.bf16.mxu1 %v6409_v59 }
 0x189   : > { %9301 = vst [vmem:[#allocation22_spill] sm:$0xff] %v7394_v43  ;;  %3495 = vrot.lane.b32.xlu1 %v5650_v63, %s6584_s25  ;;  %v2790_v53 = vor.u32 %v2789_v37, %v2786_v40  ;;  %v2793_v26 = vshll.u32 %v7118_v21, 16  ;;  %v2178_v0 = vshll.u32 %v7259_v41, 16  ;;  %3715 = vrot.lane.b32.xlu0 %v5696_v50, %s6585_s26  ;;  %v2797_v55 = vshrl.u32 %v7118_v21, 16  ;;  %v7428_v52 = vld [vmem:[#allocation2 + $0x48] sm:$0xf] }
 0x18a   : > { %v2803_v18 = vshll.u32 %v7124_v62, 16  ;;  %v1612_v40 = vshrl.u32 %v1472_v47, 16  ;;  %v2763_v37 = vshll.u32 %v7244_v57, 16  ;;  %v5649_v6 = vcombine.low %v1990_v11, %v1993_v12  ;;  %6039 = vmatpush3.bf16.msra.mxu1 %v6410_v46  ;;  %v6411_v21 = vld [vmem:[%s9223_s4 + $0x50] sm:$0xff]   ;;  %v7448_v59 = vld [vmem:[#allocation2 + $0x4c] sm:$0xf] }
 0x18b   : > { %v2795_v48 = vrot.slane %v2793_v26, 5  ;;  %v1615_v14 = vshll.u32 %v1472_v47, 16  ;;  %v5714_v41 = vcombine.low %v7428_v52, %v7202_v42  ;;  %v2791_v63 = vrot.slane %v2790_v53, 4  ;;  %v6412_v62 = vld [vmem:[%s9223_s4 + $0x10] sm:$0xff]   ;;  %v7441_v47 = vld [vmem:[#allocation2 + $0x48] sm:$0xf]  ;;  %6040 = vmatprep.subr.bf16.mxu1 %v6411_v21 }
 0x18c   : > { %v2799_v50 = vrot.slane %v2797_v55, 4  ;;  %v1614_v13 = vrot.slane %v1612_v40, 4  ;;  %v7438_v57 = vrot.slane %v2175_v20, 4  ;;  %v1621_v12 = vshll.u32 %v7345_v17, 16  ;;  %9302 = vst [vmem:[#allocation23_spill] sm:$0xff] %v7448_v59 }
 0x18d   : > { %3493 = vrot.lane.b32.xlu1 %v5649_v6, %s6584_s25  ;;  %v1617_v11 = vrot.slane %v1615_v14, 5  ;;  %v1625_v53 = vshrl.u32 %v7345_v17, 16  ;;  %v7445_v26 = vrot.slane %v2178_v0, 5  ;;  %3815 = vrot.lane.b32.xlu0 %v5714_v41, %s6584_s25  ;;  %v2805_v55 = vrot.slane %v2803_v18, 5  ;;  %v867_v21 = vld [vmem:[#allocation2 + $0x90] sm:$0x1] }
 0x18e   : > { %v2800_v46 = vor.u32 %v2799_v50, %v2795_v48  ;;  %v1631_v20 = vshll.u32 %v7341_v4, 16  ;;  %v5667_v40 = vcombine.low %v7441_v47, %v7448_v59  ;;  %v1623_v14 = vrot.slane %v1621_v12, 5  ;;  %6041 = vmatpush3.bf16.msra.mxu1 %v6412_v62  ;;  %v7580_v43 = vld [vmem:[#allocation2 + $0x44] sm:$0x1] }
 0x18f   : > { %v1618_v6 = vor.u32 %v1617_v11, %v1614_v13  ;;  %v1627_v33 = vrot.slane %v1625_v53, 4  ;;  %v7453_v32 = vrot.slane %v2212_v25, 4  ;;  %v2762_v17 = vrot.slane %v2760_v22, 4  ;;  %v7473_v11 = vld [vmem:[%s9221_s2] ss:$0 sm:$0xff] }
 0x190   : > { %v2796_v0 = vsel %vm6787_vm11, %v2791_v63, %v2795_v48  ;;  %v2801_v41 = vrot.slane %v2800_v46, 4  ;;  %v2765_v61 = vrot.slane %v2763_v37, 5  ;;  %v1633_v50 = vrot.slane %v1631_v20, 5  ;;  %v1470_v46 = vld [vmem:[#allocation2 + $0x24] sm:$0xf] }
 0x191   : > { %9303 = vst [vmem:[#allocation24_spill] sm:$0xff] %v7453_v32  ;;  %3593 = vrot.lane.b32.xlu1 %v5667_v40, %s6586_s27  ;;  %v1619_v18 = vrot.slane %v1618_v6, 4  ;;  %v1628_v4 = vor.u32 %v1627_v33, %v1623_v14  ;;  %v7458_v51 = vrot.slane %v2205_v7, 4  ;;  %v741_v12 = vmul.f32 %v7473_v11, %v6910_v45  ;;  %v7482_v20 = vld [vmem:[#allocation2 + $0x3c] sm:$0xf] }
 0x192   : > { %v2806_v22 = vsel %vm6787_vm11, %v2801_v41, %v2805_v55  ;;  %v868_v53 = vsel %vm6740_vm2, 0, %v867_v21  ;;  %v2766_v40 = vor.u32 %v2765_v61, %v2762_v17  ;;  %v2769_v6 = vshll.u32 %v7062_v9, 16  ;;  %v7488_v41 = vld [vmem:[#allocation2 + $0x3c] sm:$0xf]  ;;  %v914_v48 = vld [vmem:[#allocation2 + $0x8c] sm:$0x1] }
 0x193   : > { %9304 = vst [vmem:[#allocation25_spill] sm:$0xff] %v7458_v51  ;;  %v5728_v63 = vcombine.low %v2796_v0, %v2806_v22  ;;  %v1624_v37 = vsel %vm6787_vm11, %v1619_v18, %v1623_v14  ;;  %v1629_v62 = vrot.slane %v1628_v4, 4  ;;  %869 = vst [vmem:[#allocation2 + $0x90] sm:$0x1] %v868_v53  ;;  %v2773_v14 = vshrl.u32 %v7062_v9, 16 }
 0x194   : > { %v5713_v45 = vcombine.low %v7482_v20, %v7130_v16  ;;  %v7490_v18 = vld [vmem:[#allocation2 + $0x40] sm:$0xf]  ;;  %v2779_v61 = vshll.u32 %v7066_v19, 16  ;;  %v2767_v17 = vrot.slane %v2766_v40, 4  ;;  %v2771_v21 = vrot.slane %v2769_v6, 5  ;;  %v6413_v16 = vld [vmem:[%s9223_s4 + $0x58] sm:$0xff]  }
 0x195   : > { %3891 = vrot.lane.b32.xlu0 %v5728_v63, %s6586_s27  ;;  %v1634_v55 = vsel %vm6787_vm11, %v1629_v62, %v1633_v50  ;;  %v7495_v4 = vld [vmem:[%s9222_s3] ss:$0 sm:$0xff]  ;;  %v2775_v9 = vrot.slane %v2773_v14, 4  ;;  %v1588_v22 = vshrl.u32 %v1470_v46, 16  ;;  %v5666_v63 = vcombine.low %v7488_v41, %v7490_v18  ;;  %6042 = vmatprep.subr.bf16.mxu1 %v6413_v16  ;;  %v6414_v14 = vld [vmem:[%s9223_s4 + $0x18] sm:$0xff]  }
 0x196   : > { %v5634_v0 = vcombine.low %v1624_v37, %v1634_v55  ;;  %v780_v50 = vadd.f32 %v7495_v4, %v741_v12  ;;  %v2781_v62 = vrot.slane %v2779_v61, 5  ;;  %v1591_v53 = vshll.u32 %v1470_v46, 16  ;;  %v864_v55 = vld [vmem:[#allocation2 + $0x84] sm:$0x1]  ;;  %6043 = vmatpush3.bf16.msra.mxu1 %v6414_v14  ;;  %v1904_v33 = vld [vmem:[#allocation2 + $0x3c] sm:$0xe] }
 0x197   : > { %v2772_v19 = vsel %vm6787_vm11, %v2767_v17, %v2771_v21  ;;  %v2776_v12 = vor.u32 %v2775_v9, %v2771_v21  ;;  %v1590_v40 = vrot.slane %v1588_v22, 4  ;;  %v1597_v6 = vshll.u32 %v7374_v56, 16  ;;  %v7576_v7 = vld [vmem:[#allocation2 + $0x44] sm:$0x1] }
 0x198   : > { %3415 = vrot.lane.b32.xlu1 %v5634_v0, %s6585_s26  ;;  %v812_v37 = vmax.f32 %v780_v50, 0.0  ;;  %v1593_v13 = vrot.slane %v1591_v53, 5  ;;  %v1601_v50 = vshrl.u32 %v7374_v56, 16  ;;  %v1607_v46 = vshll.u32 %v7355_v5, 16  ;;  %v917_v53 = vld [vmem:[#allocation2 + $0x98] sm:$0x1] }
 0x199   : > { %3813 = vrot.lane.b32.xlu0 %v5713_v45, %s6584_s25  ;;  %v2777_v61 = vrot.slane %v2776_v12, 4  ;;  %v1599_v45 = vrot.slane %v1597_v6, 5  ;;  %v739_v17 = vmul.f32 %v7473_v11, %v6977_v36  ;;  %v865_v21 = vsel %vm6740_vm2, 0, %v864_v55  ;;  %9305 = vst [vmem:[#allocation26_spill] sm:$0xff] %v7576_v7 }
 0x19a   : > { %v5874_v0 = vpack.c.bf16 %v812_v37, %v812_v37  ;;  %v1594_v16 = vor.u32 %v1593_v13, %v1590_v40  ;;  %v1603_v37 = vrot.slane %v1601_v50, 4  ;;  %866 = vst [vmem:[#allocation2 + $0x84] sm:$0x1] %v865_v21  ;;  %v1609_v56 = vrot.slane %v1607_v46, 5  ;;  %v2515_v46 = vld [vmem:[#allocation2 + $0x48] sm:$0xe] }
 0x19b   : > { %v2782_v5 = vsel %vm6787_vm11, %v2777_v61, %v2781_v62  ;;  %v778_v12 = vadd.f32 %v7495_v4, %v739_v17  ;;  %v742_v36 = vmul.f32 %v7473_v11, %v6984_v30  ;;  %v918_v50 = vsel %vm6747_vm4, 0, %v917_v53  ;;  %v1905_v53 = vld [vmem:[#allocation2 + $0x48] sm:$0xe] }
 0x19c   : > { %3591 = vrot.lane.b32.xlu1 %v5666_v63, %s6586_s27  ;;  %v1218_v9 = vshrl.u32 %v5874_v0, 16  ;;  %v1221_v22 = vshll.u32 %v5874_v0, 16  ;;  %v5727_v55 = vcombine.low %v2772_v19, %v2782_v5  ;;  %v1595_v14 = vrot.slane %v1594_v16, 4  ;;  %v1429_v0 = vld [vmem:[#allocation2 + $0x90] sm:$0xf] }
 0x19d   : > { %v1604_v63 = vor.u32 %v1603_v37, %v1599_v45  ;;  %v810_v13 = vmax.f32 %v778_v12, 0.0  ;;  %v781_v40 = vadd.f32 %v7495_v4, %v742_v36  ;;  %v740_v62 = vmul.f32 %v7473_v11, %v7000_v44  ;;  %919 = vst [vmem:[#allocation2 + $0x98] sm:$0x1] %v918_v50  ;;  %v7539_v44 = vld [vmem:[#allocation2 + $0x50] sm:$0x1] }
 0x19e   : > { %v7524_v6 = vrot.slane %v1218_v9, 7  ;;  %3889 = vrot.lane.b32.xlu0 %v5727_v55, %s6586_s27  ;;  %v1600_v19 = vsel %vm6787_vm11, %v1595_v14, %v1599_v45  ;;  %v915_v37 = vsel %vm6747_vm4, 0, %v914_v48  ;;  %v5587_v12 = vrot.slane %v2515_v46, 9  ;;  %v6415_v48 = vld [vmem:[%s9223_s4 + $0x60] sm:$0xff]  }
 0x19f   : > { %v1605_v17 = vrot.slane %v1604_v63, 4  ;;  %v5872_v21 = vpack.c.bf16 %v810_v13, %v810_v13  ;;  %v813_v9 = vmax.f32 %v781_v40, 0.0  ;;  %v779_v16 = vadd.f32 %v7495_v4, %v740_v62  ;;  %916 = vst [vmem:[#allocation2 + $0x8c] sm:$0x1] %v915_v37  ;;  %v7546_v13 = vld [vmem:[#allocation2 + $0x50] sm:$0x1]  ;;  %6044 = vmatprep.subr.bf16.mxu1 %v6415_v48 }
 0x1a0   : > { %v1223_v30 = vor.u32 %v1221_v22, %v7524_v6  ;;  %v2614_v50 = vrot.slane %v7539_v44, 5  ;;  %v7556_v62 = vld [vmem:[#allocation2 + $0x4c] sm:$0xf]  ;;  %v5572_v46 = vrot.slane %v1905_v53, 9  ;;  %v1224_v5 = vrot.slane %v7524_v6, 4 }
 0x1a1   : > { %v1610_v45 = vsel %vm6787_vm11, %v1605_v17, %v1609_v56  ;;  %v1201_v55 = vshrl.u32 %v5872_v21, 16  ;;  %v1204_v14 = vshll.u32 %v5872_v21, 16  ;;  %v5875_v63 = vpack.c.bf16 %v813_v9, %v813_v9  ;;  %v1422_v9 = vld [vmem:[#allocation2 + $0x84] sm:$0xf] }
 0x1a2   : > { %v1430_v22 = vsel %vm6853_vm13, %v1223_v30, %v1429_v0  ;;  %v5633_v36 = vcombine.low %v1600_v19, %v1610_v45  ;;  %v6416_v0 = vld [vmem:[%s9223_s4 + $0x20] sm:$0xff]   ;;  %v811_v40 = vmax.f32 %v779_v16, 0.0  ;;  %v2611_v56 = vrot.slane %v7448_v59, 5 }
 0x1a3   : > { %1431 = vst [vmem:[#allocation2 + $0x90] sm:$0xf] %v1430_v22  ;;  %v1203_v30 = vrot.slane %v1201_v55, 7  ;;  %v1226_v19 = vshrl.u32 %v5875_v63, 16  ;;  %v1229_v17 = vshll.u32 %v5875_v63, 16  ;;  %v2010_v21 = vrot.slane %v7556_v62, 5  ;;  %6045 = vmatpush3.bf16.msra.mxu1 %v6416_v0 }
 0x1a4   : > { %3413 = vrot.lane.b32.xlu1 %v5633_v36, %s6585_s26  ;;  %v5873_v37 = vpack.c.bf16 %v811_v40, %v811_v40  ;;  %v2612_v16 = vsel %vm6777_vm8, %v5587_v12, %v2611_v56  ;;  %v2613_v22 = vrot.slane %v2611_v56, 4  ;;  %v2013_v45 = vrot.slane %v7546_v13, 5  ;;  %v2514_v55 = vld [vmem:[#allocation2 + $0x3c] sm:$0xe]  ;;  %v6418_v63 = vld [vmem:[%s9223_s4 + $0x68] sm:$0xff]  }
 0x1a5   : > { %v1206_v53 = vor.u32 %v1204_v14, %v1203_v30  ;;  %v1228_v61 = vrot.slane %v1226_v19, 7  ;;  %v2011_v36 = vsel %vm6777_vm8, %v5572_v46, %v2010_v21  ;;  %v6419_v12 = vld [vmem:[%s9223_s4 + $0x28] sm:$0xff]   ;;  %v1433_v48 = vld [vmem:[#allocation2 + $0x98] sm:$0x1]  ;;  %v2012_v14 = vrot.slane %v2010_v21, 4  ;;  %6046 = vmatprep.subr.bf16.mxu1 %v6418_v63 }
 0x1a6   : > { %v1209_v40 = vshrl.u32 %v5873_v37, 16  ;;  %v1212_v56 = vshll.u32 %v5873_v37, 16  ;;  %v2615_v6 = vsel %vm6777_vm8, %v2613_v22, %v2614_v50  ;;  %v1207_v32 = vrot.slane %v1203_v30, 4 }
 0x1a7   : > { %v1423_v0 = vsel %vm6853_vm13, %v1206_v53, %v1422_v9  ;;  %v1231_v46 = vor.u32 %v1229_v17, %v1228_v61  ;;  %v1233_v19 = vrot.slane %v1228_v61, 4  ;;  %v5699_v25 = vcombine.low %v2612_v16, %v2615_v6  ;;  %6047 = vmatpush3.bf16.msra.mxu1 %v6419_v12  ;;  %v1426_v17 = vld [vmem:[#allocation2 + $0x8c] sm:$0x1]  ;;  %v7590_v53 = vld [vmem:[#allocation2 + $0x40] sm:$0xf]  ;;  %v6422_v6 = vld [vmem:[%s9223_s4 + $0x30] sm:$0xff]  }
 0x1a8   : > { %1424 = vst [vmem:[#allocation2 + $0x84] sm:$0xf] %v1423_v0  ;;  %v1211_v51 = vrot.slane %v1209_v40, 7  ;;  %v2014_v37 = vsel %vm6777_vm8, %v2012_v14, %v2013_v45  ;;  %v5586_v8 = vrot.slane %v2514_v55, 9  ;;  %v2604_v30 = vrot.slane %v7490_v18, 5 }
 0x1a9   : > { %v1232_v21 = vsel %vm6877_vm14, %v1224_v5, %v1231_v46  ;;  %v1434_v61 = vsel %vm6740_vm2, %v1233_v19, %v1433_v48  ;;  %3721 = vrot.lane.b32.xlu0 %v5699_v25, %s6585_s26  ;;  %v5652_v9 = vcombine.low %v2011_v36, %v2014_v37  ;;  %v2607_v45 = vrot.slane %v7576_v7, 5 }
 0x1aa   : > { %1432 = vst.msk [vmem:[#allocation2 + $0x94] sm:$0xf] %vm822_vm5, %v1232_v21  ;;  %1435 = vst [vmem:[#allocation2 + $0x98] sm:$0x1] %v1434_v61  ;;  %v1214_v16 = vor.u32 %v1212_v56, %v1211_v51  ;;  %v1216_v22 = vrot.slane %v1211_v51, 4  ;;  %v5571_v55 = vrot.slane %v1904_v33, 9  ;;  %v2605_v5 = vsel %vm6777_vm8, %v5586_v8, %v2604_v30 }
 0x1ab   : > { %3499 = vrot.lane.b32.xlu1 %v5652_v9, %s6584_s25  ;;  %v2606_v63 = vrot.slane %v2604_v30, 4  ;;  %v2003_v25 = vrot.slane %v7590_v53, 5  ;;  %v2006_v36 = vrot.slane %v7580_v43, 5  ;;  %v9307_v12 = vshrl.u32 %v7428_v52, 16  ;;  %v6421_v8 = vld [vmem:[%s9223_s4 + $0x70] sm:$0xff]  }
 0x1ac   : > { %v9308_v51 = vshll.u32 %v7428_v52, 16  ;;  %v1215_v56 = vsel %vm6877_vm14, %v1207_v32, %v1214_v16  ;;  %v1427_v33 = vsel %vm6740_vm2, %v1216_v22, %v1426_v17  ;;  %v9309_v14 = vshrl.u32 %v7267_v38, 16  ;;  %6048 = vmatprep.subr.bf16.mxu1 %v6421_v8  ;;  %v870_v21 = vld [vmem:[#allocation2 + $0x9c] sm:$0x1] }
 0x1ad   : > { %v2834_v48 = vrot.slane %v9307_v12, 4  ;;  %1425 = vst.msk [vmem:[#allocation2 + $0x88] sm:$0xf] %vm822_vm5, %v1215_v56  ;;  %1428 = vst [vmem:[#allocation2 + $0x8c] sm:$0x1] %v1427_v33  ;;  %v2608_v32 = vsel %vm6777_vm8, %v2606_v63, %v2607_v45  ;;  %v2004_v52 = vsel %vm6777_vm8, %v5571_v55, %v2003_v25  ;;  %v2005_v46 = vrot.slane %v2003_v25, 4  ;;  %6049 = vmatpush3.bf16.msra.mxu1 %v6422_v6 }
 0x1ae   : > { %v2837_v40 = vrot.slane %v9308_v51, 5  ;;  %v7613_v0 = vrot.slane %v9309_v14, 4  ;;  %v9311_v19 = vor.u32 %v7445_v26, %v7438_v57  ;;  %v2808_v61 = vshrl.u32 %v7482_v20, 16  ;;  %v1476_v26 = vld [vmem:[#allocation2 + $0x48] sm:$0xf] }
 0x1af   : > { %v5698_v17 = vcombine.low %v2605_v5, %v2608_v32  ;;  %v9313_v30 = vshrl.u32 %v7441_v47, 16  ;;  %v9314_v22 = vshll.u32 %v7441_v47, 16  ;;  %v2007_v57 = vsel %vm6777_vm8, %v2005_v46, %v2006_v36  ;;  %v2699_v25 = vld [vmem:[#allocation2 + $0x60] sm:$0xf]  ;;  %v9315_v36 = vld [vmem:[#allocation16_spill] sm:$0xff] }
 0x1b0   : > { %9310 = vst [vmem:[#allocation6_spill] sm:$0xff] %v7613_v0  ;;  %v7623_v37 = vrot.slane %v9311_v19, 4  ;;  %v2260_v5 = vshrl.u32 %v7448_v59, 16  ;;  %v5651_v63 = vcombine.low %v2004_v52, %v2007_v57  ;;  %v2838_v12 = vor.u32 %v2837_v40, %v2834_v48  ;;  %v7642_v56 = vld [vmem:[#allocation2 + $0x60] sm:$0xf] }
 0x1b1   : > { %v7630_v16 = vrot.slane %v9313_v30, 4  ;;  %v7634_v45 = vrot.slane %v9314_v22, 5  ;;  %3719 = vrot.lane.b32.xlu0 %v5698_v17, %s6585_s26  ;;  %v2811_v51 = vshll.u32 %v7482_v20, 16  ;;  %v2841_v47 = vshll.u32 %v7202_v42, 16  ;;  %v7651_v32 = vld [vmem:[#allocation2 + $0x64] sm:$0xf] }
 0x1b2   : > { %9312 = vst [vmem:[#allocation27_spill] sm:$0xff] %v7623_v37  ;;  %v2845_v33 = vshrl.u32 %v7202_v42, 16  ;;  %v2851_v8 = vshll.u32 %v9315_v36, 16  ;;  %v7647_v6 = vrot.slane %v2808_v61, 4  ;;  %3497 = vrot.lane.b32.xlu1 %v5651_v63, %s6584_s25  ;;  %v5716_v14 = vcombine.low %v2699_v25, %v7278_v35  ;;  %v6423_v36 = vld [vmem:[%s9223_s4 + $0x78] sm:$0xff]  }
 0x1b3   : > { %v1660_v52 = vshrl.u32 %v1476_v26, 16  ;;  %v1663_v48 = vshll.u32 %v1476_v26, 16  ;;  %v5669_v20 = vcombine.low %v7642_v56, %v7651_v32  ;;  %v2839_v40 = vrot.slane %v2838_v12, 4  ;;  %6050 = vmatprep.subr.bf16.mxu1 %v6423_v36  ;;  %v923_v0 = vld [vmem:[#allocation2 + $0xb0] sm:$0x1] }
 0x1b4   : > { %v2843_v46 = vrot.slane %v2841_v47, 5  ;;  %v2847_v19 = vrot.slane %v2845_v33, 4  ;;  %v1669_v61 = vshll.u32 %v7556_v62, 16  ;;  %v1673_v30 = vshrl.u32 %v7556_v62, 16 }
 0x1b5   : > { %3819 = vrot.lane.b32.xlu0 %v5716_v14, %s6584_s25  ;;  %v1662_v42 = vrot.slane %v1660_v52, 4  ;;  %v1665_v17 = vrot.slane %v1663_v48, 5  ;;  %v2223_v35 = vshrl.u32 %v7488_v41, 16  ;;  %v2853_v57 = vrot.slane %v2851_v8, 5 }
 0x1b6   : > { %v2848_v22 = vor.u32 %v2847_v19, %v2843_v46  ;;  %v1679_v26 = vshll.u32 %v7546_v13, 16  ;;  %v2226_v63 = vshll.u32 %v7488_v41, 16  ;;  %3597 = vrot.lane.b32.xlu1 %v5669_v20, %s6586_s27  ;;  %v1671_v47 = vrot.slane %v1669_v61, 5  ;;  %v6424_v13 = vld [vmem:[%s9223_s4 + $0x38] sm:$0xff]  }
 0x1b7   : > { %v1666_v12 = vor.u32 %v1665_v17, %v1662_v42  ;;  %v1675_v33 = vrot.slane %v1673_v30, 4  ;;  %v2880_v14 = vshrl.u32 %v2699_v25, 16  ;;  %v2883_v52 = vshll.u32 %v2699_v25, 16  ;;  %v7670_v42 = vld [vmem:[#allocation2 + $0x54] sm:$0xf]  ;;  %6051 = vmatpush3.bf16.msra.mxu1 %v6424_v13 }
 0x1b8   : > { %v2844_v62 = vsel %vm6787_vm11, %v2839_v40, %v2843_v46  ;;  %v2849_v48 = vrot.slane %v2848_v22, 4  ;;  %v2813_v41 = vrot.slane %v2811_v51, 5  ;;  %v1681_v19 = vrot.slane %v1679_v26, 5  ;;  %v873_v46 = vld [vmem:[#allocation2 + $0xa8] sm:$0x1] }
 0x1b9   : > { %v1667_v8 = vrot.slane %v1666_v12, 4  ;;  %v1676_v20 = vor.u32 %v1675_v33, %v1671_v47  ;;  %v7674_v61 = vrot.slane %v2260_v5, 4  ;;  %v7676_v25 = vrot.slane %v2223_v35, 4  ;;  %v9317_v35 = vld [vmem:[#allocation9_spill] sm:$0xff] }
 0x1ba   : > { %v2854_v40 = vsel %vm6787_vm11, %v2849_v48, %v2853_v57  ;;  %v7680_v30 = vrot.slane %v2226_v63, 5  ;;  %v7684_v12 = vrot.slane %v2880_v14, 4  ;;  %v7686_v33 = vrot.slane %v2883_v52, 5  ;;  %v1474_v48 = vld [vmem:[#allocation2 + $0x3c] sm:$0xf] }
 0x1bb   : > { %9316 = vst [vmem:[#allocation16_spill] sm:$0xff] %v7674_v61  ;;  %v5730_v51 = vcombine.low %v2844_v62, %v2854_v40  ;;  %v1672_v22 = vsel %vm6787_vm11, %v1667_v8, %v1671_v47  ;;  %v1677_v26 = vrot.slane %v1676_v20, 4  ;;  %v2856_v5 = vshrl.u32 %v7670_v42, 16  ;;  %v6458_v62 = vld [vmem:[#allocation2 + $0x40] sm:$0xf] }
 0x1bc   : > { %v745_v36 = vmul.f32 %v7473_v11, %v9317_v35  ;;  %v874_v63 = vsel %vm6740_vm2, 0, %v873_v46  ;;  %v2814_v47 = vor.u32 %v2813_v41, %v7647_v6  ;;  %v2817_v14 = vshll.u32 %v6458_v62, 16  ;;  %v7698_v8 = vld [vmem:[#allocation2 + $0x58] sm:$0xf]  ;;  %v7702_v40 = vld [vmem:[#allocation2 + $0x54] sm:$0xf] }
 0x1bd   : > { %3895 = vrot.lane.b32.xlu0 %v5730_v51, %s6586_s27  ;;  %v1682_v57 = vsel %vm6787_vm11, %v1677_v26, %v1681_v19  ;;  %v2859_v13 = vshll.u32 %v7670_v42, 16  ;;  %v5715_v20 = vcombine.low %v7670_v42, %v7698_v8  ;;  %875 = vst [vmem:[#allocation2 + $0xa8] sm:$0x1] %v874_v63  ;;  %v7705_v51 = vld [vmem:[#allocation2 + $0x58] sm:$0xf]  ;;  %v2821_v41 = vshrl.u32 %v6458_v62, 16 }
 0x1be   : > { %v5636_v52 = vcombine.low %v1672_v22, %v1682_v57  ;;  %v784_v19 = vadd.f32 %v7495_v4, %v745_v36  ;;  %v2815_v46 = vrot.slane %v2814_v47, 4  ;;  %v2819_v6 = vrot.slane %v2817_v14, 5  ;;  %v6460_v26 = vld [vmem:[#allocation2 + $0x44] sm:$0x1] }
 0x1bf   : > { %v2827_v35 = vshll.u32 %v6460_v26, 16  ;;  %v5668_v22 = vcombine.low %v7702_v40, %v7705_v51  ;;  %v1636_v55 = vshrl.u32 %v1474_v48, 16  ;;  %v1639_v42 = vshll.u32 %v1474_v48, 16  ;;  %v9318_v48 = vld [vmem:[#allocation11_spill] sm:$0xff] }
 0x1c0   : > { %3419 = vrot.lane.b32.xlu1 %v5636_v52, %s6585_s26  ;;  %v816_v57 = vmax.f32 %v784_v19, 0.0  ;;  %v2820_v36 = vsel %vm6787_vm11, %v2815_v46, %v2819_v6  ;;  %v2823_v63 = vrot.slane %v2821_v41, 4  ;;  %v1645_v47 = vshll.u32 %v7590_v53, 16 }
 0x1c1   : > { %3817 = vrot.lane.b32.xlu0 %v5715_v20, %s6584_s25  ;;  %v2829_v9 = vrot.slane %v2827_v35, 5  ;;  %v1638_v14 = vrot.slane %v1636_v55, 4  ;;  %v1641_v26 = vrot.slane %v1639_v42, 5  ;;  %v1649_v52 = vshrl.u32 %v7590_v53, 16 }
 0x1c2   : > { %v5878_v62 = vpack.c.bf16 %v816_v57, %v816_v57  ;;  %v2824_v17 = vor.u32 %v2823_v63, %v2819_v6  ;;  %v1647_v61 = vrot.slane %v1645_v47, 5  ;;  %v1655_v19 = vshll.u32 %v7580_v43, 16  ;;  %v9319_v47 = vld [vmem:[#allocation12_spill] sm:$0xff] }
 0x1c3   : > { %v743_v20 = vmul.f32 %v7473_v11, %v9318_v48  ;;  %v1642_v35 = vor.u32 %v1641_v26, %v1638_v14  ;;  %v1651_v59 = vrot.slane %v1649_v52, 4  ;;  %v871_v53 = vsel %vm6740_vm2, 0, %v870_v21  ;;  %v920_v48 = vld [vmem:[#allocation2 + $0xa4] sm:$0x1]  ;;  %v9320_v52 = vld [vmem:[#allocation13_spill] sm:$0xff] }
 0x1c4   : > { %3595 = vrot.lane.b32.xlu1 %v5668_v22, %s6586_s27  ;;  %v1252_v46 = vshrl.u32 %v5878_v62, 16  ;;  %v1255_v41 = vshll.u32 %v5878_v62, 16  ;;  %v2825_v57 = vrot.slane %v2824_v17, 4  ;;  %v1657_v55 = vrot.slane %v1655_v19, 5  ;;  %872 = vst [vmem:[#allocation2 + $0x9c] sm:$0x1] %v871_v53 }
 0x1c5   : > { %v782_v42 = vadd.f32 %v7495_v4, %v743_v20  ;;  %v1643_v43 = vrot.slane %v1642_v35, 4  ;;  %v1652_v63 = vor.u32 %v1651_v59, %v1647_v61  ;;  %v746_v22 = vmul.f32 %v7473_v11, %v9319_v47  ;;  %v1443_v62 = vld [vmem:[#allocation2 + $0xa8] sm:$0xf]  ;;  %v2517_v19 = vld [vmem:[#allocation2 + $0x60] sm:$0xe] }
 0x1c6   : > { %v7722_v6 = vrot.slane %v1252_v46, 7  ;;  %v2830_v14 = vsel %vm6787_vm11, %v2825_v57, %v2829_v9  ;;  %v924_v26 = vsel %vm6747_vm4, 0, %v923_v0  ;;  %v744_v21 = vmul.f32 %v7473_v11, %v9320_v52  ;;  %v2117_v0 = vld [vmem:[#allocation2 + $0x68] sm:$0x1] }
 0x1c7   : > { %v814_v17 = vmax.f32 %v782_v42, 0.0  ;;  %v7732_v20 = vrot.slane %v2856_v5, 4  ;;  %v5729_v46 = vcombine.low %v2820_v36, %v2830_v14  ;;  %v1648_v35 = vsel %vm6787_vm11, %v1643_v43, %v1647_v61  ;;  %925 = vst [vmem:[#allocation2 + $0xb0] sm:$0x1] %v924_v26  ;;  %v1907_v61 = vld [vmem:[#allocation2 + $0x60] sm:$0xe] }
 0x1c8   : > { %v1257_v59 = vor.u32 %v1255_v41, %v7722_v6  ;;  %v1653_v53 = vrot.slane %v1652_v63, 4  ;;  %v785_v9 = vadd.f32 %v7495_v4, %v746_v22  ;;  %v783_v57 = vadd.f32 %v7495_v4, %v744_v21  ;;  %v7751_v26 = vld [vmem:[#allocation2 + $0x68] sm:$0x1] }
 0x1c9   : > { %v5876_v47 = vpack.c.bf16 %v814_v17, %v814_v17  ;;  %v7739_v42 = vrot.slane %v2859_v13, 5  ;;  %3893 = vrot.lane.b32.xlu0 %v5729_v46, %s6586_s27  ;;  %v921_v5 = vsel %vm6747_vm4, 0, %v920_v48  ;;  %v5589_v36 = vrot.slane %v2517_v19, 9  ;;  %v7748_v13 = vld [vmem:[#allocation2 + $0x64] sm:$0xf] }
 0x1ca   : > { %v1444_v11 = vsel %vm6853_vm13, %v1257_v59, %v1443_v62  ;;  %v1658_v41 = vsel %vm6787_vm11, %v1653_v53, %v1657_v55  ;;  %v817_v4 = vmax.f32 %v785_v9, 0.0  ;;  %922 = vst [vmem:[#allocation2 + $0xa4] sm:$0x1] %v921_v5  ;;  %v815_v14 = vmax.f32 %v783_v57, 0.0  ;;  %v7754_v59 = vpop.permute.xlu0 %3407  ;;  %v2516_v5 = vld [vmem:[#allocation2 + $0x54] sm:$0xe] }
 0x1cb   : > { %1445 = vst [vmem:[#allocation2 + $0xa8] sm:$0xf] %v1444_v11  ;;  %v1235_v43 = vshrl.u32 %v5876_v47, 16  ;;  %v1238_v63 = vshll.u32 %v5876_v47, 16  ;;  %v5635_v22 = vcombine.low %v1648_v35, %v1658_v41  ;;  %v2625_v62 = vrot.slane %v7651_v32, 5  ;;  %9321 = vst [vmem:[#allocation9_spill] sm:$0xff] %v7754_v59 }
 0x1cc   : > { %v2628_v17 = vrot.slane %v2117_v0, 5  ;;  %v5879_v52 = vpack.c.bf16 %v817_v4, %v817_v4  ;;  %v5574_v21 = vrot.slane %v1907_v61, 9  ;;  %v2024_v19 = vrot.slane %v7748_v13, 5  ;;  %v1436_v46 = vld [vmem:[#allocation2 + $0x9c] sm:$0xf] }
 0x1cd   : > { %v1237_v48 = vrot.slane %v1235_v43, 7  ;;  %v1258_v55 = vrot.slane %v7722_v6, 4  ;;  %3417 = vrot.lane.b32.xlu1 %v5635_v22, %s6585_s26  ;;  %v5877_v53 = vpack.c.bf16 %v815_v14, %v815_v14  ;;  %v2626_v35 = vsel %vm6777_vm8, %v5589_v36, %v2625_v62  ;;  %v2116_v4 = vld [vmem:[#allocation2 + $0x5c] sm:$0x1]  ;;  %v7765_v22 = vpop.permute.xlu1 %3487 }
 0x1ce   : > { %v2627_v47 = vrot.slane %v2625_v62, 4  ;;  %v1260_v57 = vshrl.u32 %v5879_v52, 16  ;;  %v1263_v0 = vshll.u32 %v5879_v52, 16  ;;  %v2027_v11 = vrot.slane %v7751_v26, 5  ;;  %v7769_v52 = vld [vmem:[#allocation2 + $0x5c] sm:$0x1] }
 0x1cf   : > { %v1240_v9 = vor.u32 %v1238_v63, %v1237_v48  ;;  %v1243_v61 = vshrl.u32 %v5877_v53, 16  ;;  %v1246_v41 = vshll.u32 %v5877_v53, 16  ;;  %v2025_v6 = vsel %vm6777_vm8, %v5574_v21, %v2024_v19  ;;  %v1447_v53 = vld [vmem:[#allocation2 + $0xb0] sm:$0x1] }
 0x1d0   : > { %v2629_v43 = vsel %vm6777_vm8, %v2627_v47, %v2628_v17  ;;  %v1262_v63 = vrot.slane %v1260_v57, 7  ;;  %v2026_v62 = vrot.slane %v2024_v19, 4  ;;  %v1241_v37 = vrot.slane %v1237_v48, 4  ;;  %v3128_v19 = vld [vmem:[#allocation2 + $0x84] sm:$0xe] }
 0x1d1   : > { %v1437_v36 = vsel %vm6853_vm13, %v1240_v9, %v1436_v46  ;;  %v5701_v14 = vcombine.low %v2626_v35, %v2629_v43  ;;  %v1245_v38 = vrot.slane %v1243_v61, 7  ;;  %v5588_v17 = vrot.slane %v2516_v5, 9  ;;  %v1440_v59 = vld [vmem:[#allocation2 + $0xa4] sm:$0x1]  ;;  %v7775_v9 = vpop.permute.xlu0 %3823  ;;  %v7779_v61 = vld [vmem:[#allocation2 + $0x88] sm:$0xf] }
 0x1d2   : > { %1438 = vst [vmem:[#allocation2 + $0x9c] sm:$0xf] %v1437_v36  ;;  %v2618_v47 = vrot.slane %v7705_v51, 5  ;;  %v1265_v21 = vor.u32 %v1263_v0, %v1262_v63  ;;  %v1267_v15 = vrot.slane %v1262_v63, 4  ;;  %v2028_v46 = vsel %vm6777_vm8, %v2026_v62, %v2027_v11  ;;  %9322 = vst [vmem:[#allocation11_spill] sm:$0xff] %v7775_v9 }
 0x1d3   : > { %3725 = vrot.lane.b32.xlu0 %v5701_v14, %s6585_s26  ;;  %v2621_v35 = vrot.slane %v2116_v4, 5  ;;  %v1248_v57 = vor.u32 %v1246_v41, %v1245_v38  ;;  %v1250_v48 = vrot.slane %v1245_v38, 4  ;;  %v5654_v43 = vcombine.low %v2025_v6, %v2028_v46  ;;  %v7781_v51 = vld [vmem:[#allocation2 + $0x8c] sm:$0x1]  ;;  %v7787_v36 = vld [vmem:[#allocation2 + $0x58] sm:$0xf] }
 0x1d4   : > { %v2619_v5 = vsel %vm6777_vm8, %v5588_v17, %v2618_v47  ;;  %v1266_v0 = vsel %vm6877_vm14, %v1258_v55, %v1265_v21  ;;  %v1448_v11 = vsel %vm6740_vm2, %v1267_v15, %v1447_v53  ;;  %v2620_v4 = vrot.slane %v2618_v47, 4  ;;  %v7797_v15 = vpop.permute.xlu1 %3807  ;;  %v7817_v9 = vld [vmem:[#allocation2 + $0x98] sm:$0x1] }
 0x1d5   : > { %v5573_v63 = vrot.slane %v1906_v49, 9  ;;  %1446 = vst.msk [vmem:[#allocation2 + $0xac] sm:$0xf] %vm822_vm5, %v1266_v0  ;;  %1449 = vst [vmem:[#allocation2 + $0xb0] sm:$0x1] %v1448_v11  ;;  %v1249_v38 = vsel %vm6877_vm14, %v1241_v37, %v1248_v57  ;;  %v1441_v41 = vsel %vm6740_vm2, %v1250_v48, %v1440_v59  ;;  %3503 = vrot.lane.b32.xlu1 %v5654_v43, %s6584_s25  ;;  %v2017_v55 = vrot.slane %v7787_v36, 5  ;;  %v7810_v43 = vpop.permute.xlu0 %3821 }
 0x1d6   : > { %v2020_v6 = vrot.slane %v7769_v52, 5  ;;  %1439 = vst.msk [vmem:[#allocation2 + $0xa0] sm:$0xf] %vm822_vm5, %v1249_v38  ;;  %1442 = vst [vmem:[#allocation2 + $0xa4] sm:$0x1] %v1441_v41  ;;  %v2622_v49 = vsel %vm6777_vm8, %v2620_v4, %v2621_v35  ;;  %v5607_v14 = vrot.slane %v3128_v19, 9  ;;  %v2886_v21 = vor.u32 %v7686_v33, %v7684_v12 }
 0x1d7   : > { %v3248_v37 = vrot.slane %v7779_v61, 5  ;;  %v3251_v62 = vrot.slane %v7781_v51, 5  ;;  %v1480_v59 = vld [vmem:[#allocation2 + $0x60] sm:$0xf]  ;;  %v5700_v53 = vcombine.low %v2619_v5, %v2622_v49  ;;  %v2018_v17 = vsel %vm6777_vm8, %v5573_v63, %v2017_v55  ;;  %v6461_v48 = vld [vmem:[#allocation2 + $0x64] sm:$0xf] }
 0x1d8   : > { %v2019_v47 = vrot.slane %v2017_v55, 4  ;;  %v2889_v35 = vshll.u32 %v6461_v48, 16  ;;  %v2893_v19 = vshrl.u32 %v6461_v48, 16  ;;  %9323 = vst [vmem:[#allocation12_spill] sm:$0xff] %v7810_v43  ;;  %v2887_v0 = vrot.slane %v2886_v21, 4 }
 0x1d9   : > { %v3249_v46 = vsel %vm6777_vm8, %v5607_v14, %v3248_v37  ;;  %v3250_v57 = vrot.slane %v3248_v37, 4  ;;  %3723 = vrot.lane.b32.xlu0 %v5700_v53, %s6585_s26  ;;  %v6462_v11 = vld [vmem:[#allocation2 + $0x68] sm:$0x1]  ;;  %v1708_v63 = vshrl.u32 %v1480_v59, 16  ;;  %v3129_v55 = vld [vmem:[#allocation2 + $0x90] sm:$0xe]  ;;  %v7819_v53 = vpop.permute.xlu1 %3585 }
 0x1da   : > { %v2021_v5 = vsel %vm6777_vm8, %v2019_v47, %v2020_v6  ;;  %v2899_v4 = vshll.u32 %v6462_v11, 16  ;;  %v2891_v33 = vrot.slane %v2889_v35, 5  ;;  %v2895_v41 = vrot.slane %v2893_v19, 4  ;;  %v7826_v21 = vld [vmem:[#allocation2 + $0x94] sm:$0xf] }
 0x1db   : > { %v5653_v38 = vcombine.low %v2018_v17, %v2021_v5  ;;  %v3252_v12 = vsel %vm6777_vm8, %v3250_v57, %v3251_v62  ;;  %v1710_v37 = vrot.slane %v1708_v63, 4  ;;  %v1711_v48 = vshll.u32 %v1480_v59, 16 }
 0x1dc   : > { %v5751_v49 = vcombine.low %v3249_v46, %v3252_v12  ;;  %v2901_v14 = vrot.slane %v2899_v4, 5  ;;  %v2892_v6 = vsel %vm6787_vm11, %v2887_v0, %v2891_v33  ;;  %v2896_v17 = vor.u32 %v2895_v41, %v2891_v33  ;;  %v7832_v4 = vpop.permute.xlu0 %3713 }
 0x1dd   : > { %3501 = vrot.lane.b32.xlu1 %v5653_v38, %s6584_s25  ;;  %v1717_v47 = vshll.u32 %v7748_v13, 16  ;;  %v1721_v62 = vshrl.u32 %v7748_v13, 16  ;;  %v1713_v46 = vrot.slane %v1711_v48, 5  ;;  %v1727_v59 = vshll.u32 %v7751_v26, 16 }
 0x1de   : > { %6253 = vmatmul.mubr.msk.bf16.gmra.mrb[32].mxu0 %vm3967_vm15, %v5751_v49  ;;  %v5608_v57 = vrot.slane %v3129_v55, 9  ;;  %v3255_v35 = vrot.slane %v7826_v21, 5  ;;  %v2897_v19 = vrot.slane %v2896_v17, 4  ;;  %v3258_v0 = vrot.slane %v7817_v9, 5 }
 0x1df   : > { %v1719_v5 = vrot.slane %v1717_v47, 5  ;;  %v1723_v11 = vrot.slane %v1721_v62, 4  ;;  %v1714_v63 = vor.u32 %v1713_v46, %v1710_v37  ;;  %v1729_v38 = vrot.slane %v1727_v59, 5  ;;  %v7844_v47 = vpop.permute.xlu1 %3583 }
 0x1e0   : > { %v3256_v13 = vsel %vm6777_vm8, %v5608_v57, %v3255_v35  ;;  %v3257_v12 = vrot.slane %v3255_v35, 4  ;;  %v2902_v33 = vsel %vm6787_vm11, %v2897_v19, %v2901_v14  ;;  %v2862_v41 = vor.u32 %v7739_v42, %v7732_v20  ;;  %v7851_v20 = vld [vmem:[#allocation2 + $0x84] sm:$0xf] }
 0x1e1   : > { %v1724_v26 = vor.u32 %v1723_v11, %v1719_v5  ;;  %v2865_v55 = vshll.u32 %v7698_v8, 16  ;;  %v5732_v49 = vcombine.low %v2892_v6, %v2902_v33  ;;  %v1715_v48 = vrot.slane %v1714_v63, 4  ;;  %v1908_v11 = vld [vmem:[#allocation2 + $0x6c] sm:$0xe]  ;;  %v6464_v63 = vld [vmem:[#allocation2 + $0x70] sm:$0xf] }
 0x1e2   : > { %v3259_v17 = vsel %vm6777_vm8, %v3257_v12, %v3258_v0  ;;  %v2869_v37 = vshrl.u32 %v7698_v8, 16  ;;  %v9324_v62 = vor.u32 %v7634_v45, %v7630_v16  ;;  %v2863_v6 = vrot.slane %v2862_v41, 4  ;;  %v6463_v8 = vld [vmem:[#allocation2 + $0x5c] sm:$0x1]  ;;  %v7862_v12 = vpop.permute.xlu0 %3729 }
 0x1e3   : > { %v1725_v14 = vrot.slane %v1724_v26, 4  ;;  %v5752_v59 = vcombine.low %v3256_v13, %v3259_v17  ;;  %v2867_v57 = vrot.slane %v2865_v55, 5  ;;  %3899 = vrot.lane.b32.xlu0 %v5732_v49, %s6586_s27  ;;  %v1720_v42 = vsel %vm6787_vm11, %v1715_v48, %v1719_v5  ;;  %9325 = vst [vmem:[#allocation13_spill] sm:$0xff] %v7862_v12  ;;  %v6465_v48 = vld [vmem:[#allocation2 + $0x74] sm:$0x1] }
 0x1e4   : > { %v7849_v46 = vrot.slane %v9324_v62, 4  ;;  %v2871_v35 = vrot.slane %v2869_v37, 4  ;;  %v2875_v19 = vshll.u32 %v6463_v8, 16  ;;  %v2229_v16 = vor.u32 %v7680_v30, %v7676_v25 }
 0x1e5   : > { %v2236_v45 = vshrl.u32 %v7490_v18, 16  ;;  %v1730_v0 = vsel %vm6787_vm11, %v1725_v14, %v1729_v38  ;;  %6256 = vmatprep.mubr.msk.bf16.mxu0 %vm3967_vm15, %v5752_v59  ;;  %v2031_v13 = vrot.slane %v6464_v63, 5  ;;  %v2952_v41 = vshrl.u32 %v7851_v20, 16  ;;  %v7870_v14 = vpop.permute.xlu1 %3599  ;;  %v7883_v63 = vld [vmem:[#allocation2 + $0x7c] sm:$0xf] }
 0x1e6   : > { %v5638_v5 = vcombine.low %v1720_v42, %v1730_v0  ;;  %v2872_v33 = vor.u32 %v2871_v35, %v2867_v57  ;;  %v2877_v26 = vrot.slane %v2875_v19, 5  ;;  %v5575_v55 = vrot.slane %v1908_v11, 9  ;;  %9326 = vst [vmem:[#allocation28_spill] sm:$0xff] %v7870_v14  ;;  %v1484_v19 = vld [vmem:[#allocation2 + $0x78] sm:$0xf] }
 0x1e7   : > { %v2033_v49 = vrot.slane %v2031_v13, 4  ;;  %v2034_v25 = vrot.slane %v6465_v48, 5  ;;  %v2955_v30 = vshll.u32 %v7851_v20, 16  ;;  %v2868_v38 = vsel %vm6787_vm11, %v2863_v6, %v2867_v57  ;;  %v7895_v48 = vld [vmem:[#allocation2 + $0x80] sm:$0x1] }
 0x1e8   : > { %3423 = vrot.lane.b32.xlu1 %v5638_v5, %s6585_s26  ;;  %v2873_v37 = vrot.slane %v2872_v33, 4  ;;  %v2954_v62 = vrot.slane %v2952_v41, 4  ;;  %v7872_v59 = vrot.slane %v2236_v45, 4  ;;  %v2032_v42 = vsel %vm6777_vm8, %v5575_v55, %v2031_v13  ;;  %v7886_v33 = vld [vmem:[#allocation2 + $0x78] sm:$0xf]  ;;  %v7889_v55 = vpop.permute.xlu0 %3711 }
 0x1e9   : > { %v2035_v35 = vsel %vm6777_vm8, %v2033_v49, %v2034_v25  ;;  %v2957_v8 = vrot.slane %v2955_v30, 5  ;;  %v7878_v11 = vrot.slane %v2229_v16, 4  ;;  %v2961_v41 = vshll.u32 %v7779_v61, 16  ;;  %v2520_v45 = vld [vmem:[#allocation2 + $0x84] sm:$0xe]  ;;  %v7905_v17 = vpop.permute.xlu1 %3491 }
 0x1ea   : > { %9327 = vst [vmem:[#allocation29_spill] sm:$0xff] %v7872_v59  ;;  %v2878_v57 = vsel %vm6787_vm11, %v2873_v37, %v2877_v26  ;;  %v5655_v6 = vcombine.low %v2032_v42, %v2035_v35  ;;  %v2965_v49 = vshrl.u32 %v7779_v61, 16  ;;  %v2971_v26 = vshll.u32 %v7781_v51, 16  ;;  %v879_v42 = vld [vmem:[#allocation2 + $0xc0] sm:$0x1]  ;;  %9329 = vst [vmem:[#allocation31_spill] sm:$0xff] %v7905_v17 }
 0x1eb   : > { %9328 = vst [vmem:[#allocation30_spill] sm:$0xff] %v7878_v11  ;;  %v5731_v5 = vcombine.low %v2868_v38, %v2878_v57  ;;  %v2958_v13 = vor.u32 %v2957_v8, %v2954_v62  ;;  %v1756_v25 = vshrl.u32 %v1484_v19, 16  ;;  %v2963_v38 = vrot.slane %v2961_v41, 5  ;;  %v7901_v8 = vld [vmem:[#allocation2 + $0x7c] sm:$0xf] }
 0x1ec   : > { %3505 = vrot.lane.b32.xlu1 %v5655_v6, %s6584_s25  ;;  %v1759_v37 = vshll.u32 %v1484_v19, 16  ;;  %v1765_v62 = vshll.u32 %v7883_v63, 16  ;;  %v5719_v35 = vcombine.low %v7851_v20, %v7779_v61  ;;  %v5671_v57 = vcombine.low %v7886_v33, %v7901_v8  ;;  %v7913_v20 = vld [vmem:[%s9221_s2] ss:$0 sm:$0xff]  ;;  %v7924_v16 = vld [vmem:[#allocation2 + $0x88] sm:$0xf]  ;;  %v7926_v12 = vpop.permute.xlu0 %3727 }
 0x1ed   : > { %3897 = vrot.lane.b32.xlu0 %v5731_v5, %s6586_s27  ;;  %v2959_v30 = vrot.slane %v2958_v13, 4  ;;  %v2967_v51 = vrot.slane %v2965_v49, 4  ;;  %v1758_v6 = vrot.slane %v1756_v25, 4  ;;  %v2973_v5 = vrot.slane %v2971_v26, 5  ;;  %v7919_v25 = vld [vmem:[#allocation2 + $0x8c] sm:$0x1] }
 0x1ee   : > { %v1761_v13 = vrot.slane %v1759_v37, 5  ;;  %v1767_v41 = vrot.slane %v1765_v62, 5  ;;  %v1769_v19 = vshrl.u32 %v7883_v63, 16  ;;  %v1775_v61 = vshll.u32 %v7895_v48, 16  ;;  %9330 = vst [vmem:[#allocation32_spill] sm:$0xff] %v7919_v25  ;;  %9331 = vst [vmem:[#allocation33_spill] sm:$0xff] %v7926_v12 }
 0x1ef   : > { %v2968_v0 = vor.u32 %v2967_v51, %v2963_v38  ;;  %v749_v49 = vmul.f32 %v7913_v20, %v7337_v27  ;;  %v880_v26 = vsel %vm6740_vm2, 0, %v879_v42  ;;  %v1478_v37 = vld [vmem:[#allocation2 + $0x54] sm:$0xf]  ;;  %v2964_v62 = vsel %vm6787_vm11, %v2959_v30, %v2963_v38  ;;  %v6468_v42 = vld [vmem:[%s9222_s3] ss:$0 sm:$0xff] }
 0x1f0   : > { %3601 = vrot.lane.b32.xlu1 %v5671_v57, %s6586_s27  ;;  %v1762_v57 = vor.u32 %v1761_v13, %v1758_v6  ;;  %v1771_v51 = vrot.slane %v1769_v19, 4  ;;  %881 = vst [vmem:[#allocation2 + $0xc0] sm:$0x1] %v880_v26  ;;  %v5592_v14 = vrot.slane %v2520_v45, 9  ;;  %v1777_v43 = vrot.slane %v1775_v61, 5  ;;  %v7937_v19 = vpop.permute.xlu1 %3489 }
 0x1f1   : > { %3825 = vrot.lane.b32.xlu0 %v5719_v35, %s6584_s25  ;;  %v2969_v27 = vrot.slane %v2968_v0, 4  ;;  %v788_v59 = vadd.f32 %v6468_v42, %v749_v49  ;;  %v2646_v35 = vrot.slane %v7924_v16, 5  ;;  %v2649_v30 = vrot.slane %v7919_v25, 5 }
 0x1f2   : > { %v1763_v11 = vrot.slane %v1762_v57, 4  ;;  %v1772_v7 = vor.u32 %v1771_v51, %v1767_v41  ;;  %v1684_v38 = vshrl.u32 %v1478_v37, 16  ;;  %v1687_v17 = vshll.u32 %v1478_v37, 16  ;;  %v929_v37 = vld [vmem:[#allocation2 + $0xc8] sm:$0x1] }
 0x1f3   : > { %v2974_v6 = vsel %vm6787_vm11, %v2969_v27, %v2973_v5  ;;  %v820_v45 = vmax.f32 %v788_v59, 0.0  ;;  %v2647_v0 = vsel %vm6777_vm8, %v5592_v14, %v2646_v35  ;;  %v2648_v13 = vrot.slane %v2646_v35, 4 }
 0x1f4   : > { %v5735_v61 = vcombine.low %v2964_v62, %v2974_v6  ;;  %v1768_v49 = vsel %vm6787_vm11, %v1763_v11, %v1767_v41  ;;  %v1773_v26 = vrot.slane %v1772_v7, 4  ;;  %v1686_v57 = vrot.slane %v1684_v38, 4  ;;  %v876_v11 = vld [vmem:[#allocation2 + $0xb4] sm:$0x1]  ;;  %v7949_v7 = vpop.permute.xlu0 %3811 }
 0x1f5   : > { %v5882_v51 = vpack.c.bf16 %v820_v45, %v820_v45  ;;  %v2650_v12 = vsel %vm6777_vm8, %v2648_v13, %v2649_v30  ;;  %v1693_v5 = vshll.u32 %v7787_v36, 16  ;;  %v1697_v62 = vshrl.u32 %v7787_v36, 16 }
 0x1f6   : > { %3905 = vrot.lane.b32.xlu0 %v5735_v61, %s6586_s27  ;;  %v1778_v14 = vsel %vm6787_vm11, %v1773_v26, %v1777_v43  ;;  %v5704_v59 = vcombine.low %v2647_v0, %v2650_v12  ;;  %v1703_v27 = vshll.u32 %v7769_v52, 16  ;;  %v1689_v30 = vrot.slane %v1687_v17, 5  ;;  %v926_v0 = vld [vmem:[#allocation2 + $0xbc] sm:$0x1]  ;;  %v7960_v17 = vpop.permute.xlu1 %3589 }
 0x1f7   : > { %v5640_v41 = vcombine.low %v1768_v49, %v1778_v14  ;;  %v1286_v35 = vshrl.u32 %v5882_v51, 16  ;;  %v1289_v38 = vshll.u32 %v5882_v51, 16  ;;  %v1695_v6 = vrot.slane %v1693_v5, 5  ;;  %9332 = vst [vmem:[#allocation34_spill] sm:$0xff] %v7960_v17  ;;  %v1457_v49 = vld [vmem:[#allocation2 + $0xc0] sm:$0xf] }
 0x1f8   : > { %v1699_v45 = vrot.slane %v1697_v62, 4  ;;  %v1705_v13 = vrot.slane %v1703_v27, 5  ;;  %v747_v61 = vmul.f32 %v7913_v20, %v7376_v23  ;;  %v1690_v36 = vor.u32 %v1689_v30, %v1686_v57  ;;  %v2707_v5 = vld [vmem:[#allocation2 + $0x90] sm:$0xf]  ;;  %v7971_v30 = vpop.permute.xlu0 %3887 }
 0x1f9   : > { %3427 = vrot.lane.b32.xlu1 %v5640_v41, %s6585_s26  ;;  %v7954_v43 = vrot.slane %v1286_v35, 7  ;;  %v877_v52 = vsel %vm6740_vm2, 0, %v876_v11  ;;  %v750_v12 = vmul.f32 %v7913_v20, %v7419_v60  ;;  %v930_v23 = vsel %vm6747_vm4, 0, %v929_v37 }
 0x1fa   : > { %3731 = vrot.lane.b32.xlu0 %v5704_v59, %s6585_s26  ;;  %v1700_v26 = vor.u32 %v1699_v45, %v1695_v6  ;;  %v786_v51 = vadd.f32 %v6468_v42, %v747_v61  ;;  %878 = vst [vmem:[#allocation2 + $0xb4] sm:$0x1] %v877_v52  ;;  %v748_v57 = vmul.f32 %v7913_v20, %v7425_v2  ;;  %v1691_v62 = vrot.slane %v1690_v36, 4 }
 0x1fb   : > { %v1291_v60 = vor.u32 %v1289_v38, %v7954_v43  ;;  %v789_v27 = vadd.f32 %v6468_v42, %v750_v12  ;;  %931 = vst [vmem:[#allocation2 + $0xc8] sm:$0x1] %v930_v23  ;;  %v927_v35 = vsel %vm6747_vm4, 0, %v926_v0  ;;  %v2976_v38 = vshrl.u32 %v2707_v5, 16 }
 0x1fc   : > { %v1701_v11 = vrot.slane %v1700_v26, 4  ;;  %v818_v41 = vmax.f32 %v786_v51, 0.0  ;;  %v787_v59 = vadd.f32 %v6468_v42, %v748_v57  ;;  %v1696_v2 = vsel %vm6787_vm11, %v1691_v62, %v1695_v6  ;;  %928 = vst [vmem:[#allocation2 + $0xbc] sm:$0x1] %v927_v35  ;;  %v1909_v57 = vld [vmem:[#allocation2 + $0x78] sm:$0xe]  ;;  %v7987_v35 = vpop.permute.xlu0 %3809 }
 0x1fd   : > { %v1458_v37 = vsel %vm6853_vm13, %v1291_v60, %v1457_v49  ;;  %v821_v20 = vmax.f32 %v789_v27, 0.0  ;;  %v2979_v36 = vshll.u32 %v2707_v5, 16  ;;  %v2346_v28 = vshll.u32 %v7886_v33, 16  ;;  %v7981_v49 = vpop.permute.xlu1 %3411 }
 0x1fe   : > { %1459 = vst [vmem:[#allocation2 + $0xc0] sm:$0xf] %v1458_v37  ;;  %v1706_v45 = vsel %vm6787_vm11, %v1701_v11, %v1705_v13  ;;  %v5880_v61 = vpack.c.bf16 %v818_v41, %v818_v41  ;;  %v819_v42 = vmax.f32 %v787_v59, 0.0  ;;  %v5720_v0 = vcombine.low %v2707_v5, %v7826_v21 }
 0x1ff   : > { %v5637_v52 = vcombine.low %v1696_v2, %v1706_v45  ;;  %v5883_v12 = vpack.c.bf16 %v821_v20, %v821_v20  ;;  %v1292_v6 = vrot.slane %v7954_v43, 4  ;;  %v2978_v62 = vrot.slane %v2976_v38, 4 }
 0x200   : > { %v1269_v26 = vshrl.u32 %v5880_v61, 16  ;;  %v1272_v51 = vshll.u32 %v5880_v61, 16  ;;  %v5881_v23 = vpack.c.bf16 %v819_v42, %v819_v42  ;;  %3827 = vrot.lane.b32.xlu0 %v5720_v0, %s6584_s25  ;;  %v2038_v27 = vrot.slane %v7883_v63, 5 }
 0x201   : > { %3421 = vrot.lane.b32.xlu1 %v5637_v52, %s6585_s26  ;;  %v1294_v13 = vshrl.u32 %v5883_v12, 16  ;;  %v1297_v60 = vshll.u32 %v5883_v12, 16  ;;  %v2981_v59 = vrot.slane %v2979_v36, 5  ;;  %v1450_v43 = vld [vmem:[#allocation2 + $0xb4] sm:$0xf]  ;;  %v5576_v2 = vrot.slane %v1909_v57, 9  ;;  %v7996_v57 = vpop.permute.xlu1 %3587 }
 0x202   : > { %v1271_v11 = vrot.slane %v1269_v26, 7  ;;  %v1277_v41 = vshrl.u32 %v5881_v23, 16  ;;  %v1280_v5 = vshll.u32 %v5881_v23, 16  ;;  %v2040_v20 = vrot.slane %v2038_v27, 4  ;;  %v1461_v52 = vld [vmem:[#allocation2 + $0xc8] sm:$0x1] }
 0x203   : > { %v1296_v37 = vrot.slane %v1294_v13, 7  ;;  %v2041_v45 = vrot.slane %v7895_v48, 5  ;;  %v9333_v12 = vld [vmem:[#allocation7_spill] sm:$0xff]  ;;  %v1454_v17 = vld [vmem:[#allocation2 + $0xbc] sm:$0x1]  ;;  %v2039_v36 = vsel %vm6777_vm8, %v5576_v2, %v2038_v27  ;;  %v2985_v24 = vshll.u32 %v7826_v21, 16 }
 0x204   : > { %v1274_v61 = vor.u32 %v1272_v51, %v1271_v11  ;;  %v1275_v42 = vrot.slane %v1271_v11, 4  ;;  %v1279_v38 = vrot.slane %v1277_v41, 7  ;;  %v9334_v0 = vshll.u32 %v9333_v12, 16  ;;  %v8000_v41 = vld [vmem:[#allocation2 + $0xa0] sm:$0xf]  ;;  %v9335_v2 = vld [vmem:[#allocation14_spill] sm:$0xff] }
 0x205   : > { %v1299_v63 = vor.u32 %v1297_v60, %v1296_v37  ;;  %v1301_v26 = vrot.slane %v1296_v37, 4  ;;  %v2042_v23 = vsel %vm6777_vm8, %v2040_v20, %v2041_v45  ;;  %v3130_v12 = vld [vmem:[#allocation2 + $0x9c] sm:$0xe]  ;;  %v2348_v45 = vrot.slane %v2346_v28, 5 }
 0x206   : > { %v2162_v14 = vrot.slane %v9334_v0, 5  ;;  %v1451_v48 = vsel %vm6853_vm13, %v1274_v61, %v1450_v43  ;;  %v1282_v51 = vor.u32 %v1280_v5, %v1279_v38  ;;  %v1284_v13 = vrot.slane %v1279_v38, 4  ;;  %v8010_v43 = vld [vmem:[#allocation2 + $0xa4] sm:$0x1] }
 0x207   : > { %v5656_v11 = vcombine.low %v2039_v36, %v2042_v23  ;;  %1452 = vst [vmem:[#allocation2 + $0xb4] sm:$0xf] %v1451_v48  ;;  %v1300_v60 = vsel %vm6877_vm14, %v1292_v6, %v1299_v63  ;;  %v1462_v27 = vsel %vm6740_vm2, %v1301_v26, %v1461_v52  ;;  %v9336_v5 = vshrl.u32 %v7886_v33, 16  ;;  %v9338_v33 = vld [vmem:[#allocation8_spill] sm:$0xff]  ;;  %v8036_v48 = vpop.permute.xlu1 %3409 }
 0x208   : > { %v2163_v37 = vsel %vm6787_vm11, %v7239_v39, %v2162_v14  ;;  %v2167_v31 = vor.u32 %v9335_v2, %v2162_v14  ;;  %1460 = vst.msk [vmem:[#allocation2 + $0xc4] sm:$0xf] %vm822_vm5, %v1300_v60  ;;  %1463 = vst [vmem:[#allocation2 + $0xc8] sm:$0x1] %v1462_v27  ;;  %v1283_v6 = vsel %vm6877_vm14, %v1275_v42, %v1282_v51  ;;  %v8022_v39 = vpop.permute.xlu0 %3903  ;;  %v9339_v14 = vshll.u32 %v9338_v33, 16 }
 0x209   : > { %v8014_v20 = vrot.slane %v9336_v5, 4  ;;  %v1455_v61 = vsel %vm6740_vm2, %v1284_v13, %v1454_v17  ;;  %3507 = vrot.lane.b32.xlu1 %v5656_v11, %s6584_s25  ;;  %9337 = vst [vmem:[#allocation7_spill] sm:$0xff] %v8022_v39  ;;  %1453 = vst.msk [vmem:[#allocation2 + $0xb8] sm:$0xf] %vm822_vm5, %v1283_v6  ;;  %v5609_v38 = vrot.slane %v3130_v12, 9  ;;  %v3262_v0 = vrot.slane %v8000_v41, 5 }
 0x20a   : > { %1456 = vst [vmem:[#allocation2 + $0xbc] sm:$0x1] %v1455_v61  ;;  %v2172_v52 = vrot.slane %v9339_v14, 5  ;;  %v2168_v28 = vrot.slane %v2167_v31, 4  ;;  %v3265_v50 = vrot.slane %v8010_v43, 5  ;;  %v2982_v42 = vor.u32 %v2981_v59, %v2978_v62 }
 0x20b   : > { %v2989_v17 = vshrl.u32 %v7826_v21, 16  ;;  %v3263_v26 = vsel %vm6777_vm8, %v5609_v38, %v3262_v0  ;;  %v3264_v36 = vrot.slane %v3262_v0, 4  ;;  %v2995_v23 = vshll.u32 %v7817_v9, 16  ;;  %v3131_v62 = vld [vmem:[#allocation2 + $0xa8] sm:$0xe] }
 0x20c   : > { %v2173_v63 = vsel %vm6787_vm11, %v2168_v28, %v2172_v52  ;;  %v2983_v13 = vrot.slane %v2982_v42, 4  ;;  %v2987_v11 = vrot.slane %v2985_v24, 5  ;;  %v9340_v59 = vshrl.u32 %v7642_v56, 16  ;;  %v8046_v31 = vld [vmem:[#allocation2 + $0xb0] sm:$0x1]  ;;  %v8054_v33 = vpop.permute.xlu0 %3901 }
 0x20d   : > { %v5679_v51 = vcombine.low %v2163_v37, %v2173_v63  ;;  %v2991_v12 = vrot.slane %v2989_v17, 4  ;;  %v2298_v21 = vshll.u32 %v7642_v56, 16  ;;  %v3266_v2 = vsel %vm6777_vm8, %v3264_v36, %v3265_v50  ;;  %v8052_v61 = vld [vmem:[#allocation2 + $0x84] sm:$0xf]  ;;  %9341 = vst [vmem:[#allocation14_spill] sm:$0xff] %v8054_v33 }
 0x20e   : > { %v8040_v60 = vrot.slane %v9340_v59, 4  ;;  %v5753_v37 = vcombine.low %v3263_v26, %v3266_v2  ;;  %v2997_v6 = vrot.slane %v2995_v23, 5  ;;  %v2349_v56 = vor.u32 %v2348_v45, %v8014_v20  ;;  %v8061_v28 = vld [vmem:[#allocation2 + $0xac] sm:$0xf]  ;;  %v2521_v24 = vld [vmem:[#allocation2 + $0x90] sm:$0xe]  ;;  %v8075_v26 = vpop.permute.xlu1 %3425 }
 0x20f   : > { %v8050_v9 = vsel %vm3967_vm15, %v5679_v51, %v7832_v4  ;;  %v2992_v5 = vor.u32 %v2991_v12, %v2987_v11  ;;  %v2988_v14 = vsel %vm6787_vm11, %v2983_v13, %v2987_v11  ;;  %v5672_v52 = vcombine.low %v8052_v61, %v7924_v16  ;;  %v8073_v63 = vld [vmem:[#allocation2 + $0x98] sm:$0x1]  ;;  %9342 = vst [vmem:[#allocation8_spill] sm:$0xff] %v8075_v26  ;;  %v8081_v11 = vld [vmem:[#allocation2 + $0x94] sm:$0xf] }
 0x210   : > { %v5610_v38 = vrot.slane %v3131_v62, 9  ;;  %6257 = vmatmul.mubr.msk.bf16.gmra.mrb[36].mxu0 %vm3967_vm15, %v5753_v37  ;;  %v3269_v0 = vrot.slane %v8061_v28, 5  ;;  %v3272_v50 = vrot.slane %v8046_v31, 5  ;;  %v2352_v42 = vshll.u32 %v7901_v8, 16  ;;  %v1486_v12 = vld [vmem:[#allocation2 + $0x84] sm:$0xf] }
 0x211   : > { %v2993_v4 = vrot.slane %v2992_v5, 4  ;;  %v8067_v20 = vrot.slane %v2298_v21, 5  ;;  %3603 = vrot.lane.b32.xlu1 %v5672_v52, %s6586_s27  ;;  %v2356_v16 = vshrl.u32 %v7901_v8, 16  ;;  %v2350_v62 = vrot.slane %v2349_v56, 4  ;;  %v1487_v8 = vld [vmem:[#allocation2 + $0x88] sm:$0xf] }
 0x212   : > { %v3270_v23 = vsel %vm6777_vm8, %v5610_v38, %v3269_v0  ;;  %v3271_v51 = vrot.slane %v3269_v0, 4  ;;  %v2354_v13 = vrot.slane %v2352_v42, 5  ;;  %v5593_v2 = vrot.slane %v2521_v24, 9  ;;  %v8091_v0 = vpop.permute.xlu0 %3717  ;;  %v2709_v45 = vld [vmem:[#allocation2 + $0x9c] sm:$0xf]  ;;  %v8098_v26 = vpop.permute.xlu1 %3495 }
 0x213   : > { %v2998_v36 = vsel %vm6787_vm11, %v2993_v4, %v2997_v6  ;;  %v2358_v21 = vrot.slane %v2356_v16, 4  ;;  %v9343_v5 = vshll.u32 %v7038_v54, 16  ;;  %v2653_v6 = vrot.slane %v8081_v11, 5  ;;  %v8089_v4 = vld [vmem:[#allocation2 + $0x8c] sm:$0x1]  ;;  %9344 = vst [vmem:[#allocation35_spill] sm:$0xff] %v8098_v26 }
 0x214   : > { %v5736_v59 = vcombine.low %v2988_v14, %v2998_v36  ;;  %v3273_v37 = vsel %vm6777_vm8, %v3271_v51, %v3272_v50  ;;  %v2656_v38 = vrot.slane %v8073_v63, 5  ;;  %v1780_v42 = vshrl.u32 %v1486_v12, 16 }
 0x215   : > { %v2364_v52 = vrot.slane %v9343_v5, 5  ;;  %v5754_v56 = vcombine.low %v3270_v23, %v3273_v37  ;;  %v2359_v14 = vor.u32 %v2358_v21, %v2354_v13  ;;  %v1783_v24 = vshll.u32 %v1486_v12, 16 }
 0x216   : > { %3907 = vrot.lane.b32.xlu0 %v5736_v59, %s6586_s27  ;;  %v2654_v50 = vsel %vm6777_vm8, %v5593_v2, %v2653_v6  ;;  %v2655_v16 = vrot.slane %v2653_v6, 4  ;;  %v1789_v54 = vshll.u32 %v1487_v8, 16  ;;  %v1793_v36 = vshrl.u32 %v1487_v8, 16  ;;  %v1910_v2 = vld [vmem:[#allocation2 + $0x84] sm:$0xe] }
 0x217   : > { %6260 = vmatprep.mubr.msk.bf16.mxu0 %vm3967_vm15, %v5754_v56  ;;  %v2360_v51 = vrot.slane %v2359_v14, 4  ;;  %v1782_v5 = vrot.slane %v1780_v42, 4  ;;  %v1785_v27 = vrot.slane %v1783_v24, 5  ;;  %v1799_v17 = vshll.u32 %v8089_v4, 16 }
 0x218   : > { %v2355_v23 = vsel %vm6787_vm11, %v2350_v62, %v2354_v13  ;;  %v2657_v12 = vsel %vm6777_vm8, %v2655_v16, %v2656_v38  ;;  %v1791_v59 = vrot.slane %v1789_v54, 5  ;;  %v1795_v21 = vrot.slane %v1793_v36, 4  ;;  %v8110_v13 = vpop.permute.xlu0 %3715 }
 0x219   : > { %v2365_v37 = vsel %vm6787_vm11, %v2360_v51, %v2364_v52  ;;  %v5705_v6 = vcombine.low %v2654_v50, %v2657_v12  ;;  %v1786_v56 = vor.u32 %v1785_v27, %v1782_v5  ;;  %v1801_v14 = vrot.slane %v1799_v17, 5  ;;  %v9348_v17 = vld [vmem:[#allocation17_spill] sm:$0xff]  ;;  %v8122_v12 = vpop.permute.xlu1 %3493 }
 0x21a   : > { %v8106_v42 = vcombine.low %v2355_v23, %v2365_v37  ;;  %v1796_v24 = vor.u32 %v1795_v21, %v1791_v59  ;;  %v9346_v39 = vshll.u32 %v7025_v34, 16  ;;  %v3000_v26 = vshrl.u32 %v2709_v45, 16  ;;  %9349 = vst [vmem:[#allocation17_spill] sm:$0xff] %v8122_v12 }
 0x21b   : > { %3733 = vrot.lane.b32.xlu0 %v5705_v6, %s6585_s26  ;;  %v1787_v62 = vrot.slane %v1786_v56, 4  ;;  %v9347_v38 = vshll.u32 %v7084_v29, 16  ;;  %v3003_v54 = vshll.u32 %v2709_v45, 16  ;;  %v5577_v52 = vrot.slane %v1910_v2, 9  ;;  %v9352_v56 = vld [vmem:[#allocation22_spill] sm:$0xff] }
 0x21c   : > { %9345 = vst [vmem:[#allocation36_spill] sm:$0xff] %v8106_v42  ;;  %v2138_v33 = vrot.slane %v9346_v39, 5  ;;  %v1797_v50 = vrot.slane %v1796_v24, 4  ;;  %v5721_v34 = vcombine.low %v2709_v45, %v8000_v41  ;;  %v3002_v51 = vrot.slane %v3000_v26, 4 }
 0x21d   : > { %v2148_v16 = vrot.slane %v9347_v38, 5  ;;  %v1792_v39 = vsel %vm6787_vm11, %v1787_v62, %v1791_v59  ;;  %v3005_v5 = vrot.slane %v3003_v54, 5  ;;  %v2045_v23 = vrot.slane %v1487_v8, 5  ;;  %v8142_v62 = vpop.permute.xlu0 %3815 }
 0x21e   : > { %v2139_v27 = vsel %vm6787_vm11, %v7254_v1, %v2138_v33  ;;  %v2143_v36 = vor.u32 %v9348_v17, %v2138_v33  ;;  %v1802_v29 = vsel %vm6787_vm11, %v1797_v50, %v1801_v14  ;;  %v2048_v2 = vrot.slane %v8089_v4, 5  ;;  %9354 = vst [vmem:[#allocation22_spill] sm:$0xff] %v8142_v62  ;;  %v6470_v17 = vld [vmem:[#allocation2] sm:$0xf] }
 0x21f   : > { %v9350_v1 = vshll.u32 %v7046_v58, 16  ;;  %v9351_v33 = vshrl.u32 %v7702_v40, 16  ;;  %v5641_v6 = vcombine.low %v1792_v39, %v1802_v29  ;;  %3829 = vrot.lane.b32.xlu0 %v5721_v34, %s6584_s25  ;;  %v2046_v26 = vsel %vm6777_vm8, %v5577_v52, %v2045_v23  ;;  %v9353_v58 = vld [vmem:[#allocation21_spill] sm:$0xff]  ;;  %v9355_v39 = vld [vmem:[#allocation10_spill] sm:$0xff] }
 0x220   : > { %v2144_v21 = vrot.slane %v2143_v36, 4  ;;  %v2047_v8 = vrot.slane %v2045_v23, 4  ;;  %v3006_v24 = vor.u32 %v3005_v5, %v3002_v51  ;;  %v3009_v52 = vshll.u32 %v8000_v41, 16 }
 0x221   : > { %v2330_v37 = vrot.slane %v9350_v1, 5  ;;  %v8131_v45 = vrot.slane %v9351_v33, 4  ;;  %3429 = vrot.lane.b32.xlu1 %v5641_v6, %s6585_s26  ;;  %v3013_v50 = vshrl.u32 %v8000_v41, 16  ;;  %v9356_v23 = vshll.u32 %v9355_v39, 16  ;;  %v8154_v33 = vpop.permute.xlu1 %3593 }
 0x222   : > { %v2149_v59 = vsel %vm6787_vm11, %v2144_v21, %v2148_v16  ;;  %v2049_v54 = vsel %vm6777_vm8, %v2047_v8, %v2048_v2  ;;  %v6469_v16 = vld [vmem:[#allocation2 + $0x4] sm:$0xf]  ;;  %v3019_v51 = vshll.u32 %v8010_v43, 16  ;;  %v3007_v21 = vrot.slane %v3006_v24, 4  ;;  %v2522_v2 = vld [vmem:[#allocation2 + $0x9c] sm:$0xe] }
 0x223   : > { %v2331_v4 = vsel %vm6787_vm11, %v9352_v56, %v2330_v37  ;;  %v2335_v14 = vor.u32 %v9353_v58, %v2330_v37  ;;  %v5678_v38 = vcombine.low %v2139_v27, %v2149_v59  ;;  %v5614_v36 = vcombine.low %v6470_v17, %v6469_v16  ;;  %v8152_v37 = vld [vmem:[#allocation2 + $0x90] sm:$0xf]  ;;  %9357 = vst [vmem:[#allocation21_spill] sm:$0xff] %v8154_v33  ;;  %v8164_v43 = vld [vmem:[#allocation2 + $0xa4] sm:$0x1] }
 0x224   : > { %v2340_v29 = vrot.slane %v9356_v23, 5  ;;  %v5657_v5 = vcombine.low %v2046_v26, %v2049_v54  ;;  %v3011_v1 = vrot.slane %v3009_v52, 5  ;;  %v3015_v27 = vrot.slane %v3013_v50, 4  ;;  %v1488_v26 = vld [vmem:[#allocation2 + $0x90] sm:$0xf] }
 0x225   : > { %v2336_v34 = vrot.slane %v2335_v14, 4  ;;  %v9358_v6 = vshll.u32 %v7702_v40, 16  ;;  %v8166_v56 = vpop.f32.mrb[16].mxu0  ;;  %v8168_v58 = vld [vmem:[#allocation2 + $0x58] sm:$0xf]  ;;  %v3021_v40 = vrot.slane %v3019_v51, 5 }
 0x226   : > { %9359 = vst [vmem:[#allocation10_spill] sm:$0xff] %v8166_v56  ;;  %9360 = vst [vmem:[#allocation37_spill] sm:$0xff] %v8168_v58  ;;  %3509 = vrot.lane.b32.xlu1 %v5657_v5, %s6584_s25  ;;  %v3016_v54 = vor.u32 %v3015_v27, %v3011_v1  ;;  %v8174_v52 = vld [vmem:[#allocation2 + $0xa0] sm:$0xf]  ;;  %v8176_v50 = vpop.f32.mrb[17].mxu0  ;;  %v9364_v16 = vld [vmem:[#allocation9_spill] sm:$0xff]  ;;  %v3012_v51 = vsel %vm6787_vm11, %v3007_v21, %v3011_v1  ;;  %v8197_v56 = vpop.permute.xlu1 %3415 }
 0x227   : > { %v8160_v8 = vrot.slane %v9358_v6, 5  ;;  %v2341_v59 = vsel %vm6787_vm11, %v2336_v34, %v2340_v29  ;;  %9362 = vst [vmem:[#allocation39_spill] sm:$0xff] %v8174_v52  ;;  %9363 = vst [vmem:[#allocation40_spill] sm:$0xff] %v8176_v50  ;;  %v3970_v17 = vsel %vm3967_vm15, %v5614_v36, %v9364_v16  ;;  %v5673_v34 = vcombine.low %v8152_v37, %v8081_v11  ;;  %v1489_v29 = vld [vmem:[#allocation2 + $0x94] sm:$0xf]  ;;  %v8183_v6 = vpop.permute.xlu0 %3891 }
 0x228   : > { %v8172_v24 = vcombine.low %v2331_v4, %v2341_v59  ;;  %v5594_v39 = vrot.slane %v2522_v2, 9  ;;  %v2660_v23 = vrot.slane %v8174_v52, 5  ;;  %v8185_v4 = vpop.f32.mrb[18].mxu0  ;;  %v3017_v5 = vrot.slane %v3016_v54, 4  ;;  %v1508_v2 = vld [vmem:[#allocation2 + $0x98] sm:$0x1] }
 0x229   : > { %9365 = vst [vmem:[#allocation9_spill] sm:$0xff] %v8185_v4  ;;  %v2663_v27 = vrot.slane %v8164_v43, 5  ;;  %v1804_v59 = vshrl.u32 %v1488_v26, 16  ;;  %v8190_v14 = vpop.f32.mrb[19].mxu0  ;;  %v4100_v11 = vsel %vm3967_vm15, %v5678_v38, %v7889_v55  ;;  %v1807_v16 = vshll.u32 %v1488_v26, 16  ;;  %9367 = vst [vmem:[#allocation42_spill] sm:$0xff] %v8197_v56 }
 0x22a   : > { %9361 = vst [vmem:[#allocation38_spill] sm:$0xff] %v8172_v24  ;;  %9366 = vst [vmem:[#allocation41_spill] sm:$0xff] %v8190_v14  ;;  %v2662_v36 = vrot.slane %v2660_v23, 4  ;;  %v3022_v41 = vsel %vm6787_vm11, %v3017_v5, %v3021_v40  ;;  %3605 = vrot.lane.b32.xlu1 %v5673_v34, %s6586_s27  ;;  %v1813_v21 = vshll.u32 %v1489_v29, 16  ;;  %v1817_v1 = vshrl.u32 %v1489_v29, 16 }
 0x22b   : > { %v1806_v4 = vrot.slane %v1804_v59, 4  ;;  %v2711_v54 = vld [vmem:[#allocation2 + $0xa8] sm:$0xf]  ;;  %v5737_v14 = vcombine.low %v3012_v51, %v3022_v41  ;;  %v2661_v50 = vsel %vm6777_vm8, %v5594_v39, %v2660_v23  ;;  %v1809_v55 = vrot.slane %v1807_v16, 5  ;;  %v1911_v51 = vld [vmem:[#allocation2 + $0x90] sm:$0xe]  ;;  %v8208_v24 = vpop.permute.xlu0 %3813 }
 0x22c   : > { %v2664_v38 = vsel %vm6777_vm8, %v2662_v36, %v2663_v27  ;;  %v1815_v26 = vrot.slane %v1813_v21, 5  ;;  %v1819_v42 = vrot.slane %v1817_v1, 4  ;;  %v1823_v40 = vshll.u32 %v1508_v2, 16 }
 0x22d   : > { %v4018_v34 = vsel %vm4016_vm0, %v3970_v17, %v7765_v22  ;;  %3909 = vrot.lane.b32.xlu0 %v5737_v14, %s6586_s27  ;;  %v1810_v5 = vor.u32 %v1809_v55, %v1806_v4  ;;  %v4147_v59 = vsel %vm4016_vm0, %v4100_v11, %v7797_v15  ;;  %v3024_v41 = vshrl.u32 %v2711_v54, 16 }
 0x22e   : > { %v1820_v39 = vor.u32 %v1819_v42, %v1815_v26  ;;  %v1825_v23 = vrot.slane %v1823_v40, 5  ;;  %v4179_v27 = vsel %vm4049_vm1, %v4147_v59, %v7971_v30  ;;  %v3027_v36 = vshll.u32 %v2711_v54, 16  ;;  %v8216_v42 = vpop.permute.xlu1 %3591 }
 0x22f   : > { %v4051_v16 = vsel %vm4049_vm1, %v4018_v34, %v7844_v47  ;;  %v5706_v22 = vcombine.low %v2661_v50, %v2664_v38  ;;  %v1811_v17 = vrot.slane %v1810_v5, 4  ;;  %4450 = vmatprep.mubr.bf16.mxu1 %v4179_v27  ;;  %v3026_v14 = vrot.slane %v3024_v41, 4  ;;  %v8214_v4 = vpop.f32.mrb[20].mxu0  ;;  %9369 = vst [vmem:[#allocation44_spill] sm:$0xff] %v8216_v42  ;;  %v8235_v27 = vpop.permute.xlu0 %3889 }
 0x230   : > { %9368 = vst [vmem:[#allocation43_spill] sm:$0xff] %v8214_v4  ;;  %v1821_v15 = vrot.slane %v1820_v39, 4  ;;  %v3029_v11 = vrot.slane %v3027_v36, 5  ;;  %v5578_v21 = vrot.slane %v1911_v51, 9  ;;  %v2052_v1 = vrot.slane %v1489_v29, 5  ;;  %4451 = vmatmul.mubr.bf16.vlgmr.msra.gmra.mrb[16].mxu1 %v4051_v16  ;;  %v8218_v55 = vpop.f32.mrb[21].mxu0 }
 0x231   : > { %9370 = vst [vmem:[#allocation45_spill] sm:$0xff] %v8218_v55  ;;  %3735 = vrot.lane.b32.xlu0 %v5706_v22, %s6585_s26  ;;  %v1816_v47 = vsel %vm6787_vm11, %v1811_v17, %v1815_v26  ;;  %v5722_v30 = vcombine.low %v2711_v54, %v8061_v28  ;;  %v2055_v50 = vrot.slane %v1508_v2, 5  ;;  %v3033_v38 = vshll.u32 %v8061_v28, 16  ;;  %v8225_v40 = vpop.f32.mrb[22].mxu0  ;;  %v3132_v54 = vld [vmem:[#allocation2 + $0xb4] sm:$0xe] }
 0x232   : > { %9371 = vst [vmem:[#allocation46_spill] sm:$0xff] %v8225_v40  ;;  %v1826_v29 = vsel %vm6787_vm11, %v1821_v15, %v1825_v23  ;;  %v2053_v34 = vsel %vm6777_vm8, %v5578_v21, %v2052_v1  ;;  %v2054_v5 = vrot.slane %v2052_v1, 4  ;;  %v3030_v59 = vor.u32 %v3029_v11, %v3026_v14  ;;  %v8231_v41 = vpop.f32.mrb[23].mxu0  ;;  %v8237_v36 = vld [vmem:[#allocation2 + $0x64] sm:$0xf] }
 0x233   : > { %9372 = vst [vmem:[#allocation47_spill] sm:$0xff] %v8231_v41  ;;  %v5642_v51 = vcombine.low %v1816_v47, %v1826_v29  ;;  %v3035_v39 = vrot.slane %v3033_v38, 5  ;;  %v3037_v26 = vshrl.u32 %v8061_v28, 16  ;;  %v3043_v2 = vshll.u32 %v8046_v31, 16  ;;  %9373 = vst [vmem:[#allocation48_spill] sm:$0xff] %v8237_v36  ;;  %v8284_v40 = vpop.permute.xlu0 %3721 }
 0x234   : > { %v2056_v16 = vsel %vm6777_vm8, %v2054_v5, %v2055_v50  ;;  %v3031_v22 = vrot.slane %v3030_v59, 4  ;;  %v8242_v17 = vld [vmem:[#allocation2 + $0xb8] sm:$0xf]  ;;  %v8244_v14 = vld [vmem:[#allocation2 + $0xbc] sm:$0x1]  ;;  %v9374_v28 = vor.u32 %v8067_v20, %v8040_v60  ;;  %v9376_v31 = vshrl.u32 %v7651_v32, 16  ;;  %v8264_v5 = vpop.permute.xlu1 %3413 }
 0x235   : > { %3431 = vrot.lane.b32.xlu1 %v5642_v51, %s6585_s26  ;;  %3831 = vrot.lane.b32.xlu0 %v5722_v30, %s6584_s25  ;;  %v3039_v1 = vrot.slane %v3037_v26, 4  ;;  %v2523_v47 = vld [vmem:[#allocation2 + $0xa8] sm:$0xe]  ;;  %v2277_v50 = vor.u32 %v8160_v8, %v8131_v45  ;;  %v9378_v38 = vshrl.u32 %v8168_v58, 16  ;;  %v5658_v20 = vcombine.low %v2053_v34, %v2056_v16  ;;  %v1490_v32 = vld [vmem:[#allocation2 + $0x9c] sm:$0xf] }
 0x236   : > { %v8249_v15 = vrot.slane %v9374_v28, 4  ;;  %v8253_v11 = vrot.slane %v9376_v31, 4  ;;  %v3045_v29 = vrot.slane %v3043_v2, 5  ;;  %v8266_v28 = vld [vmem:[#allocation2 + $0x9c] sm:$0xf]  ;;  %v5611_v51 = vrot.slane %v3132_v54, 9 }
 0x237   : > { %v8262_v60 = vrot.slane %v9378_v38, 4  ;;  %v3040_v59 = vor.u32 %v3039_v1, %v3035_v39  ;;  %v3276_v30 = vrot.slane %v8242_v17, 5  ;;  %v3279_v26 = vrot.slane %v8244_v14, 5  ;;  %v8270_v31 = vld [vmem:[#allocation2 + $0xb0] sm:$0x1]  ;;  %9381 = vst [vmem:[#allocation53_spill] sm:$0xff] %v8284_v40 }
 0x238   : > { %9375 = vst [vmem:[#allocation49_spill] sm:$0xff] %v8249_v15  ;;  %9377 = vst [vmem:[#allocation50_spill] sm:$0xff] %v8253_v11  ;;  %v2367_v45 = vshrl.u32 %v8052_v61, 16  ;;  %v2370_v8 = vshll.u32 %v8052_v61, 16  ;;  %v3036_v34 = vsel %vm6787_vm11, %v3031_v22, %v3035_v39  ;;  %v8276_v2 = vld [vmem:[#allocation2 + $0xac] sm:$0xf]  ;;  %v5674_v61 = vcombine.low %v8266_v28, %v8174_v52  ;;  %v8299_v56 = vpop.permute.xlu1 %3499 }
 0x239   : > { %9379 = vst [vmem:[#allocation51_spill] sm:$0xff] %v8262_v60  ;;  %9380 = vst [vmem:[#allocation52_spill] sm:$0xff] %v8276_v2  ;;  %v5595_v16 = vrot.slane %v2523_v47, 9  ;;  %3511 = vrot.lane.b32.xlu1 %v5658_v20, %s6584_s25  ;;  %v3041_v1 = vrot.slane %v3040_v59, 4  ;;  %v3277_v54 = vsel %vm6777_vm8, %v5611_v51, %v3276_v30  ;;  %v3278_v38 = vrot.slane %v3276_v30, 4 }
 0x23a   : > { %v2667_v21 = vrot.slane %v8276_v2, 5  ;;  %v8282_v23 = vld [vmem:[#allocation2 + $0xa0] sm:$0xf]  ;;  %v2670_v39 = vrot.slane %v8270_v31, 5  ;;  %v8289_v22 = vld [vmem:[#allocation2 + $0xa4] sm:$0x1] }
 0x23b   : > { %v1828_v47 = vshrl.u32 %v1490_v32, 16  ;;  %v1831_v20 = vshll.u32 %v1490_v32, 16  ;;  %v3046_v59 = vsel %vm6787_vm11, %v3041_v1, %v3045_v29  ;;  %v3280_v51 = vsel %vm6777_vm8, %v3278_v38, %v3279_v26  ;;  %v3133_v41 = vld [vmem:[#allocation2 + $0xc0] sm:$0xe]  ;;  %v8297_v40 = vld [vmem:[#allocation2 + $0xc8] sm:$0x1] }
 0x23c   : > { %v2668_v30 = vsel %vm6777_vm8, %v5595_v16, %v2667_v21  ;;  %v2669_v4 = vrot.slane %v2667_v21, 4  ;;  %v5738_v55 = vcombine.low %v3036_v34, %v3046_v59  ;;  %v5755_v33 = vcombine.low %v3277_v54, %v3280_v51  ;;  %9382 = vst [vmem:[#allocation54_spill] sm:$0xff] %v8299_v56  ;;  %v8307_v16 = vld [vmem:[#allocation2 + $0xc4] sm:$0xf]  ;;  %v1912_v34 = vld [vmem:[#allocation2 + $0x9c] sm:$0xe] }
 0x23d   : > { %v1830_v52 = vrot.slane %v1828_v47, 4  ;;  %v1833_v42 = vrot.slane %v1831_v20, 5  ;;  %3607 = vrot.lane.b32.xlu1 %v5674_v61, %s6586_s27  ;;  %v1837_v32 = vshll.u32 %v8282_v23, 16  ;;  %v1841_v26 = vshrl.u32 %v8282_v23, 16 }
 0x23e   : > { %v2671_v29 = vsel %vm6777_vm8, %v2669_v4, %v2670_v39  ;;  %v1847_v21 = vshll.u32 %v8289_v22, 16  ;;  %v8309_v1 = vpop.f32.mrb[24].mxu0  ;;  %v8311_v54 = vrot.slane %v2277_v50, 4  ;;  %3911 = vrot.lane.b32.xlu0 %v5738_v55, %s6586_s27  ;;  %6261 = vmatmul.mubr.msk.bf16.gmra.mrb[40].mxu0 %vm3967_vm15, %v5755_v33  ;;  %v5612_v61 = vrot.slane %v3133_v41, 9  ;;  %v8316_v39 = vld [vmem:[#allocation2 + $0xb4] sm:$0xf]  ;;  %v8323_v50 = vpop.permute.xlu0 %3719 }
 0x23f   : > { %9383 = vst [vmem:[#allocation55_spill] sm:$0xff] %v8309_v1  ;;  %v1834_v38 = vor.u32 %v1833_v42, %v1830_v52  ;;  %v3283_v4 = vrot.slane %v8307_v16, 5  ;;  %v8318_v47 = vpop.f32.mrb[25].mxu0  ;;  %v8320_v20 = vrot.slane %v2367_v45, 4  ;;  %v1839_v59 = vrot.slane %v1837_v32, 5  ;;  %9386 = vst [vmem:[#allocation58_spill] sm:$0xff] %v8323_v50 }
 0x240   : > { %9384 = vst [vmem:[#allocation56_spill] sm:$0xff] %v8311_v54  ;;  %9385 = vst [vmem:[#allocation57_spill] sm:$0xff] %v8318_v47  ;;  %v1843_v51 = vrot.slane %v1841_v26, 4  ;;  %v3286_v1 = vrot.slane %v8297_v40, 5  ;;  %v8325_v56 = vpop.f32.mrb[26].mxu0  ;;  %v5707_v55 = vcombine.low %v2668_v30, %v2671_v29  ;;  %v8331_v62 = vrot.slane %v2370_v8, 5 }
 0x241   : > { %9387 = vst [vmem:[#allocation59_spill] sm:$0xff] %v8325_v56  ;;  %v1835_v33 = vrot.slane %v1834_v38, 4  ;;  %v3284_v52 = vsel %vm6777_vm8, %v5612_v61, %v3283_v4  ;;  %v3285_v42 = vrot.slane %v3283_v4, 4  ;;  %v8329_v41 = vpop.f32.mrb[27].mxu0  ;;  %v2391_v45 = vshrl.u32 %v8152_v37, 16  ;;  %v8339_v4 = vpop.permute.xlu1 %3497 }
 0x242   : > { %9388 = vst [vmem:[#allocation60_spill] sm:$0xff] %v8329_v41  ;;  %v1844_v32 = vor.u32 %v1843_v51, %v1839_v59  ;;  %v1849_v26 = vrot.slane %v1847_v21, 5  ;;  %v2394_v47 = vshll.u32 %v8152_v37, 16  ;;  %3737 = vrot.lane.b32.xlu0 %v5707_v55, %s6585_s26  ;;  %v3048_v29 = vshrl.u32 %v8316_v39, 16  ;;  %v2524_v61 = vld [vmem:[#allocation2 + $0xb4] sm:$0xe]  ;;  %v8360_v60 = vpop.permute.xlu0 %3819 }
 0x243   : > { %v3287_v30 = vsel %vm6777_vm8, %v3285_v42, %v3286_v1  ;;  %v5579_v38 = vrot.slane %v1912_v34, 9  ;;  %9389 = vst [vmem:[#allocation61_spill] sm:$0xff] %v8339_v4  ;;  %v1840_v8 = vsel %vm6787_vm11, %v1835_v33, %v1839_v59  ;;  %v3051_v21 = vshll.u32 %v8316_v39, 16  ;;  %v8344_v51 = vld [vmem:[#allocation2 + $0xb8] sm:$0xf]  ;;  %v9390_v34 = vld [vmem:[#allocation15_spill] sm:$0xff] }
 0x244   : > { %v1845_v56 = vrot.slane %v1844_v32, 4  ;;  %v5756_v41 = vcombine.low %v3284_v52, %v3287_v30  ;;  %v5723_v37 = vcombine.low %v8316_v39, %v8242_v17  ;;  %v2059_v1 = vrot.slane %v8282_v23, 5  ;;  %v8352_v4 = vld [vmem:[#allocation2 + $0xbc] sm:$0x1]  ;;  %v9393_v33 = vld [vmem:[#allocation19_spill] sm:$0xff] }
 0x245   : > { %v2062_v55 = vrot.slane %v8289_v22, 5  ;;  %v9391_v42 = vshll.u32 %v9390_v34, 16  ;;  %9392 = vst [vmem:[#allocation15_spill] sm:$0xff] %v8352_v4  ;;  %v9394_v52 = vshll.u32 %v9393_v33, 16  ;;  %v5596_v30 = vrot.slane %v2524_v61, 9  ;;  %9395 = vst [vmem:[#allocation19_spill] sm:$0xff] %v8360_v60 }
 0x246   : > { %v1850_v59 = vsel %vm6787_vm11, %v1845_v56, %v1849_v26  ;;  %6264 = vmatprep.mubr.msk.bf16.mxu0 %vm3967_vm15, %v5756_v41  ;;  %v2674_v39 = vrot.slane %v8344_v51, 5  ;;  %3833 = vrot.lane.b32.xlu0 %v5723_v37, %s6584_s25  ;;  %v2060_v22 = vsel %vm6777_vm8, %v5579_v38, %v2059_v1  ;;  %v2061_v34 = vrot.slane %v2059_v1, 4  ;;  %v9397_v41 = vld [vmem:[#allocation24_spill] sm:$0xff]  ;;  %v8375_v37 = vld [vmem:[#allocation2 + $0x5c] sm:$0x1] }
 0x247   : > { %v2210_v50 = vrot.slane %v9391_v42, 5  ;;  %v2220_v32 = vrot.slane %v9394_v52, 5  ;;  %v5643_v23 = vcombine.low %v1840_v8, %v1850_v59  ;;  %v9396_v42 = vld [vmem:[#allocation25_spill] sm:$0xff]  ;;  %v2677_v52 = vrot.slane %v8352_v4, 5  ;;  %v8372_v60 = vld [vmem:[#allocation2 + $0x68] sm:$0x1] }
 0x248   : > { %v2675_v61 = vsel %vm6777_vm8, %v5596_v30, %v2674_v39  ;;  %v2676_v33 = vrot.slane %v2674_v39, 4  ;;  %9398 = vst [vmem:[#allocation25_spill] sm:$0xff] %v8372_v60  ;;  %9399 = vst [vmem:[#allocation24_spill] sm:$0xff] %v8375_v37  ;;  %v2715_v59 = vld [vmem:[#allocation2 + $0xc0] sm:$0xf]  ;;  %v8382_v30 = vpop.permute.xlu1 %3597  ;;  %v8392_v1 = vrot.slane %v2394_v47, 5 }
 0x249   : > { %v2211_v56 = vsel %vm6787_vm11, %v9396_v42, %v2210_v50  ;;  %v2215_v26 = vor.u32 %v9397_v41, %v2210_v50  ;;  %3433 = vrot.lane.b32.xlu1 %v5643_v23, %s6585_s26  ;;  %v2063_v50 = vsel %vm6777_vm8, %v2061_v34, %v2062_v55  ;;  %9400 = vst [vmem:[#allocation62_spill] sm:$0xff] %v8382_v30  ;;  %v8386_v42 = vrot.slane %v2391_v45, 4  ;;  %v8390_v38 = vld [vmem:[#allocation2 + $0xa8] sm:$0xf]  ;;  %v9402_v55 = vld [vmem:[#allocation18_spill] sm:$0xff] }
 0x24a   : > { %v2678_v8 = vsel %vm6777_vm8, %v2676_v33, %v2677_v52  ;;  %9401 = vst [vmem:[#allocation63_spill] sm:$0xff] %v8390_v38  ;;  %v5659_v23 = vcombine.low %v2060_v22, %v2063_v50  ;;  %v8394_v4 = vld [vmem:[#allocation2 + $0xa8] sm:$0xf]  ;;  %v9403_v34 = vshll.u32 %v9402_v55, 16  ;;  %v3050_v54 = vrot.slane %v3048_v29, 4  ;;  %v8402_v33 = vpop.permute.xlu0 %3895  ;;  %v8404_v52 = vpop.f32.mrb[28].mxu0 }
 0x24b   : > { %v2216_v41 = vrot.slane %v2215_v26, 4  ;;  %v5708_v25 = vcombine.low %v2675_v61, %v2678_v8  ;;  %v3053_v37 = vrot.slane %v3051_v21, 5  ;;  %v3072_v26 = vshrl.u32 %v2715_v59, 16  ;;  %v8400_v39 = vld [vmem:[#allocation2 + $0xac] sm:$0xf]  ;;  %9404 = vst [vmem:[#allocation18_spill] sm:$0xff] %v8402_v33 }
 0x24c   : > { %v2186_v30 = vrot.slane %v9403_v34, 5  ;;  %9405 = vst [vmem:[#allocation64_spill] sm:$0xff] %v8404_v52  ;;  %v5675_v29 = vcombine.low %v8394_v4, %v8276_v2  ;;  %v9406_v21 = vld [vmem:[#allocation27_spill] sm:$0xff]  ;;  %v8415_v22 = vld [vmem:[#allocation2 + $0xb0] sm:$0x1]  ;;  %v1852_v61 = vshrl.u32 %v8390_v38, 16  ;;  %v5724_v2 = vcombine.low %v2715_v59, %v8307_v16  ;;  %v8428_v58 = vpop.permute.xlu1 %3419 }
 0x24d   : > { %v2221_v45 = vsel %vm6787_vm11, %v2216_v41, %v2220_v32  ;;  %3513 = vrot.lane.b32.xlu1 %v5659_v23, %s6584_s25  ;;  %3739 = vrot.lane.b32.xlu0 %v5708_v25, %s6585_s26  ;;  %v8418_v8 = vpop.f32.mrb[29].mxu0  ;;  %v9408_v50 = vld [vmem:[#allocation20_spill] sm:$0xff]  ;;  %v3075_v34 = vshll.u32 %v2715_v59, 16  ;;  %v1855_v25 = vshll.u32 %v8390_v38, 16  ;;  %v3074_v52 = vrot.slane %v3072_v26, 4 }
 0x24e   : > { %v8407_v47 = vcombine.low %v2211_v56, %v2221_v45  ;;  %v2187_v32 = vsel %vm6787_vm11, %v9406_v21, %v2186_v30  ;;  %9407 = vst [vmem:[#allocation27_spill] sm:$0xff] %v8418_v8  ;;  %v9409_v41 = vshll.u32 %v9408_v50, 16  ;;  %v9410_v56 = vld [vmem:[#allocation6_spill] sm:$0xff]  ;;  %v8424_v45 = vpop.f32.mrb[30].mxu0  ;;  %v1854_v21 = vrot.slane %v1852_v61, 4 }
 0x24f   : > { %v2191_v55 = vor.u32 %v9410_v56, %v2186_v30  ;;  %9411 = vst [vmem:[#allocation20_spill] sm:$0xff] %v8424_v45  ;;  %v1861_v33 = vshll.u32 %v8400_v39, 16  ;;  %9412 = vst [vmem:[#allocation6_spill] sm:$0xff] %v8428_v58  ;;  %v8430_v11 = vpop.f32.mrb[31].mxu0  ;;  %v1857_v50 = vrot.slane %v1855_v25, 5  ;;  %v1871_v30 = vshll.u32 %v8415_v22, 16  ;;  %v8440_v58 = vpop.permute.xlu0 %3817 }
 0x250   : > { %v2196_v23 = vrot.slane %v9409_v41, 5  ;;  %9413 = vst [vmem:[#allocation65_spill] sm:$0xff] %v8430_v11  ;;  %v1865_v41 = vshrl.u32 %v8400_v39, 16  ;;  %v3054_v56 = vor.u32 %v3053_v37, %v3050_v54  ;;  %v3057_v59 = vshll.u32 %v8242_v17, 16  ;;  %v1913_v38 = vld [vmem:[#allocation2 + $0xa8] sm:$0xe] }
 0x251   : > { %v2192_v8 = vrot.slane %v2191_v55, 4  ;;  %3609 = vrot.lane.b32.xlu1 %v5675_v29, %s6586_s27  ;;  %3835 = vrot.lane.b32.xlu0 %v5724_v2, %s6584_s25  ;;  %v1863_v26 = vrot.slane %v1861_v33, 5  ;;  %v3061_v61 = vshrl.u32 %v8242_v17, 16  ;;  %v3077_v11 = vrot.slane %v3075_v34, 5  ;;  %v8447_v34 = vpop.permute.xlu1 %3595 }
 0x252   : > { %v1858_v55 = vor.u32 %v1857_v50, %v1854_v21  ;;  %v1867_v25 = vrot.slane %v1865_v41, 4  ;;  %v3055_v29 = vrot.slane %v3054_v56, 4  ;;  %v3059_v60 = vrot.slane %v3057_v59, 5 }
 0x253   : > { %v2197_v45 = vsel %vm6787_vm11, %v2192_v8, %v2196_v23  ;;  %v3063_v2 = vrot.slane %v3061_v61, 4  ;;  %v1873_v37 = vrot.slane %v1871_v30, 5  ;;  %v3067_v12 = vshll.u32 %v8244_v14, 16 }
 0x254   : > { %v8442_v15 = vcombine.low %v2187_v32, %v2197_v45  ;;  %v1859_v33 = vrot.slane %v1858_v55, 4  ;;  %v1868_v54 = vor.u32 %v1867_v25, %v1863_v26  ;;  %v2410_v17 = vshll.u32 %v8073_v63, 16  ;;  %v8460_v55 = vpop.permute.xlu0 %3893 }
 0x255   : > { %v3064_v36 = vor.u32 %v3063_v2, %v3059_v60  ;;  %v5580_v8 = vrot.slane %v1913_v38, 9  ;;  %v2066_v23 = vrot.slane %v8400_v39, 5  ;;  %v3069_v21 = vrot.slane %v3067_v12, 5  ;;  %v8473_v2 = vld [vmem:[#allocation2 + $0xc8] sm:$0x1] }
 0x256   : > { %v1864_v32 = vsel %vm6787_vm11, %v1859_v33, %v1863_v26  ;;  %v1869_v45 = vrot.slane %v1868_v54, 4  ;;  %v2069_v50 = vrot.slane %v8415_v22, 5  ;;  %v2397_v41 = vor.u32 %v8392_v1, %v8386_v42  ;;  %v6475_v1 = vld [vmem:[#allocation2 + $0x1c] sm:$0xf]  ;;  %v6476_v42 = vld [vmem:[#allocation2 + $0x18] sm:$0xf] }
 0x257   : > { %v3060_v14 = vsel %vm6787_vm11, %v3055_v29, %v3059_v60  ;;  %v3065_v30 = vrot.slane %v3064_v36, 4  ;;  %v2068_v56 = vrot.slane %v2066_v23, 4  ;;  %v3078_v59 = vor.u32 %v3077_v11, %v3074_v52 }
 0x258   : > { %v1874_v38 = vsel %vm6787_vm11, %v1869_v45, %v1873_v37  ;;  %v3081_v61 = vshll.u32 %v8307_v16, 16  ;;  %v3085_v26 = vshrl.u32 %v8307_v16, 16  ;;  %v9414_v12 = vor.u32 %v8331_v62, %v8320_v20  ;;  %v2525_v62 = vld [vmem:[#allocation2 + $0xc0] sm:$0xe]  ;;  %v8478_v45 = vpop.permute.xlu1 %3417 }
 0x259   : > { %v5616_v60 = vcombine.low %v6476_v42, %v6475_v1  ;;  %v5644_v36 = vcombine.low %v1864_v32, %v1874_v38  ;;  %v3070_v25 = vsel %vm6787_vm11, %v3065_v30, %v3069_v21  ;;  %v2067_v11 = vsel %vm6777_vm8, %v5580_v8, %v2066_v23  ;;  %v1914_v32 = vld [vmem:[#allocation2 + $0xb4] sm:$0xe]  ;;  %v8494_v38 = vld [vmem:[#allocation2 + $0xc4] sm:$0xf] }
 0x25a   : > { %v8465_v22 = vrot.slane %v9414_v12, 4  ;;  %v5739_v29 = vcombine.low %v3060_v14, %v3070_v25  ;;  %v2070_v16 = vsel %vm6777_vm8, %v2068_v56, %v2069_v50  ;;  %v3083_v52 = vrot.slane %v3081_v61, 5  ;;  %v8491_v14 = vld [vmem:[#allocation2 + $0xbc] sm:$0x1]  ;;  %v6477_v25 = vld [vmem:[#allocation2 + $0x10] sm:$0xf] }
 0x25b   : > { %v2434_v20 = vshll.u32 %v8164_v43, 16  ;;  %3435 = vrot.lane.b32.xlu1 %v5644_v36, %s6585_s26  ;;  %v3079_v33 = vrot.slane %v3078_v59, 4  ;;  %v3087_v54 = vrot.slane %v3085_v26, 4  ;;  %v3091_v37 = vshll.u32 %v8297_v40, 16  ;;  %v8498_v26 = vld [vmem:[#allocation2 + $0xb8] sm:$0xf] }
 0x25c   : > { %v8480_v21 = vrot.slane %v2397_v41, 4  ;;  %v8484_v8 = vsel %vm3967_vm15, %v5616_v60, %v7981_v49  ;;  %v4149_v23 = vsel %vm4016_vm0, %v8050_v9, %v7987_v35  ;;  %v2415_v50 = vshrl.u32 %v8266_v28, 16  ;;  %3913 = vrot.lane.b32.xlu0 %v5739_v29, %s6586_s27  ;;  %v8500_v9 = vpop.permute.xlu0 %3725  ;;  %v8507_v36 = vld [vmem:[#allocation2 + $0xcc] sm:$0xf] }
 0x25d   : > { %v2418_v40 = vshll.u32 %v8266_v28, 16  ;;  %v5660_v30 = vcombine.low %v2067_v11, %v2070_v16  ;;  %v3088_v56 = vor.u32 %v3087_v54, %v3083_v52  ;;  %v3093_v41 = vrot.slane %v3091_v37, 5  ;;  %v6478_v29 = vld [vmem:[#allocation2 + $0xc] sm:$0xf]  ;;  %v8509_v16 = vld [vmem:[#allocation2 + $0xb4] sm:$0xf] }
 0x25e   : > { %v5597_v59 = vrot.slane %v2525_v62, 9  ;;  %v2681_v49 = vrot.slane %v8494_v38, 5  ;;  %v2684_v61 = vrot.slane %v8473_v2, 5  ;;  %v5581_v35 = vrot.slane %v1914_v32, 9 }
 0x25f   : > { %3515 = vrot.lane.b32.xlu1 %v5660_v30, %s6584_s25  ;;  %v3084_v12 = vsel %vm6787_vm11, %v3079_v33, %v3083_v52  ;;  %v3089_v1 = vrot.slane %v3088_v56, 4  ;;  %v2073_v42 = vrot.slane %v8498_v26, 5  ;;  %v2076_v60 = vrot.slane %v8491_v14, 5  ;;  %v8521_v56 = vld [vmem:[#allocation2 + $0xd0] sm:$0xf] }
 0x260   : > { %v5615_v11 = vcombine.low %v6478_v29, %v6477_v25  ;;  %v2682_v62 = vsel %vm6777_vm8, %v5597_v59, %v2681_v49  ;;  %v2683_v54 = vrot.slane %v2681_v49, 4  ;;  %v4182_v37 = vsel %vm4049_vm1, %v4149_v23, %v8235_v27  ;;  %v8523_v25 = vpop.permute.xlu1 %3503 }
 0x261   : > { %v3094_v52 = vsel %vm6787_vm11, %v3089_v1, %v3093_v41  ;;  %v5676_v33 = vcombine.low %v8509_v16, %v8344_v51  ;;  %v2074_v32 = vsel %vm6777_vm8, %v5581_v35, %v2073_v42  ;;  %v2075_v30 = vrot.slane %v2073_v42, 4  ;;  %4458 = vmatprep.mubr.bf16.mxu1 %v4182_v37  ;;  %v8530_v41 = vld [vmem:[#allocation2 + $0xb4] sm:$0xf] }
 0x262   : > { %v3973_v59 = vsel %vm3967_vm15, %v5615_v11, %v8036_v48  ;;  %v5740_v49 = vcombine.low %v3084_v12, %v3094_v52  ;;  %v2685_v27 = vsel %vm6777_vm8, %v2683_v54, %v2684_v61  ;;  %v3096_v23 = vshrl.u32 %v8507_v36, 16  ;;  %v8543_v54 = vpop.permute.xlu0 %3723 }
 0x263   : > { %v4106_v35 = vsel %vm3967_vm15, %v8442_v15, %v8110_v13  ;;  %3611 = vrot.lane.b32.xlu1 %v5676_v33, %s6586_s27  ;;  %v5709_v1 = vcombine.low %v2682_v62, %v2685_v27  ;;  %v2077_v42 = vsel %vm6777_vm8, %v2075_v30, %v2076_v60  ;;  %v3099_v48 = vshll.u32 %v8507_v36, 16 }
 0x264   : > { %3915 = vrot.lane.b32.xlu0 %v5740_v49, %s6586_s27  ;;  %v5661_v12 = vcombine.low %v2074_v32, %v2077_v42  ;;  %v3098_v61 = vrot.slane %v3096_v23, 4  ;;  %v3109_v29 = vshrl.u32 %v8521_v56, 16  ;;  %v5725_v11 = vcombine.low %v8507_v36, %v8521_v56  ;;  %v8557_v23 = vpop.permute.xlu1 %3501 }
 0x265   : > { %v3101_v13 = vrot.slane %v3099_v48, 5  ;;  %v1876_v15 = vshrl.u32 %v8530_v41, 16  ;;  %v1879_v62 = vshll.u32 %v8530_v41, 16  ;;  %v1885_v60 = vshll.u32 %v8498_v26, 16  ;;  %v8564_v48 = vld [vmem:[#allocation2 + $0xd4] sm:$0x1] }
 0x266   : > { %v1889_v37 = vshrl.u32 %v8498_v26, 16  ;;  %v1895_v52 = vshll.u32 %v8491_v14, 16  ;;  %v4020_v33 = vsel %vm4016_vm0, %v3973_v59, %v7937_v19  ;;  %v4151_v32 = vsel %vm4016_vm0, %v4106_v35, %v7949_v7  ;;  %v9415_v59 = vld [vmem:[#allocation23_spill] sm:$0xff] }
 0x267   : > { %3517 = vrot.lane.b32.xlu1 %v5661_v12, %s6584_s25  ;;  %v1878_v36 = vrot.slane %v1876_v15, 4  ;;  %v1881_v30 = vrot.slane %v1879_v62, 5  ;;  %v1887_v49 = vrot.slane %v1885_v60, 5  ;;  %v4054_v27 = vsel %vm4049_vm1, %v4020_v33, %v7819_v53 }
 0x268   : > { %3741 = vrot.lane.b32.xlu0 %v5709_v1, %s6585_s26  ;;  %v1891_v42 = vrot.slane %v1889_v37, 4  ;;  %v1897_v14 = vrot.slane %v1895_v52, 5  ;;  %4459 = vmatmul.mubr.bf16.gmra.mrb[20].mxu1 %v4054_v27  ;;  %v4185_v19 = vsel %vm4049_vm1, %v4151_v32, %v8183_v6  ;;  %v9416_v7 = vshll.u32 %v9415_v59, 16  ;;  %v9418_v52 = vld [vmem:[#allocation16_spill] sm:$0xff]  ;;  %v8573_v32 = vpop.permute.xlu0 %3899 }
 0x269   : > { %v1882_v12 = vor.u32 %v1881_v30, %v1878_v36  ;;  %4466 = vmatprep.mubr.bf16.mxu1 %v4185_v19  ;;  %v9417_v15 = vshll.u32 %v7539_v44, 16  ;;  %v3102_v62 = vor.u32 %v3101_v13, %v3098_v61  ;;  %v3105_v60 = vshll.u32 %v8521_v56, 16 }
 0x26a   : > { %v2258_v35 = vrot.slane %v9416_v7, 5  ;;  %v1892_v1 = vor.u32 %v1891_v42, %v1887_v49  ;;  %v3111_v33 = vrot.slane %v3109_v29, 4  ;;  %v3115_v30 = vshll.u32 %v8564_v48, 16 }
 0x26b   : > { %v2268_v53 = vrot.slane %v9417_v15, 5  ;;  %v1883_v27 = vrot.slane %v1882_v12, 4  ;;  %v3103_v59 = vrot.slane %v3102_v62, 4  ;;  %v3107_v36 = vrot.slane %v3105_v60, 5  ;;  %v6479_v15 = vld [vmem:[#allocation2 + $0x28] sm:$0xf] }
 0x26c   : > { %v2259_v37 = vsel %vm6787_vm11, %v7849_v46, %v2258_v35  ;;  %v2263_v6 = vor.u32 %v9418_v52, %v2258_v35  ;;  %v2417_v44 = vrot.slane %v2415_v50, 4  ;;  %v2420_v61 = vrot.slane %v2418_v40, 5  ;;  %3837 = vrot.lane.b32.xlu0 %v5725_v11, %s6584_s25  ;;  %v8584_v35 = vpop.permute.xlu1 %3423  ;;  %v6480_v50 = vld [vmem:[#allocation2 + $0x24] sm:$0xf] }
 0x26d   : > { %v1893_v13 = vrot.slane %v1892_v1, 4  ;;  %v2439_v42 = vshrl.u32 %v8394_v4, 16  ;;  %v1888_v29 = vsel %vm6787_vm11, %v1883_v27, %v1887_v49  ;;  %v3112_v19 = vor.u32 %v3111_v33, %v3107_v36  ;;  %v9420_v27 = vld [vmem:[#allocation31_spill] sm:$0xff] }
 0x26e   : > { %v2264_v46 = vrot.slane %v2263_v6, 4  ;;  %v3117_v7 = vrot.slane %v3115_v30, 5  ;;  %v2442_v12 = vshll.u32 %v8394_v4, 16  ;;  %v5617_v62 = vcombine.low %v6480_v50, %v6479_v15  ;;  %v9421_v30 = vld [vmem:[#allocation26_spill] sm:$0xff] }
 0x26f   : > { %v1898_v28 = vsel %vm6787_vm11, %v1893_v13, %v1897_v14  ;;  %v3108_v49 = vsel %vm6787_vm11, %v3103_v59, %v3107_v36  ;;  %v3113_v1 = vrot.slane %v3112_v19, 4  ;;  %v2421_v52 = vor.u32 %v2420_v61, %v2417_v44  ;;  %v2108_v36 = vld [vmem:[#allocation2 + $0xc0] sm:$0xf]  ;;  %v9423_v61 = vld [vmem:[#allocation30_spill] sm:$0xff]  ;;  %v9424_v13 = vld [vmem:[#allocation29_spill] sm:$0xff] }
 0x270   : > { %v2269_v40 = vsel %vm6787_vm11, %v2264_v46, %v2268_v53  ;;  %v5645_v11 = vcombine.low %v1888_v29, %v1898_v28  ;;  %v4109_v4 = vsel %vm3967_vm15, %v8407_v47, %v8091_v0  ;;  %v9419_v6 = vshll.u32 %v7490_v18, 16  ;;  %v8603_v53 = vpop.permute.xlu0 %3897  ;;  %v9425_v28 = vld [vmem:[#allocation48_spill] sm:$0xff] }
 0x271   : > { %v8591_v60 = vcombine.low %v2259_v37, %v2269_v40  ;;  %v4022_v14 = vsel %vm4016_vm0, %v8484_v8, %v9420_v27  ;;  %v4153_v37 = vsel %vm4016_vm0, %v4109_v4, %v8208_v24  ;;  %v3979_v59 = vsel %vm3967_vm15, %v5617_v62, %v8264_v5 }
 0x272   : > { %v2234_v33 = vrot.slane %v9419_v6, 5  ;;  %3437 = vrot.lane.b32.xlu1 %v5645_v11, %s6585_s26  ;;  %v3118_v0 = vsel %vm6787_vm11, %v3113_v1, %v3117_v7  ;;  %v4057_v18 = vsel %vm4049_vm1, %v4022_v14, %v7996_v57  ;;  %v9422_v8 = vshll.u32 %v9421_v30, 16  ;;  %v8623_v57 = vpop.permute.xlu1 %3505  ;;  %v9428_v1 = vld [vmem:[#allocation25_spill] sm:$0xff]  ;;  %v9431_v14 = vld [vmem:[#allocation50_spill] sm:$0xff] }
 0x273   : > { %v5741_v47 = vcombine.low %v3108_v49, %v3118_v0  ;;  %4467 = vmatmul.mubr.bf16.gmra.mrb[24].mxu1 %v4057_v18  ;;  %v2441_v5 = vrot.slane %v2439_v42, 4  ;;  %v2444_v29 = vrot.slane %v2442_v12, 5  ;;  %v5677_v19 = vcombine.low %v2108_v36, %v8494_v38  ;;  %v9432_v0 = vld [vmem:[#allocation37_spill] sm:$0xff] }
 0x274   : > { %v2244_v44 = vrot.slane %v9422_v8, 5  ;;  %v2235_v24 = vsel %vm6787_vm11, %v9423_v61, %v2234_v33  ;;  %v2239_v46 = vor.u32 %v9424_v13, %v2234_v33  ;;  %v4188_v7 = vsel %vm4049_vm1, %v4153_v37, %v8460_v55  ;;  %v9427_v55 = vld [vmem:[#allocation17_spill] sm:$0xff] }
 0x275   : > { %v8625_v15 = vrot.slane %v2421_v52, 4  ;;  %v2458_v50 = vshll.u32 %v8270_v31, 16  ;;  %3917 = vrot.lane.b32.xlu0 %v5741_v47, %s6586_s27  ;;  %4474 = vmatprep.mubr.bf16.mxu1 %v4188_v7  ;;  %v9426_v40 = vshll.u32 %v9425_v28, 16  ;;  %v2463_v42 = vshrl.u32 %v8509_v16, 16  ;;  %v9430_v33 = vld [vmem:[#allocation49_spill] sm:$0xff]  ;;  %v8646_v47 = vpop.permute.xlu0 %3825  ;;  %v9437_v28 = vld [vmem:[#allocation51_spill] sm:$0xff] }
 0x276   : > { %v2240_v62 = vrot.slane %v2239_v46, 4  ;;  %v2466_v12 = vshll.u32 %v8509_v16, 16  ;;  %3613 = vrot.lane.b32.xlu1 %v5677_v19, %s6586_s27  ;;  %v4024_v49 = vsel %vm4016_vm0, %v3979_v59, %v9427_v55  ;;  %v9429_v52 = vshll.u32 %v9428_v1, 16  ;;  %v9434_v46 = vld [vmem:[#allocation24_spill] sm:$0xff]  ;;  %v6482_v55 = vld [vmem:[#allocation2 + $0x30] sm:$0xf] }
 0x277   : > { %v2306_v11 = vrot.slane %v9426_v40, 5  ;;  %v9433_v18 = vshll.u32 %v9432_v0, 16  ;;  %v2445_v30 = vor.u32 %v2444_v29, %v2441_v5  ;;  %v2487_v8 = vshrl.u32 %v2108_v36, 16  ;;  %v9439_v29 = vld [vmem:[#allocation34_spill] sm:$0xff]  ;;  %s6519_s27 = scalar_lea.vmem %s9170_s30, 2048 }
 0x278   : > { %v2316_v4 = vrot.slane %v9429_v52, 5  ;;  %v2245_v6 = vsel %vm6787_vm11, %v2240_v62, %v2244_v44  ;;  %v2490_v59 = vshll.u32 %v2108_v36, 16  ;;  %v9435_v19 = vshll.u32 %v9434_v46, 16  ;;  %v9436_v44 = vld [vmem:[#allocation56_spill] sm:$0xff]  ;;  %p6520_p11 = scmp.ne.s32.totalorder %s9170_s30, %s6519_s27 }
 0x279   : > { %v2307_v27 = vsel %vm6787_vm11, %v9430_v33, %v2306_v11  ;;  %v2311_v37 = vor.u32 %v9431_v14, %v2306_v11  ;;  %v2282_v16 = vrot.slane %v9433_v18, 5  ;;  %v5682_v61 = vcombine.low %v2235_v24, %v2245_v6  ;;  %v6481_v11 = vld [vmem:[#allocation2 + $0x34] sm:$0xf]  ;;  %v9438_v33 = vld [vmem:[#allocation58_spill] sm:$0xff]  ;;  %v8658_v24 = vpop.permute.xlu1 %3601 }
 0x27a   : > { %v2292_v7 = vrot.slane %v9435_v19, 5  ;;  %v5618_v1 = vcombine.low %v6482_v55, %v6481_v11  ;;  %v2465_v52 = vrot.slane %v2463_v42, 4  ;;  %v4060_v36 = vsel %vm4049_vm1, %v4024_v49, %v9439_v29  ;;  %v9440_v14 = vld [vmem:[#allocation22_spill] sm:$0xff]  ;;  %v8669_v49 = vpop.permute.xlu0 %3905  ;;  %v6483_v11 = vld [vmem:[#allocation2 + $0x88] sm:$0xf]  ;;  %p6521_p12 = pnand %p6520_p11, %p6682_p5 }
 0x27b   : > { %v2312_v13 = vrot.slane %v2311_v37, 4  ;;  %v2283_v62 = vsel %vm6787_vm11, %v9436_v44, %v2282_v16  ;;  %v2287_v40 = vor.u32 %v9437_v28, %v2282_v16  ;;  %v4112_v5 = vsel %vm3967_vm15, %v5682_v61, %v9438_v33  ;;  %4475 = vmatmul.mubr.bf16.gmra.mrb[28].mxu1 %v4060_v36  ;;  %v9441_v42 = vld [vmem:[#allocation18_spill] sm:$0xff]  ;;  %v9442_v44 = vld [vmem:[#allocation15_spill] sm:$0xff]  ;;  %v9444_v36 = vld [vmem:[#allocation53_spill] sm:$0xff] }
 0x27c   : > { %v2468_v6 = vrot.slane %v2466_v12, 5  ;;  %v4155_v37 = vsel %vm4016_vm0, %v4112_v5, %v9440_v14  ;;  %v2489_v16 = vrot.slane %v2487_v8, 4  ;;  %v2492_v46 = vrot.slane %v2490_v59, 5  ;;  %v6484_v59 = vld [vmem:[#allocation2 + $0x40] sm:$0xf]  ;;  %p6522_p13 = pneg %p6521_p12 }
 0x27d   : > { %v2317_v0 = vsel %vm6787_vm11, %v2312_v13, %v2316_v4  ;;  %v2288_v18 = vrot.slane %v2287_v40, 4  ;;  %v4191_v19 = vsel %vm4049_vm1, %v4155_v37, %v9441_v42  ;;  %v2482_v28 = vshll.u32 %v9442_v44, 16  ;;  %v9443_v4 = vld [vmem:[#allocation42_spill] sm:$0xff]  ;;  %v6487_v42 = vld [vmem:[#allocation2 + $0x48] sm:$0xf] }
 0x27e   : > { %v5685_v61 = vcombine.low %v2307_v27, %v2317_v0  ;;  %4482 = vmatprep.mubr.bf16.mxu1 %v4191_v19  ;;  %v2376_v55 = vshll.u32 %v6483_v11, 16  ;;  %v2380_v33 = vshrl.u32 %v6483_v11, 16  ;;  %v8671_v5 = vrot.slane %v2445_v30, 4  ;;  %v6485_v13 = vld [vmem:[#allocation2 + $0x3c] sm:$0xf]  ;;  %v8682_v11 = vpop.permute.xlu1 %3427 }
 0x27f   : > { %v2293_v12 = vsel %vm6787_vm11, %v2288_v18, %v2292_v7  ;;  %v3982_v8 = vsel %vm3967_vm15, %v5618_v1, %v9443_v4  ;;  %v5619_v40 = vcombine.low %v6485_v13, %v6484_v59  ;;  %v2469_v29 = vor.u32 %v2468_v6, %v2465_v52  ;;  %v6486_v18 = vld [vmem:[#allocation2 + $0x4c] sm:$0xf]  ;;  %v6488_v59 = vld [vmem:[#allocation2 + $0x94] sm:$0xf] }
 0x280   : > { %v5684_v27 = vcombine.low %v2283_v62, %v2293_v12  ;;  %v4115_v14 = vsel %vm3967_vm15, %v8591_v60, %v9444_v36  ;;  %v2378_v7 = vrot.slane %v2376_v55, 5  ;;  %v2382_v37 = vrot.slane %v2380_v33, 4  ;;  %v9445_v62 = vld [vmem:[#allocation35_spill] sm:$0xff]  ;;  %v9446_v12 = vld [vmem:[#allocation32_spill] sm:$0xff]  ;;  %v9448_v33 = vld [vmem:[#allocation6_spill] sm:$0xff] }
 0x281   : > { %v2493_v0 = vor.u32 %v2492_v46, %v2489_v16  ;;  %v5620_v19 = vcombine.low %v6487_v42, %v6486_v18  ;;  %v4157_v30 = vsel %vm4016_vm0, %v4115_v14, %v8440_v58  ;;  %v3985_v1 = vsel %vm3967_vm15, %v5619_v40, %v8478_v45  ;;  %v9449_v4 = vld [vmem:[#allocation44_spill] sm:$0xff]  ;;  %v9450_v40 = vld [vmem:[#allocation61_spill] sm:$0xff]  ;;  %v8700_v14 = vpop.permute.xlu0 %3731 }
 0x282   : > { %v4026_v52 = vsel %vm4016_vm0, %v3982_v8, %v9445_v62  ;;  %v4194_v60 = vsel %vm4049_vm1, %v4157_v30, %v8603_v53  ;;  %v2383_v6 = vor.u32 %v2382_v37, %v2378_v7  ;;  %v9447_v16 = vshll.u32 %v9446_v12, 16 }
 0x283   : > { %v2506_v55 = vshll.u32 %v8473_v2, 16  ;;  %v3988_v58 = vsel %vm3967_vm15, %v5620_v19, %v9448_v33  ;;  %v4063_v45 = vsel %vm4049_vm1, %v4026_v52, %v9449_v4  ;;  %v2400_v13 = vshll.u32 %v6488_v59, 16  ;;  %v9451_v52 = vld [vmem:[#allocation21_spill] sm:$0xff]  ;;  %v8718_v33 = vpop.permute.xlu1 %3421 }
 0x284   : > { %v2388_v46 = vrot.slane %v9447_v16, 5  ;;  %4483 = vmatmul.mubr.bf16.gmra.mrb[32].mxu1 %v4063_v45  ;;  %v4028_v8 = vsel %vm4016_vm0, %v3985_v1, %v9450_v40  ;;  %v2379_v53 = vsel %vm6787_vm11, %v8465_v22, %v2378_v7  ;;  %v2384_v36 = vrot.slane %v2383_v6, 4  ;;  %v9454_v45 = vld [vmem:[#allocation19_spill] sm:$0xff]  ;;  %v9455_v40 = vld [vmem:[#allocation52_spill] sm:$0xff] }
 0x285   : > { %v2404_v37 = vshrl.u32 %v6488_v59, 16  ;;  %v8702_v18 = vrot.slane %v2469_v29, 4  ;;  %v3290_v42 = vrot.slane %v8521_v56, 5  ;;  %v3293_v19 = vrot.slane %v8564_v48, 5  ;;  %4490 = vmatprep.mubr.bf16.mxu1 %v4194_v60  ;;  %v9452_v29 = vld [vmem:[#allocation54_spill] sm:$0xff]  ;;  %v9453_v60 = vld [vmem:[#allocation39_spill] sm:$0xff] }
 0x286   : > { %v2402_v30 = vrot.slane %v2400_v13, 5  ;;  %v8706_v62 = vrot.slane %v2493_v0, 4  ;;  %v4118_v1 = vsel %vm3967_vm15, %v5684_v27, %v8543_v54  ;;  %v2389_v22 = vsel %vm6787_vm11, %v2384_v36, %v2388_v46 }
 0x287   : > { %v2406_v7 = vrot.slane %v2404_v37, 4  ;;  %v4066_v6 = vsel %vm4049_vm1, %v4028_v8, %v9451_v52  ;;  %v4030_v12 = vsel %vm4016_vm0, %v3988_v58, %v9452_v29  ;;  %v8716_v16 = vcombine.low %v2379_v53, %v2389_v22  ;;  %v8731_v53 = vpop.permute.xlu0 %3827  ;;  %v9456_v37 = vld [vmem:[#allocation12_spill] sm:$0xff]  ;;  %v6490_v22 = vld [vmem:[#allocation2 + $0x54] sm:$0xf] }
 0x288   : > { %v2424_v0 = vshll.u32 %v9453_v60, 16  ;;  %v4121_v4 = vsel %vm3967_vm15, %v5685_v61, %v8500_v9  ;;  %v2412_v27 = vrot.slane %v2410_v17, 5  ;;  %v2428_v46 = vshrl.u32 %v9453_v60, 16  ;;  %v8745_v60 = vpop.permute.xlu1 %3507 }
 0x289   : > { %v2407_v54 = vor.u32 %v2406_v7, %v2402_v30  ;;  %v4159_v59 = vsel %vm4016_vm0, %v4118_v1, %v9454_v45  ;;  %v4069_v58 = vsel %vm4049_vm1, %v4030_v12, %v8447_v34  ;;  %v2448_v8 = vshll.u32 %v9455_v40, 16  ;;  %v6489_v34 = vld [vmem:[#allocation2 + $0x58] sm:$0xf] }
 0x28a   : > { %v2426_v13 = vrot.slane %v2424_v0, 5  ;;  %v2403_v9 = vsel %vm6787_vm11, %v8480_v21, %v2402_v30  ;;  %v2430_v63 = vrot.slane %v2428_v46, 4  ;;  %v2452_v17 = vshrl.u32 %v9455_v40, 16 }
 0x28b   : > { %v2408_v61 = vrot.slane %v2407_v54, 4  ;;  %v4197_v36 = vsel %vm4049_vm1, %v4159_v59, %v8573_v32  ;;  %v4161_v1 = vsel %vm4016_vm0, %v4121_v4, %v9456_v37  ;;  %v5621_v7 = vcombine.low %v6490_v22, %v6489_v34 }
 0x28c   : > { %v2450_v52 = vrot.slane %v2448_v8, 5  ;;  %4491 = vmatmul.mubr.bf16.gmra.mrb[36].mxu1 %v4066_v6  ;;  %v2431_v12 = vor.u32 %v2430_v63, %v2426_v13  ;;  %v2436_v21 = vrot.slane %v2434_v20, 5  ;;  %v2454_v30 = vrot.slane %v2452_v17, 4  ;;  %v9457_v20 = vld [vmem:[#allocation63_spill] sm:$0xff]  ;;  %v8778_v22 = vpop.permute.xlu1 %3603 }
 0x28d   : > { %v2413_v29 = vsel %vm6787_vm11, %v2408_v61, %v2412_v27  ;;  %4498 = vmatprep.mubr.bf16.mxu1 %v4197_v36  ;;  %v2427_v0 = vsel %vm6787_vm11, %v8625_v15, %v2426_v13  ;;  %v2472_v4 = vshll.u32 %v8344_v51, 16  ;;  %v2476_v6 = vshrl.u32 %v8344_v51, 16  ;;  %v8760_v15 = vpop.permute.xlu0 %3907 }
 0x28e   : > { %v8747_v32 = vcombine.low %v2403_v9, %v2413_v29  ;;  %v2432_v54 = vrot.slane %v2431_v12, 4  ;;  %v2455_v27 = vor.u32 %v2454_v30, %v2450_v52  ;;  %v2460_v43 = vrot.slane %v2458_v50, 5  ;;  %v3134_v9 = vld [vmem:[#allocation2 + $0xcc] sm:$0xe]  ;;  %v9458_v12 = vld [vmem:[#allocation14_spill] sm:$0xff] }
 0x28f   : > { %v5628_v46 = vcombine.low %v9457_v20, %v8400_v39  ;;  %v2474_v45 = vrot.slane %v2472_v4, 5  ;;  %v2478_v59 = vrot.slane %v2476_v6, 4  ;;  %v2496_v40 = vshll.u32 %v8494_v38, 16  ;;  %v9459_v6 = vld [vmem:[#allocation33_spill] sm:$0xff] }
 0x290   : > { %v2500_v8 = vshrl.u32 %v8494_v38, 16  ;;  %v2437_v51 = vsel %vm6787_vm11, %v2432_v54, %v2436_v21  ;;  %v2451_v31 = vsel %vm6787_vm11, %v8671_v5, %v2450_v52  ;;  %v2456_v50 = vrot.slane %v2455_v27, 4  ;;  %v9460_v54 = vld [vmem:[#allocation38_spill] sm:$0xff]  ;;  %v6492_v27 = vld [vmem:[#allocation2 + $0x60] sm:$0xf] }
 0x291   : > { %v5629_v13 = vcombine.low %v8530_v41, %v8498_v26  ;;  %v8769_v61 = vcombine.low %v2427_v0, %v2437_v51  ;;  %v2479_v63 = vor.u32 %v2478_v59, %v2474_v45  ;;  %v2484_v38 = vrot.slane %v2482_v28, 5 }
 0x292   : > { %v2498_v17 = vrot.slane %v2496_v40, 5  ;;  %v2461_v36 = vsel %vm6787_vm11, %v2456_v50, %v2460_v43  ;;  %v2475_v37 = vsel %vm6787_vm11, %v8702_v18, %v2474_v45  ;;  %v2502_v34 = vrot.slane %v2500_v8, 4  ;;  %v9461_v45 = vld [vmem:[#allocation62_spill] sm:$0xff]  ;;  %v9462_v40 = vld [vmem:[#allocation11_spill] sm:$0xff] }
 0x293   : > { %v5613_v5 = vrot.slane %v3134_v9, 9  ;;  %v8780_v52 = vcombine.low %v2451_v31, %v2461_v36  ;;  %v2480_v29 = vrot.slane %v2479_v63, 4  ;;  %v3292_v28 = vrot.slane %v3290_v42, 4  ;;  %v3430_v48 = vpop.permute.xlu1 %3429  ;;  %v9463_v9 = vld [vmem:[#allocation7_spill] sm:$0xff]  ;;  %v9464_v63 = vld [vmem:[#allocation13_spill] sm:$0xff] }
 0x294   : > { %v2499_v44 = vsel %vm6787_vm11, %v8706_v62, %v2498_v17  ;;  %4499 = vmatmul.mubr.bf16.gmra.mrb[40].mxu1 %v4069_v58  ;;  %v4200_v21 = vsel %vm4049_vm1, %v4161_v1, %v9458_v12  ;;  %v2503_v30 = vor.u32 %v2502_v34, %v2498_v17  ;;  %v2508_v18 = vrot.slane %v2506_v55, 5  ;;  %v3734_v1 = vpop.permute.xlu0 %3733  ;;  %v9466_v34 = vld [vmem:[#allocation28_spill] sm:$0xff] }
 0x295   : > { %v3291_v0 = vsel %vm6777_vm8, %v5613_v5, %v3290_v42  ;;  %4506 = vmatprep.mubr.bf16.mxu1 %v4200_v21  ;;  %v3991_v62 = vsel %vm3967_vm15, %v5621_v7, %v8718_v33  ;;  %v2485_v4 = vsel %vm6787_vm11, %v2480_v29, %v2484_v38  ;;  %v3294_v58 = vsel %vm6777_vm8, %v3292_v28, %v3293_v19  ;;  %v6491_v19 = vld [vmem:[#allocation2 + $0x64] sm:$0xf]  ;;  %v9465_v38 = vld [vmem:[#allocation36_spill] sm:$0xff]  ;;  %v6494_v28 = vld [vmem:[#allocation2 + $0x70] sm:$0xf] }
 0x296   : > { %v8803_v2 = vcombine.low %v2475_v37, %v2485_v4  ;;  %v2504_v55 = vrot.slane %v2503_v30, 4  ;;  %v5757_v56 = vcombine.low %v3291_v0, %v3294_v58  ;;  %v4124_v42 = vsel %vm3967_vm15, %v9460_v54, %v9459_v6  ;;  %v9467_v21 = vld [vmem:[#allocation8_spill] sm:$0xff] }
 0x297   : > { %v4032_v33 = vsel %vm4016_vm0, %v3991_v62, %v8557_v23  ;;  %v5622_v43 = vcombine.low %v6492_v27, %v6491_v19  ;;  %v4163_v8 = vsel %vm4016_vm0, %v4124_v42, %v9462_v40  ;;  %v4127_v17 = vsel %vm3967_vm15, %v9465_v38, %v9464_v63  ;;  %v6498_v19 = vld [vmem:[#allocation2 + $0x88] sm:$0xf] }
 0x298   : > { %v2509_v7 = vsel %vm6787_vm11, %v2504_v55, %v2508_v18  ;;  %6265 = vmatmul.mubr.msk.bf16.gmra.mrb[44].mxu0 %vm3967_vm15, %v5757_v56  ;;  %v4072_v59 = vsel %vm4049_vm1, %v4032_v33, %v9461_v45  ;;  %v4203_v23 = vsel %vm4049_vm1, %v4163_v8, %v9463_v9  ;;  %v3830_v10 = vpop.permute.xlu0 %3829  ;;  %v3510_v31 = vpop.permute.xlu1 %3509  ;;  %v4165_v37 = vsel %vm4016_vm0, %v4127_v17, %v8646_v47  ;;  %v6495_v55 = vld [vmem:[#allocation2 + $0x78] sm:$0xf]  ;;  %v6496_v56 = vld [vmem:[#allocation2 + $0x7c] sm:$0xf] }
 0x299   : > { %v8813_v3 = vcombine.low %v2499_v44, %v2509_v7  ;;  %v3994_v51 = vsel %vm3967_vm15, %v5622_v43, %v8584_v35  ;;  %v4206_v35 = vsel %vm4049_vm1, %v4165_v37, %v8669_v49  ;;  %v6493_v44 = vld [vmem:[#allocation2 + $0x6c] sm:$0xf]  ;;  %v4130_v47 = vsel %vm3967_vm15, %v8716_v16, %v8700_v14 }
 0x29a   : > { %v4034_v50 = vsel %vm4016_vm0, %v3994_v51, %v8523_v25  ;;  %v5623_v25 = vcombine.low %v6493_v44, %v6494_v28  ;;  %v4167_v0 = vsel %vm4016_vm0, %v4130_v47, %v8731_v53  ;;  %v6499_v51 = vld [vmem:[#allocation2 + $0x90] sm:$0xf] }
 0x29b   : > { %v4075_v5 = vsel %vm4049_vm1, %v4034_v50, %v9466_v34  ;;  %v4209_v4 = vsel %vm4049_vm1, %v4167_v0, %v8760_v15  ;;  %v6500_v50 = vld [vmem:[#allocation2 + $0x94] sm:$0xf]  ;;  %v6438_v34 = vld [vmem:[%s9226_s7] sm:$0xff]  }
 0x29c   : > { %4507 = vmatmul.mubr.bf16.gmra.mrb[44].mxu1 %v4072_v59  ;;  %v3606_v29 = vpop.permute.xlu1 %3605  ;;  %v3997_v30 = vsel %vm3967_vm15, %v5623_v25, %v9467_v21  ;;  %v5626_v63 = vcombine.low %v6499_v51, %v6500_v50  ;;  %6268 = vmatprep.subr.bf16.mxu0 %v6438_v34 }
 0x29d   : > { %4514 = vmatprep.mubr.bf16.mxu1 %v4203_v23  ;;  %v4036_v18 = vsel %vm4016_vm0, %v3997_v30, %v8623_v57  ;;  %v5624_v57 = vcombine.low %v6495_v55, %v6496_v56  ;;  %6269 = vmatpush3.bf16.msra.mxu0 %v6438_v34 }
 0x29e   : > { %v4078_v49 = vsel %vm4049_vm1, %v4036_v18, %v8658_v24  ;;  %v4133_v24 = vsel %vm3967_vm15, %v8747_v32, %v3734_v1 }
 0x29f   : > { %v3910_v36 = vpop.permute.xlu0 %3909  ;;  %v4000_v6 = vsel %vm3967_vm15, %v5624_v57, %v8682_v11  ;;  %v4169_v53 = vsel %vm4016_vm0, %v4133_v24, %v3830_v10 }
 0x2a0   : > { %v4038_v16 = vsel %vm4016_vm0, %v4000_v6, %v8745_v60  ;;  %v4212_v42 = vsel %vm4049_vm1, %v4169_v53, %v3910_v36  ;;  %v6497_v60 = vld [vmem:[#allocation2 + $0x84] sm:$0xf] }
 0x2a1   : > { %v4081_v15 = vsel %vm4049_vm1, %v4038_v16, %v8778_v22  ;;  %v5625_v27 = vcombine.low %v6497_v60, %v6498_v19 }
 0x2a3   : > { %v3736_v12 = vpop.permute.xlu0 %3735  ;;  %v4003_v22 = vsel %vm3967_vm15, %v5625_v27, %v3430_v48 }
 0x2a4   : > { %4515 = vmatmul.mubr.bf16.gmra.mrb[48].mxu1 %v4075_v5  ;;  %v4040_v45 = vsel %vm4016_vm0, %v4003_v22, %v3510_v31  ;;  %v4136_v59 = vsel %vm3967_vm15, %v8769_v61, %v3736_v12  ;;  %v6501_v5 = vld [vmem:[#allocation2 + $0x9c] sm:$0xf]  ;;  %v8919_v22 = vld [vmem:[%s9224_s5] ss:$0 sm:$0xff] }
 0x2a5   : > { %4522 = vmatprep.mubr.bf16.mxu1 %v4206_v35  ;;  %v4084_v8 = vsel %vm4049_vm1, %v4040_v45, %v3606_v29  ;;  %v6502_v35 = vld [vmem:[#allocation2 + $0xa0] sm:$0xf] }
 0x2a6   : > { %v5627_v29 = vcombine.low %v6501_v5, %v6502_v35 }
 0x2a7   : > { %v3432_v62 = vpop.permute.xlu1 %3431  ;;  %v3832_v58 = vpop.permute.xlu0 %3831 }
 0x2a8   : > { %v4171_v40 = vsel %vm4016_vm0, %v4136_v59, %v3832_v58  ;;  %v4006_v48 = vsel %vm3967_vm15, %v5626_v63, %v3432_v62  ;;  %v9468_v59 = vld [vmem:[#allocation40_spill] sm:$0xff] }
 0x2ab   : > { %v3512_v14 = vpop.permute.xlu1 %3511 }
 0x2ac   : > { %4523 = vmatmul.mubr.bf16.gmra.mrb[52].mxu1 %v4078_v49  ;;  %v4042_v31 = vsel %vm4016_vm0, %v4006_v48, %v3512_v14  ;;  %v6439_v49 = vld [vmem:[%s9226_s7 + $0x8] sm:$0xff]  }
 0x2ad   : > { %4530 = vmatprep.mubr.bf16.mxu1 %v4209_v4  ;;  %6270 = vmatprep.subr.bf16.mxu0 %v6439_v49 }
 0x2ae   : > { %6271 = vmatpush3.bf16.msra.mxu0 %v6439_v49 }
 0x2af   : > { %v3608_v32 = vpop.permute.xlu1 %3607 }
 0x2b0   : > { %v3912_v54 = vpop.permute.xlu0 %3911  ;;  %v4087_v61 = vsel %vm4049_vm1, %v4042_v31, %v3608_v32 }
 0x2b1   : > { %v8857_v33 = vpop.f32.mrb[32].mxu0  ;;  %v4215_v9 = vsel %vm4049_vm1, %v4171_v40, %v3912_v54 }
 0x2b2   : > { %v8859_v11 = vpop.f32.mrb[33].mxu0 }
 0x2b3   : > { %v8861_v7 = vpop.f32.mrb[34].mxu0 }
 0x2b4   : > { %4531 = vmatmul.mubr.bf16.gmra.mrb[56].mxu1 %v4081_v15  ;;  %v8863_v1 = vpop.f32.mrb[35].mxu0  ;;  %v3738_v43 = vpop.permute.xlu0 %3737 }
 0x2b5   : > { %4538 = vmatprep.mubr.bf16.mxu1 %v4212_v42  ;;  %v4139_v44 = vsel %vm3967_vm15, %v8780_v52, %v3738_v43 }
 0x2b8   : > { %v3834_v10 = vpop.permute.xlu0 %3833 }
 0x2b9   : > { %v4173_v12 = vsel %vm4016_vm0, %v4139_v44, %v3834_v10  ;;  %v9469_v10 = vld [vmem:[#allocation41_spill] sm:$0xff] }
 0x2bb   : > { %v3434_v23 = vpop.permute.xlu1 %3433 }
 0x2bc   : > { %4539 = vmatmul.mubr.bf16.gmra.mrb[60].mxu1 %v4084_v8  ;;  %v4009_v25 = vsel %vm3967_vm15, %v5627_v29, %v3434_v23 }
 0x2bd   : > { %4546 = vmatprep.mubr.bf16.mxu1 %v4215_v9  ;;  %v8925_v9 = vld [vmem:[%s9225_s6] ss:$0 sm:$0xff] }
 0x2bf   : > { %v3514_v38 = vpop.permute.xlu1 %3513  ;;  %v3740_v17 = vpop.permute.xlu0 %3739 }
 0x2c0   : > { %v4044_v30 = vsel %vm4016_vm0, %v4009_v25, %v3514_v38  ;;  %v4142_v52 = vsel %vm3967_vm15, %v8803_v2, %v3740_v17  ;;  %v9470_v25 = vld [vmem:[#allocation10_spill] sm:$0xff] }
 0x2c3   : > { %v3610_v36 = vpop.permute.xlu1 %3609  ;;  %v3836_v37 = vpop.permute.xlu0 %3835 }
 0x2c4   : > { %4547 = vmatmul.mubr.bf16.gmra.mrb[64].mxu1 %v4087_v61  ;;  %v4090_v47 = vsel %vm4049_vm1, %v4044_v30, %v3610_v36  ;;  %v4175_v4 = vsel %vm4016_vm0, %v4142_v52, %v3836_v37 }
 0x2cd   : > { %v3436_v28 = vpop.permute.xlu1 %3435 }
 0x2ce   : > { %v3914_v21 = vpop.permute.xlu0 %3913  ;;  %v4012_v58 = vsel %vm3967_vm15, %v5628_v46, %v3436_v28 }
 0x2cf   : > { %v4218_v18 = vsel %vm4049_vm1, %v4173_v12, %v3914_v21 }
 0x2d0   : > { %4554 = vmatprep.mubr.bf16.mxu1 %v4218_v18  ;;  %v9471_v18 = vld [vmem:[#allocation9_spill] sm:$0xff] }
 0x2d1   : > { %v3516_v0 = vpop.permute.xlu1 %3515  ;;  %4555 = vmatmul.mubr.bf16.gmra.mrb[68].mxu1 %v4090_v47 }
 0x2d2   : > { %v4046_v56 = vsel %vm4016_vm0, %v4012_v58, %v3516_v0 }
 0x2d5   : > { %v3612_v62 = vpop.permute.xlu1 %3611 }
 0x2d6   : > { %v3916_v55 = vpop.permute.xlu0 %3915  ;;  %v4093_v6 = vsel %vm4049_vm1, %v4046_v56, %v3612_v62 }
 0x2d7   : > { %v4221_v57 = vsel %vm4049_vm1, %v4175_v4, %v3916_v55 }
 0x2d8   : > { %4562 = vmatprep.mubr.bf16.mxu1 %v4221_v57 }
 0x2d9   : > { %4563 = vmatmul.mubr.bf16.gmra.mrb[72].mxu1 %v4093_v6  ;;  %v3518_v16 = vpop.permute.xlu1 %3517 }
 0x2da   : > { %v3742_v14 = vpop.permute.xlu0 %3741 }
 0x2db   : > { %v4145_v20 = vsel %vm3967_vm15, %v8813_v3, %v3742_v14 }
 0x2de   : > { %v3838_v2 = vpop.permute.xlu0 %3837 }
 0x2df   : > { %v4177_v53 = vsel %vm4016_vm0, %v4145_v20, %v3838_v2  ;;  %v9473_v20 = vld [vmem:[#allocation47_spill] sm:$0xff] }
 0x2e3   : > { %v8904_v46 = vpop.f32.mrb[36].mxu0 }
 0x2e4   : > { %v3438_v24 = vpop.permute.xlu1 %3437  ;;  %v8907_v54 = vpop.f32.mrb[37].mxu0 }
 0x2e5   : > { %v4015_v39 = vsel %vm3967_vm15, %v5629_v13, %v3438_v24  ;;  %v8911_v27 = vpop.f32.mrb[38].mxu0 }
 0x2e6   : > { %v4048_v19 = vsel %vm4016_vm0, %v4015_v39, %v3518_v16  ;;  %v8914_v41 = vpop.f32.mrb[39].mxu0  ;;  %v9472_v16 = vld [vmem:[#allocation45_spill] sm:$0xff] }
 0x2e7   : > { %v3918_v15 = vpop.permute.xlu0 %3917 }
 0x2e8   : > { %v3614_v42 = vpop.permute.xlu1 %3613  ;;  %v4224_v60 = vsel %vm4049_vm1, %v4177_v53, %v3918_v15 }
 0x2e9   : > { %4570 = vmatprep.mubr.bf16.mxu1 %v4224_v60  ;;  %v4096_v26 = vsel %vm4049_vm1, %v4048_v19, %v3614_v42 }
 0x2ea   : > { %4571 = vmatmul.mubr.bf16.gmra.mrb[76].mxu1 %v4096_v26 }
 0x303   : > { %v6052_v13 = vpop.f32.mrb[16].mxu1 }
 0x304   : > { %v6053_v3 = vpop.f32.mrb[17].mxu1 }
 0x305   : > { %v6054_v32 = vadd.f32 %v6053_v3, %v6052_v13  ;;  %v6055_v43 = vpop.f32.mrb[18].mxu1 }
 0x306   : > { %v6056_v45 = vpop.f32.mrb[19].mxu1 }
 0x307   : > { %v4614_v40 = vadd.f32 %v6054_v32, %v9468_v59  ;;  %v6057_v8 = vadd.f32 %v6056_v45, %v6055_v43  ;;  %v9474_v59 = vld [vmem:[#allocation43_spill] sm:$0xff] }
 0x309   : > { %v4747_v23 = vmul.f32 %v8919_v22, %v4614_v40  ;;  %v4617_v51 = vadd.f32 %v6057_v8, %v9469_v10 }
 0x30b   : > { %v4786_v50 = vadd.f32 %v8925_v9, %v4747_v23  ;;  %v4748_v63 = vmul.f32 %v8919_v22, %v4617_v51  ;;  %v9475_v51 = vld [vmem:[#allocation46_spill] sm:$0xff] }
 0x30d   : > { %v4787_v48 = vadd.f32 %v8925_v9, %v4748_v63  ;;  %v4818_v31 = vmax.f32 %v4786_v50, 0.0 }
 0x30f   : > { %v4819_v38 = vmax.f32 %v4787_v48, 0.0 }
 0x311   : > { %v8932_v61 = vpop.f32.mrb[40].mxu0  ;;  %v4850_v17 = vpack.c.bf16 %v4819_v38, %v4818_v31 }
 0x312   : > { %v8934_v36 = vpop.f32.mrb[41].mxu0 }
 0x313   : > { %v8936_v37 = vpop.f32.mrb[42].mxu0  ;;  %6272 = vmatprep.mubr.msk.bf16.mxu0 %vm3967_vm15, %v4850_v17 }
 0x314   : > { %v8939_v34 = vpop.f32.mrb[43].mxu0 }
 0x33b   : > { %v6058_v5 = vpop.f32.mrb[20].mxu1 }
 0x33c   : > { %v6059_v35 = vpop.f32.mrb[21].mxu1 }
 0x33d   : > { %v6060_v29 = vadd.f32 %v6059_v35, %v6058_v5  ;;  %v6061_v44 = vpop.f32.mrb[22].mxu1 }
 0x33e   : > { %v6062_v28 = vpop.f32.mrb[23].mxu1 }
 0x33f   : > { %v4622_v12 = vadd.f32 %v9470_v25, %v6060_v29  ;;  %v6063_v21 = vadd.f32 %v6062_v28, %v6061_v44  ;;  %v9476_v25 = vld [vmem:[#allocation57_spill] sm:$0xff] }
 0x341   : > { %v4749_v30 = vmul.f32 %v8919_v22, %v4622_v12  ;;  %v4625_v47 = vadd.f32 %v9471_v18, %v6063_v21  ;;  %v9477_v18 = vld [vmem:[#allocation60_spill] sm:$0xff] }
 0x343   : > { %v4788_v0 = vadd.f32 %v8925_v9, %v4749_v30  ;;  %v4750_v49 = vmul.f32 %v8919_v22, %v4625_v47 }
 0x345   : > { %v4789_v52 = vadd.f32 %v8925_v9, %v4750_v49  ;;  %v4820_v58 = vmax.f32 %v4788_v0, 0.0 }
 0x346   : > { %v6064_v62 = vpop.f32.mrb[24].mxu1 }
 0x347   : > { %v6065_v4 = vpop.f32.mrb[25].mxu1  ;;  %v4821_v55 = vmax.f32 %v4789_v52, 0.0 }
 0x348   : > { %v6066_v56 = vadd.f32 %v6065_v4, %v6064_v62  ;;  %v6067_v57 = vpop.f32.mrb[26].mxu1 }
 0x349   : > { %v6068_v6 = vpop.f32.mrb[27].mxu1  ;;  %v4851_v14 = vpack.c.bf16 %v4821_v55, %v4820_v58 }
 0x34a   : > { %v4630_v2 = vadd.f32 %v6066_v56, %v9472_v16  ;;  %v6069_v24 = vadd.f32 %v6068_v6, %v6067_v57  ;;  %v9478_v16 = vld [vmem:[#allocation55_spill] sm:$0xff] }
 0x34b   : > { %6273 = vmatmul.mubr.msk.bf16.vlgmr.msra.gmra.mrb[48].mxu0 %vm3967_vm15, %v4851_v14 }
 0x34c   : > { %v4751_v39 = vmul.f32 %v8919_v22, %v4630_v2  ;;  %v4633_v53 = vadd.f32 %v6069_v24, %v9473_v20  ;;  %v9479_v20 = vld [vmem:[#allocation59_spill] sm:$0xff] }
 0x34e   : > { %v4790_v15 = vadd.f32 %v8925_v9, %v4751_v39  ;;  %v4752_v42 = vmul.f32 %v8919_v22, %v4633_v53  ;;  %v6070_v60 = vpop.f32.mrb[28].mxu1 }
 0x34f   : > { %v6071_v19 = vpop.f32.mrb[29].mxu1 }
 0x350   : > { %v4791_v26 = vadd.f32 %v8925_v9, %v4752_v42  ;;  %v6072_v13 = vadd.f32 %v6071_v19, %v6070_v60  ;;  %v6073_v3 = vpop.f32.mrb[30].mxu1  ;;  %v4822_v43 = vmax.f32 %v4790_v15, 0.0 }
 0x351   : > { %v6074_v32 = vpop.f32.mrb[31].mxu1 }
 0x352   : > { %v4823_v45 = vmax.f32 %v4791_v26, 0.0  ;;  %v4638_v40 = vadd.f32 %v9474_v59, %v6072_v13  ;;  %v6075_v8 = vadd.f32 %v6074_v32, %v6073_v3 }
 0x354   : > { %v4852_v23 = vpack.c.bf16 %v4823_v45, %v4822_v43  ;;  %v4753_v10 = vmul.f32 %v8919_v22, %v4638_v40  ;;  %v4641_v50 = vadd.f32 %v9475_v51, %v6075_v8  ;;  %v9480_v40 = vld [vmem:[#allocation27_spill] sm:$0xff] }
 0x356   : > { %6276 = vmatprep.mubr.msk.bf16.mxu0 %vm3967_vm15, %v4852_v23  ;;  %v4792_v63 = vadd.f32 %v8925_v9, %v4753_v10  ;;  %v4754_v48 = vmul.f32 %v8919_v22, %v4641_v50 }
 0x357   : > { %v6076_v31 = vpop.f32.mrb[32].mxu1 }
 0x358   : > { %v6077_v38 = vpop.f32.mrb[33].mxu1  ;;  %v4793_v17 = vadd.f32 %v8925_v9, %v4754_v48  ;;  %v4824_v44 = vmax.f32 %v4792_v63, 0.0  ;;  %v9481_v63 = vld [vmem:[#allocation65_spill] sm:$0xff] }
 0x359   : > { %v6078_v5 = vadd.f32 %v6077_v38, %v6076_v31  ;;  %v6079_v35 = vpop.f32.mrb[34].mxu1 }
 0x35a   : > { %v6080_v29 = vpop.f32.mrb[35].mxu1  ;;  %v4825_v28 = vmax.f32 %v4793_v17, 0.0 }
 0x35b   : > { %v4646_v12 = vadd.f32 %v6078_v5, %v9476_v25  ;;  %v6081_v21 = vadd.f32 %v6080_v29, %v6079_v35 }
 0x35c   : > { %v4853_v0 = vpack.c.bf16 %v4825_v28, %v4824_v44 }
 0x35d   : > { %v4755_v30 = vmul.f32 %v8919_v22, %v4646_v12  ;;  %v4649_v47 = vadd.f32 %v6081_v21, %v9477_v18 }
 0x35e   : > { %6277 = vmatmul.mubr.msk.bf16.gmra.mrb[52].mxu0 %vm3967_vm15, %v4853_v0 }
 0x35f   : > { %v4794_v49 = vadd.f32 %v8925_v9, %v4755_v30  ;;  %v4756_v52 = vmul.f32 %v8919_v22, %v4649_v47  ;;  %v6082_v62 = vpop.f32.mrb[36].mxu1  ;;  %v9482_v47 = vld [vmem:[#allocation64_spill] sm:$0xff] }
 0x360   : > { %v6083_v4 = vpop.f32.mrb[37].mxu1 }
 0x361   : > { %v4795_v58 = vadd.f32 %v8925_v9, %v4756_v52  ;;  %v6084_v55 = vadd.f32 %v6083_v4, %v6082_v62  ;;  %v6085_v56 = vpop.f32.mrb[38].mxu1  ;;  %v4826_v6 = vmax.f32 %v4794_v49, 0.0  ;;  %v9483_v62 = vld [vmem:[#allocation20_spill] sm:$0xff] }
 0x362   : > { %v6086_v57 = vpop.f32.mrb[39].mxu1 }
 0x363   : > { %v4827_v14 = vmax.f32 %v4795_v58, 0.0  ;;  %v4654_v2 = vadd.f32 %v9478_v16, %v6084_v55  ;;  %v6087_v24 = vadd.f32 %v6086_v57, %v6085_v56 }
 0x365   : > { %v4757_v39 = vmul.f32 %v8919_v22, %v4654_v2  ;;  %v4657_v53 = vadd.f32 %v9479_v20, %v6087_v24  ;;  %v4854_v15 = vpack.c.bf16 %v4827_v14, %v4826_v6 }
 0x367   : > { %v4796_v42 = vadd.f32 %v8925_v9, %v4757_v39  ;;  %v4758_v60 = vmul.f32 %v8919_v22, %v4657_v53  ;;  %v6088_v19 = vpop.f32.mrb[40].mxu1  ;;  %6280 = vmatprep.mubr.msk.bf16.mxu0 %vm3967_vm15, %v4854_v15 }
 0x368   : > { %v6089_v26 = vpop.f32.mrb[41].mxu1 }
 0x369   : > { %v4797_v13 = vadd.f32 %v8925_v9, %v4758_v60  ;;  %v6090_v3 = vadd.f32 %v6089_v26, %v6088_v19  ;;  %v6091_v32 = vpop.f32.mrb[42].mxu1  ;;  %v4828_v45 = vmax.f32 %v4796_v42, 0.0 }
 0x36a   : > { %v6092_v43 = vpop.f32.mrb[43].mxu1 }
 0x36b   : > { %v4829_v59 = vmax.f32 %v4797_v13, 0.0  ;;  %v4662_v8 = vadd.f32 %v6090_v3, %v9480_v40  ;;  %v6093_v23 = vadd.f32 %v6092_v43, %v6091_v32  ;;  %v8976_v10 = vpop.f32.mrb[44].mxu0 }
 0x36c   : > { %v8978_v51 = vpop.f32.mrb[45].mxu0 }
 0x36d   : > { %v4759_v50 = vmul.f32 %v8919_v22, %v4662_v8  ;;  %v4665_v48 = vadd.f32 %v6093_v23, %v9481_v63  ;;  %v4855_v31 = vpack.c.bf16 %v4829_v59, %v4828_v45  ;;  %v8982_v38 = vpop.f32.mrb[46].mxu0 }
 0x36e   : > { %v8984_v17 = vpop.f32.mrb[47].mxu0 }
 0x36f   : > { %v4798_v5 = vadd.f32 %v8925_v9, %v4759_v50  ;;  %v4760_v35 = vmul.f32 %v8919_v22, %v4665_v48  ;;  %v6094_v29 = vpop.f32.mrb[44].mxu1  ;;  %6281 = vmatmul.mubr.msk.bf16.gmra.mrb[56].mxu0 %vm3967_vm15, %v4855_v31 }
 0x370   : > { %v6095_v44 = vpop.f32.mrb[45].mxu1 }
 0x371   : > { %v4799_v28 = vadd.f32 %v8925_v9, %v4760_v35  ;;  %v6096_v25 = vadd.f32 %v6095_v44, %v6094_v29  ;;  %v6097_v12 = vpop.f32.mrb[46].mxu1  ;;  %v4830_v30 = vmax.f32 %v4798_v5, 0.0 }
 0x372   : > { %v6098_v21 = vpop.f32.mrb[47].mxu1 }
 0x373   : > { %v4831_v18 = vmax.f32 %v4799_v28, 0.0  ;;  %v4670_v0 = vadd.f32 %v9482_v47, %v6096_v25  ;;  %v6099_v49 = vadd.f32 %v6098_v21, %v6097_v12 }
 0x375   : > { %v4761_v52 = vmul.f32 %v8919_v22, %v4670_v0  ;;  %v4673_v4 = vadd.f32 %v9483_v62, %v6099_v49  ;;  %v4856_v58 = vpack.c.bf16 %v4831_v18, %v4830_v30 }
 0x377   : > { %v4800_v55 = vadd.f32 %v8925_v9, %v4761_v52  ;;  %v4762_v56 = vmul.f32 %v8919_v22, %v4673_v4  ;;  %v6100_v57 = vpop.f32.mrb[48].mxu1  ;;  %6284 = vmatprep.mubr.msk.bf16.mxu0 %vm3967_vm15, %v4856_v58 }
 0x378   : > { %v6101_v6 = vpop.f32.mrb[49].mxu1 }
 0x379   : > { %v4801_v14 = vadd.f32 %v8925_v9, %v4762_v56  ;;  %v6102_v16 = vadd.f32 %v6101_v6, %v6100_v57  ;;  %v6103_v2 = vpop.f32.mrb[50].mxu1  ;;  %v4832_v39 = vmax.f32 %v4800_v55, 0.0 }
 0x37a   : > { %v6104_v24 = vpop.f32.mrb[51].mxu1 }
 0x37b   : > { %v4833_v20 = vmax.f32 %v4801_v14, 0.0  ;;  %v4678_v53 = vadd.f32 %v6102_v16, %v8859_v11  ;;  %v6105_v15 = vadd.f32 %v6104_v24, %v6103_v2 }
 0x37d   : > { %v4763_v42 = vmul.f32 %v8919_v22, %v4678_v53  ;;  %v4681_v60 = vadd.f32 %v6105_v15, %v8863_v1  ;;  %v4857_v19 = vpack.c.bf16 %v4833_v20, %v4832_v39 }
 0x37f   : > { %v4802_v26 = vadd.f32 %v8925_v9, %v4763_v42  ;;  %v4764_v13 = vmul.f32 %v8919_v22, %v4681_v60  ;;  %v6106_v3 = vpop.f32.mrb[52].mxu1  ;;  %6285 = vmatmul.mubr.msk.bf16.gmra.mrb[60].mxu0 %vm3967_vm15, %v4857_v19 }
 0x380   : > { %v6107_v32 = vpop.f32.mrb[53].mxu1 }
 0x381   : > { %v4803_v43 = vadd.f32 %v8925_v9, %v4764_v13  ;;  %v6108_v45 = vadd.f32 %v6107_v32, %v6106_v3  ;;  %v6109_v59 = vpop.f32.mrb[54].mxu1  ;;  %v4834_v11 = vmax.f32 %v4802_v26, 0.0 }
 0x382   : > { %v6110_v40 = vpop.f32.mrb[55].mxu1 }
 0x383   : > { %v4835_v8 = vmax.f32 %v4803_v43, 0.0  ;;  %v4686_v23 = vadd.f32 %v8857_v33, %v6108_v45  ;;  %v6111_v50 = vadd.f32 %v6110_v40, %v6109_v59 }
 0x385   : > { %v4765_v1 = vmul.f32 %v8919_v22, %v4686_v23  ;;  %v4689_v63 = vadd.f32 %v8861_v7, %v6111_v50  ;;  %v4858_v48 = vpack.c.bf16 %v4835_v8, %v4834_v11 }
 0x387   : > { %v4804_v31 = vadd.f32 %v8925_v9, %v4765_v1  ;;  %v4766_v5 = vmul.f32 %v8919_v22, %v4689_v63  ;;  %v6112_v35 = vpop.f32.mrb[56].mxu1  ;;  %6288 = vmatprep.mubr.msk.bf16.mxu0 %vm3967_vm15, %v4858_v48 }
 0x388   : > { %v6113_v29 = vpop.f32.mrb[57].mxu1 }
 0x389   : > { %v4805_v44 = vadd.f32 %v8925_v9, %v4766_v5  ;;  %v6114_v28 = vadd.f32 %v6113_v29, %v6112_v35  ;;  %v6115_v25 = vpop.f32.mrb[58].mxu1  ;;  %v4836_v33 = vmax.f32 %v4804_v31, 0.0 }
 0x38a   : > { %v6116_v12 = vpop.f32.mrb[59].mxu1 }
 0x38b   : > { %v4837_v21 = vmax.f32 %v4805_v44, 0.0  ;;  %v4694_v30 = vadd.f32 %v6114_v28, %v8907_v54  ;;  %v6117_v18 = vadd.f32 %v6116_v12, %v6115_v25 }
 0x38d   : > { %v4767_v7 = vmul.f32 %v8919_v22, %v4694_v30  ;;  %v4697_v47 = vadd.f32 %v6117_v18, %v8914_v41  ;;  %v4859_v0 = vpack.c.bf16 %v4837_v21, %v4836_v33 }
 0x38f   : > { %v4806_v49 = vadd.f32 %v8925_v9, %v4767_v7  ;;  %v4768_v52 = vmul.f32 %v8919_v22, %v4697_v47  ;;  %v6118_v62 = vpop.f32.mrb[60].mxu1  ;;  %6289 = vmatmul.mubr.msk.bf16.gmra.mrb[64].mxu0 %vm3967_vm15, %v4859_v0 }
 0x390   : > { %v6119_v4 = vpop.f32.mrb[61].mxu1 }
 0x391   : > { %v4807_v58 = vadd.f32 %v8925_v9, %v4768_v52  ;;  %v6120_v55 = vadd.f32 %v6119_v4, %v6118_v62  ;;  %v6121_v56 = vpop.f32.mrb[62].mxu1  ;;  %v4838_v54 = vmax.f32 %v4806_v49, 0.0 }
 0x392   : > { %v6122_v57 = vpop.f32.mrb[63].mxu1 }
 0x393   : > { %v4839_v6 = vmax.f32 %v4807_v58, 0.0  ;;  %v4702_v14 = vadd.f32 %v8904_v46, %v6120_v55  ;;  %v6123_v16 = vadd.f32 %v6122_v57, %v6121_v56 }
 0x395   : > { %v4769_v41 = vmul.f32 %v8919_v22, %v4702_v14  ;;  %v4705_v2 = vadd.f32 %v8911_v27, %v6123_v16  ;;  %v4860_v24 = vpack.c.bf16 %v4839_v6, %v4838_v54 }
 0x397   : > { %v4808_v39 = vadd.f32 %v8925_v9, %v4769_v41  ;;  %v4770_v20 = vmul.f32 %v8919_v22, %v4705_v2  ;;  %v6124_v53 = vpop.f32.mrb[64].mxu1  ;;  %6292 = vmatprep.mubr.msk.bf16.mxu0 %vm3967_vm15, %v4860_v24 }
 0x398   : > { %v6125_v15 = vpop.f32.mrb[65].mxu1 }
 0x399   : > { %v4809_v42 = vadd.f32 %v8925_v9, %v4770_v20  ;;  %v6126_v60 = vadd.f32 %v6125_v15, %v6124_v53  ;;  %v6127_v19 = vpop.f32.mrb[66].mxu1  ;;  %v4840_v46 = vmax.f32 %v4808_v39, 0.0 }
 0x39a   : > { %v6128_v26 = vpop.f32.mrb[67].mxu1 }
 0x39b   : > { %v4841_v13 = vmax.f32 %v4809_v42, 0.0  ;;  %v4710_v3 = vadd.f32 %v6126_v60, %v8934_v36  ;;  %v6129_v32 = vadd.f32 %v6128_v26, %v6127_v19 }
 0x39d   : > { %v4771_v27 = vmul.f32 %v8919_v22, %v4710_v3  ;;  %v4713_v43 = vadd.f32 %v6129_v32, %v8939_v34  ;;  %v4861_v45 = vpack.c.bf16 %v4841_v13, %v4840_v46  ;;  %v6504_v13 = vld [vmem:[%s6706_s21] sm:$0xff]  }
 0x39e   : > { %v5169_v3 = vunpack.c.l.bf16 %v6504_v13 }
 0x39f   : > { %v4810_v59 = vadd.f32 %v8925_v9, %v4771_v27  ;;  %v4772_v40 = vmul.f32 %v8919_v22, %v4713_v43  ;;  %6293 = vmatmul.mubr.msk.bf16.gmra.mrb[68].mxu0 %vm3967_vm15, %v4861_v45 }
 0x3a1   : > { %v4811_v11 = vadd.f32 %v8925_v9, %v4772_v40  ;;  %v4842_v8 = vmax.f32 %v4810_v59, 0.0 }
 0x3a3   : > { %v4843_v23 = vmax.f32 %v4811_v11, 0.0  ;;  %v5170_v11 = vunpack.c.h.bf16 %v6504_v13 }
 0x3a4   : > { %v6130_v1 = vpop.f32.mrb[68].mxu1 }
 0x3a5   : > { %v4862_v50 = vpack.c.bf16 %v4843_v23, %v4842_v8  ;;  %v6131_v63 = vpop.f32.mrb[69].mxu1 }
 0x3a6   : > { %v6132_v36 = vadd.f32 %v6131_v63, %v6130_v1  ;;  %v6133_v48 = vpop.f32.mrb[70].mxu1 }
 0x3a7   : > { %6296 = vmatprep.mubr.msk.bf16.mxu0 %vm3967_vm15, %v4862_v50  ;;  %v6134_v31 = vpop.f32.mrb[71].mxu1 }
 0x3a8   : > { %v4718_v34 = vadd.f32 %v8932_v61, %v6132_v36  ;;  %v6135_v5 = vadd.f32 %v6134_v31, %v6133_v48 }
 0x3aa   : > { %v4773_v35 = vmul.f32 %v8919_v22, %v4718_v34  ;;  %v4721_v29 = vadd.f32 %v8936_v37, %v6135_v5 }
 0x3ac   : > { %v4812_v44 = vadd.f32 %v8925_v9, %v4773_v35  ;;  %v4774_v28 = vmul.f32 %v8919_v22, %v4721_v29  ;;  %v6136_v25 = vpop.f32.mrb[72].mxu1 }
 0x3ad   : > { %v6137_v12 = vpop.f32.mrb[73].mxu1 }
 0x3ae   : > { %v4813_v33 = vadd.f32 %v8925_v9, %v4774_v28  ;;  %v6138_v21 = vadd.f32 %v6137_v12, %v6136_v25  ;;  %v6139_v30 = vpop.f32.mrb[74].mxu1  ;;  %v4844_v7 = vmax.f32 %v4812_v44, 0.0  ;;  %v6505_v12 = vld [vmem:[%s6706_s21 + $0x18] sm:$0xff]  }
 0x3af   : > { %v6140_v18 = vpop.f32.mrb[75].mxu1 }
 0x3b0   : > { %v4845_v47 = vmax.f32 %v4813_v33, 0.0  ;;  %v6141_v0 = vadd.f32 %v6140_v18, %v6139_v30  ;;  %v4726_v61 = vadd.f32 %v6138_v21, %v8978_v51  ;;  %v5175_v33 = vunpack.c.l.bf16 %v6505_v12  ;;  %v6506_v18 = vld [vmem:[%s6706_s21 + $0x10] sm:$0xff]  }
 0x3b2   : > { %v4775_v49 = vmul.f32 %v8919_v22, %v4726_v61  ;;  %v4729_v37 = vadd.f32 %v6141_v0, %v8984_v17  ;;  %v4863_v52 = vpack.c.bf16 %v4845_v47, %v4844_v7  ;;  %v5173_v7 = vunpack.c.l.bf16 %v6506_v18 }
 0x3b3   : > { %v5176_v61 = vunpack.c.h.bf16 %v6505_v12 }
 0x3b4   : > { %v4814_v62 = vadd.f32 %v8925_v9, %v4775_v49  ;;  %v4776_v4 = vmul.f32 %v8919_v22, %v4729_v37  ;;  %6297 = vmatmul.mubr.msk.bf16.gmra.mrb[72].mxu0 %vm3967_vm15, %v4863_v52 }
 0x3b6   : > { %v4815_v58 = vadd.f32 %v8925_v9, %v4776_v4  ;;  %v4846_v55 = vmax.f32 %v4814_v62, 0.0  ;;  %v5174_v62 = vunpack.c.h.bf16 %v6506_v18 }
 0x3b8   : > { %v4847_v56 = vmax.f32 %v4815_v58, 0.0 }
 0x3ba   : > { %v4864_v57 = vpack.c.bf16 %v4847_v56, %v4846_v55 }
 0x3bc   : > { %6300 = vmatprep.mubr.msk.bf16.mxu0 %vm3967_vm15, %v4864_v57 }
 0x3bd   : > { %v6142_v54 = vpop.f32.mrb[76].mxu1 }
 0x3be   : > { %v6143_v51 = vpop.f32.mrb[77].mxu1 }
 0x3bf   : > { %v6144_v6 = vadd.f32 %v6143_v51, %v6142_v54  ;;  %v6145_v14 = vpop.f32.mrb[78].mxu1 }
 0x3c0   : > { %v6146_v17 = vpop.f32.mrb[79].mxu1 }
 0x3c1   : > { %v4734_v16 = vadd.f32 %v8976_v10, %v6144_v6  ;;  %v6147_v41 = vadd.f32 %v6146_v17, %v6145_v14  ;;  %v9057_v10 = vld [vmem:[%s9227_s8] ss:$0 sm:$0xff] }
 0x3c3   : > { %v4777_v2 = vmul.f32 %v8919_v22, %v4734_v16  ;;  %v4737_v24 = vadd.f32 %v8982_v38, %v6147_v41  ;;  %v9062_v38 = vld [vmem:[%s9228_s9] ss:$0 sm:$0xff] }
 0x3c5   : > { %v4816_v39 = vadd.f32 %v8925_v9, %v4777_v2  ;;  %v4778_v20 = vmul.f32 %v8919_v22, %v4737_v24  ;;  %v6503_v22 = vld [vmem:[%s6706_s21 + $0x8] sm:$0xff]  }
 0x3c6   : > { %v5171_v26 = vunpack.c.l.bf16 %v6503_v22  ;;  %v5172_v43 = vunpack.c.h.bf16 %v6503_v22 }
 0x3c7   : > { %v4817_v53 = vadd.f32 %v8925_v9, %v4778_v20  ;;  %v4848_v15 = vmax.f32 %v4816_v39, 0.0  ;;  %v6507_v20 = vld [vmem:[%s6706_s21 + $0x28] sm:$0xff]  }
 0x3c9   : > { %v4849_v42 = vmax.f32 %v4817_v53, 0.0  ;;  %v5179_v53 = vunpack.c.l.bf16 %v6507_v20 }
 0x3cb   : > { %v4865_v60 = vpack.c.bf16 %v4849_v42, %v4848_v15 }
 0x3cd   : > { %6301 = vmatmul.mubr.msk.bf16.gmra.mrb[76].mxu0 %vm3967_vm15, %v4865_v60  ;;  %v6508_v60 = vld [vmem:[%s6706_s21 + $0x20] sm:$0xff]  }
 0x41e   : > { %v6274_v19 = vpop.f32.mrb[48].mxu0 }
 0x41f   : > { %v5100_v9 = vmul.f32 %v6274_v19, %v9057_v10  ;;  %v4964_v46 = vpop.f32.mrb[49].mxu0  ;;  %v5177_v19 = vunpack.c.l.bf16 %v6508_v60 }
 0x420   : > { %v5098_v32 = vmul.f32 %v9057_v10, %v4964_v46  ;;  %v6275_v27 = vpop.f32.mrb[50].mxu0 }
 0x421   : > { %v5139_v45 = vadd.f32 %v9062_v38, %v5100_v9  ;;  %v5101_v59 = vmul.f32 %v6275_v27, %v9057_v10  ;;  %v4967_v40 = vpop.f32.mrb[51].mxu0  ;;  %v5180_v9 = vunpack.c.h.bf16 %v6507_v20 }
 0x422   : > { %v5137_v8 = vadd.f32 %v9062_v38, %v5098_v32  ;;  %v5099_v23 = vmul.f32 %v9057_v10, %v4967_v40  ;;  %v5178_v32 = vunpack.c.h.bf16 %v6508_v60 }
 0x423   : > { %v5203_v50 = vadd.f32 %v5171_v26, %v5139_v45  ;;  %v5140_v1 = vadd.f32 %v9062_v38, %v5101_v59 }
 0x424   : > { %v5201_v63 = vadd.f32 %v5169_v3, %v5137_v8  ;;  %v5138_v36 = vadd.f32 %v9062_v38, %v5099_v23 }
 0x425   : > { %v5204_v48 = vadd.f32 %v5172_v43, %v5140_v1  ;;  %v5235_v34 = vmax.f32 %v5203_v50, 0.0 }
 0x426   : > { %v5202_v31 = vadd.f32 %v5170_v11, %v5138_v36  ;;  %v5233_v35 = vmax.f32 %v5201_v63, 0.0 }
 0x427   : > { %v5236_v5 = vmax.f32 %v5204_v48, 0.0 }
 0x428   : > { %v5234_v29 = vmax.f32 %v5202_v31, 0.0 }
 0x429   : > { %v5925_v44 = vpack.c.bf16 %v5236_v5, %v5235_v34  ;;  %v6509_v5 = vld [vmem:[%s6706_s21 + $0x38] sm:$0xff]  }
 0x42a   : > { %v5920_v28 = vpack.c.bf16 %v5234_v29, %v5233_v35  ;;  %v5183_v35 = vunpack.c.l.bf16 %v6509_v5 }
 0x42b   : > { %5997 = vst [vmem:[%s9077_s29 + $0x8] sm:$0xff] %v5925_v44  }
 0x42c   : > { %5921 = vst [vmem:[%s9077_s29] sm:$0xff] %v5920_v28   ;;  %v6510_v28 = vld [vmem:[%s6706_s21 + $0x30] sm:$0xff]  }
 0x431   : > { %v6278_v25 = vpop.f32.mrb[52].mxu0 }
 0x432   : > { %v5104_v21 = vmul.f32 %v6278_v25, %v9057_v10  ;;  %v4980_v30 = vpop.f32.mrb[53].mxu0  ;;  %v5181_v25 = vunpack.c.l.bf16 %v6510_v28 }
 0x433   : > { %v5102_v47 = vmul.f32 %v9057_v10, %v4980_v30  ;;  %v6279_v0 = vpop.f32.mrb[54].mxu0 }
 0x434   : > { %v5143_v49 = vadd.f32 %v9062_v38, %v5104_v21  ;;  %v5105_v37 = vmul.f32 %v6279_v0, %v9057_v10  ;;  %v4983_v52 = vpop.f32.mrb[55].mxu0  ;;  %v5184_v21 = vunpack.c.h.bf16 %v6509_v5 }
 0x435   : > { %v5141_v4 = vadd.f32 %v9062_v38, %v5102_v47  ;;  %v5103_v58 = vmul.f32 %v9057_v10, %v4983_v52  ;;  %v5182_v47 = vunpack.c.h.bf16 %v6510_v28 }
 0x436   : > { %v5207_v55 = vadd.f32 %v5175_v33, %v5143_v49  ;;  %v5144_v56 = vadd.f32 %v9062_v38, %v5105_v37 }
 0x437   : > { %v5205_v57 = vadd.f32 %v5173_v7, %v5141_v4  ;;  %v5142_v54 = vadd.f32 %v9062_v38, %v5103_v58 }
 0x438   : > { %v5208_v51 = vadd.f32 %v5176_v61, %v5144_v56  ;;  %v5239_v14 = vmax.f32 %v5207_v55, 0.0 }
 0x439   : > { %v5206_v6 = vadd.f32 %v5174_v62, %v5142_v54  ;;  %v5237_v16 = vmax.f32 %v5205_v57, 0.0 }
 0x43a   : > { %v5240_v17 = vmax.f32 %v5208_v51, 0.0 }
 0x43b   : > { %v5238_v41 = vmax.f32 %v5206_v6, 0.0 }
 0x43c   : > { %v5935_v2 = vpack.c.bf16 %v5240_v17, %v5239_v14  ;;  %v6511_v17 = vld [vmem:[%s6706_s21 + $0x48] sm:$0xff]  }
 0x43d   : > { %v5930_v24 = vpack.c.bf16 %v5238_v41, %v5237_v16  ;;  %v5187_v16 = vunpack.c.l.bf16 %v6511_v17 }
 0x43e   : > { %5999 = vst [vmem:[%s9077_s29 + $0x18] sm:$0xff] %v5935_v2  }
 0x43f   : > { %5998 = vst [vmem:[%s9077_s29 + $0x10] sm:$0xff] %v5930_v24   ;;  %v6512_v24 = vld [vmem:[%s6706_s21 + $0x40] sm:$0xff]  }
 0x442   : > { %v6282_v39 = vpop.f32.mrb[56].mxu0 }
 0x443   : > { %v5108_v15 = vmul.f32 %v6282_v39, %v9057_v10  ;;  %v4996_v42 = vpop.f32.mrb[57].mxu0  ;;  %v5185_v39 = vunpack.c.l.bf16 %v6512_v24 }
 0x444   : > { %v5106_v22 = vmul.f32 %v9057_v10, %v4996_v42  ;;  %v6283_v26 = vpop.f32.mrb[58].mxu0 }
 0x445   : > { %v5147_v46 = vadd.f32 %v9062_v38, %v5108_v15  ;;  %v5109_v13 = vmul.f32 %v6283_v26, %v9057_v10  ;;  %v4999_v3 = vpop.f32.mrb[59].mxu0  ;;  %v5188_v15 = vunpack.c.h.bf16 %v6511_v17 }
 0x446   : > { %v5145_v27 = vadd.f32 %v9062_v38, %v5106_v22  ;;  %v5107_v43 = vmul.f32 %v9057_v10, %v4999_v3  ;;  %v5186_v22 = vunpack.c.h.bf16 %v6512_v24 }
 0x447   : > { %v5211_v45 = vadd.f32 %v5179_v53, %v5147_v46  ;;  %v5148_v59 = vadd.f32 %v9062_v38, %v5109_v13 }
 0x448   : > { %v5209_v40 = vadd.f32 %v5177_v19, %v5145_v27  ;;  %v5146_v11 = vadd.f32 %v9062_v38, %v5107_v43 }
 0x449   : > { %v5212_v8 = vadd.f32 %v5180_v9, %v5148_v59  ;;  %v5243_v50 = vmax.f32 %v5211_v45, 0.0 }
 0x44a   : > { %v5210_v23 = vadd.f32 %v5178_v32, %v5146_v11  ;;  %v5241_v63 = vmax.f32 %v5209_v40, 0.0 }
 0x44b   : > { %v5244_v1 = vmax.f32 %v5212_v8, 0.0 }
 0x44c   : > { %v5242_v36 = vmax.f32 %v5210_v23, 0.0 }
 0x44d   : > { %v5945_v48 = vpack.c.bf16 %v5244_v1, %v5243_v50  ;;  %v6513_v1 = vld [vmem:[%s6706_s21 + $0x58] sm:$0xff]  }
 0x44e   : > { %v5940_v31 = vpack.c.bf16 %v5242_v36, %v5241_v63  ;;  %v5191_v63 = vunpack.c.l.bf16 %v6513_v1 }
 0x44f   : > { %6001 = vst [vmem:[%s9077_s29 + $0x28] sm:$0xff] %v5945_v48  }
 0x450   : > { %6000 = vst [vmem:[%s9077_s29 + $0x20] sm:$0xff] %v5940_v31   ;;  %v6514_v31 = vld [vmem:[%s6706_s21 + $0x50] sm:$0xff]  }
 0x452   : > { %v6286_v34 = vpop.f32.mrb[60].mxu0 }
 0x453   : > { %v5112_v29 = vmul.f32 %v6286_v34, %v9057_v10  ;;  %v5012_v44 = vpop.f32.mrb[61].mxu0  ;;  %v5189_v34 = vunpack.c.l.bf16 %v6514_v31 }
 0x454   : > { %v5110_v12 = vmul.f32 %v9057_v10, %v5012_v44  ;;  %v6287_v33 = vpop.f32.mrb[62].mxu0 }
 0x455   : > { %v5151_v30 = vadd.f32 %v9062_v38, %v5112_v29  ;;  %v5113_v18 = vmul.f32 %v6287_v33, %v9057_v10  ;;  %v5015_v7 = vpop.f32.mrb[63].mxu0  ;;  %v5192_v29 = vunpack.c.h.bf16 %v6513_v1 }
 0x456   : > { %v5149_v0 = vadd.f32 %v9062_v38, %v5110_v12  ;;  %v5111_v61 = vmul.f32 %v9057_v10, %v5015_v7  ;;  %v5190_v12 = vunpack.c.h.bf16 %v6514_v31 }
 0x457   : > { %v5215_v49 = vadd.f32 %v5183_v35, %v5151_v30  ;;  %v5152_v37 = vadd.f32 %v9062_v38, %v5113_v18 }
 0x458   : > { %v5213_v52 = vadd.f32 %v5181_v25, %v5149_v0  ;;  %v5150_v62 = vadd.f32 %v9062_v38, %v5111_v61 }
 0x459   : > { %v5216_v4 = vadd.f32 %v5184_v21, %v5152_v37  ;;  %v5247_v55 = vmax.f32 %v5215_v49, 0.0 }
 0x45a   : > { %v5214_v58 = vadd.f32 %v5182_v47, %v5150_v62  ;;  %v5245_v57 = vmax.f32 %v5213_v52, 0.0 }
 0x45b   : > { %v5248_v56 = vmax.f32 %v5216_v4, 0.0 }
 0x45c   : > { %v5246_v54 = vmax.f32 %v5214_v58, 0.0 }
 0x45d   : > { %v5955_v51 = vpack.c.bf16 %v5248_v56, %v5247_v55  ;;  %v6515_v56 = vld [vmem:[%s6706_s21 + $0x68] sm:$0xff]  }
 0x45e   : > { %v5950_v6 = vpack.c.bf16 %v5246_v54, %v5245_v57  ;;  %v5195_v57 = vunpack.c.l.bf16 %v6515_v56 }
 0x45f   : > { %6003 = vst [vmem:[%s9077_s29 + $0x38] sm:$0xff] %v5955_v51  }
 0x460   : > { %6002 = vst [vmem:[%s9077_s29 + $0x30] sm:$0xff] %v5950_v6   ;;  %v6516_v6 = vld [vmem:[%s6706_s21 + $0x60] sm:$0xff]  }
 0x462   : > { %v6290_v14 = vpop.f32.mrb[64].mxu0 }
 0x463   : > { %v5116_v41 = vmul.f32 %v6290_v14, %v9057_v10  ;;  %v5028_v2 = vpop.f32.mrb[65].mxu0  ;;  %v5193_v14 = vunpack.c.l.bf16 %v6516_v6 }
 0x464   : > { %v5114_v20 = vmul.f32 %v9057_v10, %v5028_v2  ;;  %v6291_v53 = vpop.f32.mrb[66].mxu0 }
 0x465   : > { %v5155_v42 = vadd.f32 %v9062_v38, %v5116_v41  ;;  %v5117_v60 = vmul.f32 %v6291_v53, %v9057_v10  ;;  %v5031_v19 = vpop.f32.mrb[67].mxu0  ;;  %v5196_v41 = vunpack.c.h.bf16 %v6515_v56 }
 0x466   : > { %v5153_v26 = vadd.f32 %v9062_v38, %v5114_v20  ;;  %v5115_v9 = vmul.f32 %v9057_v10, %v5031_v19  ;;  %v5194_v20 = vunpack.c.h.bf16 %v6516_v6 }
 0x467   : > { %v5219_v46 = vadd.f32 %v5187_v16, %v5155_v42  ;;  %v5156_v13 = vadd.f32 %v9062_v38, %v5117_v60 }
 0x468   : > { %v5217_v3 = vadd.f32 %v5185_v39, %v5153_v26  ;;  %v5154_v32 = vadd.f32 %v9062_v38, %v5115_v9 }
 0x469   : > { %v5220_v27 = vadd.f32 %v5188_v15, %v5156_v13  ;;  %v5251_v45 = vmax.f32 %v5219_v46, 0.0 }
 0x46a   : > { %v5218_v43 = vadd.f32 %v5186_v22, %v5154_v32  ;;  %v5249_v40 = vmax.f32 %v5217_v3, 0.0 }
 0x46b   : > { %v5252_v59 = vmax.f32 %v5220_v27, 0.0 }
 0x46c   : > { %v5250_v11 = vmax.f32 %v5218_v43, 0.0 }
 0x46d   : > { %v5965_v8 = vpack.c.bf16 %v5252_v59, %v5251_v45  ;;  %v6517_v59 = vld [vmem:[%s6706_s21 + $0x78] sm:$0xff]  }
 0x46e   : > { %v5960_v23 = vpack.c.bf16 %v5250_v11, %v5249_v40  ;;  %v5199_v40 = vunpack.c.l.bf16 %v6517_v59 }
 0x46f   : > { %6005 = vst [vmem:[%s9077_s29 + $0x48] sm:$0xff] %v5965_v8  }
 0x470   : > { %6004 = vst [vmem:[%s9077_s29 + $0x40] sm:$0xff] %v5960_v23   ;;  %v6518_v23 = vld [vmem:[%s6706_s21 + $0x70] sm:$0xff]   ;;  %s5916_s21 = sshll.u32 %s6665_s17, 11  ;;  %s9176_s17 = scalar_lea.sflag [#allocation4], %s350_s20 }
 0x471   : > { %s9168_s26 = scalar_lea.hbm %s9229_s10, %s5916_s21  ;;  %s6525_s21 = scalar_lea.vmem %s6524_s28, 4096 }
 0x472   : > { %v6294_v50 = vpop.f32.mrb[68].mxu0  ;;  %p6527_p1 = scmp.lt.s32.totalorder %s6525_s21, %s6519_s27 }
 0x473   : > { %v5120_v36 = vmul.f32 %v6294_v50, %v9057_v10  ;;  %v5044_v48 = vpop.f32.mrb[69].mxu0  ;;  %v5197_v50 = vunpack.c.l.bf16 %v6518_v23 }
 0x474   : > { %v5118_v5 = vmul.f32 %v9057_v10, %v5044_v48  ;;  %v6295_v35 = vpop.f32.mrb[70].mxu0  ;;  %p6528_p2 = por %p6527_p1, %p6526_p0 }
 0x475   : > { %v5159_v44 = vadd.f32 %v9062_v38, %v5120_v36  ;;  %v5121_v28 = vmul.f32 %v6295_v35, %v9057_v10  ;;  %v5047_v25 = vpop.f32.mrb[71].mxu0  ;;  %v5200_v36 = vunpack.c.h.bf16 %v6517_v59 }
 0x476   : > { %v5157_v33 = vadd.f32 %v9062_v38, %v5118_v5  ;;  %v5119_v21 = vmul.f32 %v9057_v10, %v5047_v25  ;;  %v5198_v5 = vunpack.c.h.bf16 %v6518_v23  ;;  %p6529_p3 = pnand %p6528_p2, %p6522_p13 }
 0x477   : > { %v5223_v30 = vadd.f32 %v5191_v63, %v5159_v44  ;;  %v5160_v18 = vadd.f32 %v9062_v38, %v5121_v28 }
 0x478   : > { %v5221_v7 = vadd.f32 %v5189_v34, %v5157_v33  ;;  %v5158_v47 = vadd.f32 %v9062_v38, %v5119_v21 }
 0x479   : > { %v5224_v0 = vadd.f32 %v5192_v29, %v5160_v18  ;;  %v5255_v49 = vmax.f32 %v5223_v30, 0.0 }
 0x47a   : > { %v5222_v61 = vadd.f32 %v5190_v12, %v5158_v47  ;;  %v5253_v52 = vmax.f32 %v5221_v7, 0.0 }
 0x47b   : > { %v5256_v37 = vmax.f32 %v5224_v0, 0.0 }
 0x47c   : > { %v5254_v62 = vmax.f32 %v5222_v61, 0.0 }
 0x47d   : > { %v5975_v4 = vpack.c.bf16 %v5256_v37, %v5255_v49 }
 0x47e   : > { %v5970_v58 = vpack.c.bf16 %v5254_v62, %v5253_v52 }
 0x47f   : > { %6007 = vst [vmem:[%s9077_s29 + $0x58] sm:$0xff] %v5975_v4  }
 0x480   : > { %6006 = vst [vmem:[%s9077_s29 + $0x50] sm:$0xff] %v5970_v58  }
 0x487   : > { %v6298_v55 = vpop.f32.mrb[72].mxu0 }
 0x488   : > { %v5124_v54 = vmul.f32 %v6298_v55, %v9057_v10  ;;  %v5060_v51 = vpop.f32.mrb[73].mxu0 }
 0x489   : > { %v5122_v17 = vmul.f32 %v9057_v10, %v5060_v51  ;;  %v6299_v16 = vpop.f32.mrb[74].mxu0 }
 0x48a   : > { %v5163_v2 = vadd.f32 %v9062_v38, %v5124_v54  ;;  %v5125_v24 = vmul.f32 %v6299_v16, %v9057_v10  ;;  %v5063_v39 = vpop.f32.mrb[75].mxu0 }
 0x48b   : > { %v5161_v53 = vadd.f32 %v9062_v38, %v5122_v17  ;;  %v5123_v15 = vmul.f32 %v9057_v10, %v5063_v39 }
 0x48c   : > { %v5227_v42 = vadd.f32 %v5195_v57, %v5163_v2  ;;  %v5164_v60 = vadd.f32 %v9062_v38, %v5125_v24 }
 0x48d   : > { %v5225_v19 = vadd.f32 %v5193_v14, %v5161_v53  ;;  %v5162_v22 = vadd.f32 %v9062_v38, %v5123_v15 }
 0x48e   : > { %v5228_v26 = vadd.f32 %v5196_v41, %v5164_v60  ;;  %v5259_v46 = vmax.f32 %v5227_v42, 0.0 }
 0x48f   : > { %v5226_v9 = vadd.f32 %v5194_v20, %v5162_v22  ;;  %v5257_v3 = vmax.f32 %v5225_v19, 0.0 }
 0x490   : > { %v5260_v13 = vmax.f32 %v5228_v26, 0.0 }
 0x491   : > { %v5258_v32 = vmax.f32 %v5226_v9, 0.0 }
 0x492   : > { %v5985_v27 = vpack.c.bf16 %v5260_v13, %v5259_v46 }
 0x493   : > { %v5980_v43 = vpack.c.bf16 %v5258_v32, %v5257_v3 }
 0x494   : > { %6009 = vst [vmem:[%s9077_s29 + $0x68] sm:$0xff] %v5985_v27  }
 0x495   : > { %6008 = vst [vmem:[%s9077_s29 + $0x60] sm:$0xff] %v5980_v43  }
 0x4a0   : > { %v6302_v45 = vpop.f32.mrb[76].mxu0 }
 0x4a1   : > { %v5128_v11 = vmul.f32 %v6302_v45, %v9057_v10  ;;  %v5076_v8 = vpop.f32.mrb[77].mxu0 }
 0x4a2   : > { %v5126_v1 = vmul.f32 %v9057_v10, %v5076_v8  ;;  %v6303_v63 = vpop.f32.mrb[78].mxu0 }
 0x4a3   : > { %v5167_v48 = vadd.f32 %v9062_v38, %v5128_v11  ;;  %v5129_v31 = vmul.f32 %v6303_v63, %v9057_v10  ;;  %v5079_v34 = vpop.f32.mrb[79].mxu0 }
 0x4a4   : > { %v5165_v35 = vadd.f32 %v9062_v38, %v5126_v1  ;;  %v5127_v29 = vmul.f32 %v9057_v10, %v5079_v34 }
 0x4a5   : > { %v5231_v44 = vadd.f32 %v5199_v40, %v5167_v48  ;;  %v5168_v28 = vadd.f32 %v9062_v38, %v5129_v31 }
 0x4a6   : > { %v5229_v25 = vadd.f32 %v5197_v50, %v5165_v35  ;;  %v5166_v12 = vadd.f32 %v9062_v38, %v5127_v29 }
 0x4a7   : > { %v5232_v33 = vadd.f32 %v5200_v36, %v5168_v28  ;;  %v5263_v30 = vmax.f32 %v5231_v44, 0.0 }
 0x4a8   : > { %v5230_v21 = vadd.f32 %v5198_v5, %v5166_v12  ;;  %v5261_v7 = vmax.f32 %v5229_v25, 0.0 }
 0x4a9   : > { %v5264_v18 = vmax.f32 %v5232_v33, 0.0 }
 0x4aa   : > { %v5262_v47 = vmax.f32 %v5230_v21, 0.0 }
 0x4ab   : > { %v5995_v0 = vpack.c.bf16 %v5264_v18, %v5263_v30 }
 0x4ac   : > { %v5990_v10 = vpack.c.bf16 %v5262_v47, %v5261_v7 }
 0x4ad   : > { %6011 = vst [vmem:[%s9077_s29 + $0x78] sm:$0xff] %v5995_v0  }
 0x4ae   : > { %6010 = vst [vmem:[%s9077_s29 + $0x70] sm:$0xff] %v5990_v10  }
 0x4af   : > { %6532 = shalt.err (!%p6529_p3)
}
 0x4b0   : > { %s6533_s20 = scalar_lea.hbm %s9168_s26, 2048  ;;  %s6537_s12 = scalar_lea.hbm %s9229_s10, 4096 }
 0x4b1   : > { %p6534_p4 = scmp.ne.s32.totalorder %s9168_s26, %s6533_s20  ;;  %p6538_p9 = scmp.lt.u32.totalorder %s9168_s26, %s9229_s10 }
 0x4b2   : > { %p6539_p10 = scmp.lt.u32.totalorder %s6537_s12, %s6533_s20  ;;  %p6541_p12 = scmp.lt.u32.totalorder %s6533_s20, %s9168_s26 }
 0x4b3   : > { %p6535_p7 = pnand %p6534_p4, %p6682_p5 }
 0x4b4   : > { %p6540_p11 = por %p6539_p10, %p6538_p9 }
 0x4b5   : > { %p6536_p8 = pneg %p6535_p7 }
 0x4b6   : > { %p6542_p13 = por %p6541_p12, %p6540_p11 }
 0x4b8   : > { %p6543_p0 = pnand %p6542_p13, %p6536_p8 }
 0x4ba   : > { %6546 = shalt.err (!%p6543_p0)
}
 0x4bb   : > { %s6588_s27 = smov 4  }
 0x4bc   : > { %6320 = dma.vmem_to_hbm [thread:$0]  (%p6682_p5), %s9170_s30, 2048, %s9168_s26, %s9176_s17, %s6584_s25, %s6584_s25, %s6588_s27  }
 0x4bd PF: > { %p6326_p1 = scmp.ge.s32.totalorder %s6581_s16, 2  ;;  %s5454_s21 = sand.u32 1, %s6569_s13  }
 0x4be   : > { %s5455_s20 = scalar_lea.sflag [#allocation4], %s5454_s21 }
 0x4bf   : > { %p6323_p2 = pnand %p6326_p1, %p6686_p6 }
 0x4c1   : > { %6564 = dma.done.wait (!%p6323_p2), %s5455_s20, 2048  }
 0x4c2   : > { %6566 = vsyncadd (!%p6323_p2), %s5455_s20, 4294965248  ;;  %p20_p3 = scmp.ge.s32.totalorder %s6669_s19, 4   ;;  %s9484_s13 = smov %s6573_s14 }
 0x4c3   : > { %s9485_s14 = smov %s6577_s15  ;;  %s9486_s15 = smov %s6680_s22 }
 0x4c4   : > { %s9487_s16 = smov %s6669_s19  ;;  %22 = sbr.rel (!%p20_p3) target bundleno = 3 (0x3), region = 98 }
 0x4cb   :  { %5460 = vsyncpa [#allocation4], 1 }
 0x4cc   :  { %5462 = vsyncpa [#allocation4 + $0x1], 1 }

</bundles_post_ra>
